<compile_context>
chip_gen: v7x
topology: tpu7x:2x2x1
jax: 0.10.0
libtpu: 0.0.40
codegen_flags: <defaults>
</compile_context>

<pallas_src>
import numpy as np
import jax
import jax.numpy as jnp
from jax.experimental import pallas as pl
from jax.experimental.pallas import tpu as pltpu

# ----------------------------- model config (small ViT) -----------------------------
B = 2            # batch
IN_CH = 3        # image channels
IMG = 16         # image H = W
PATCH = 4        # patch size (kernel=stride=PATCH conv)
N_PATCH = (IMG // PATCH) ** 2           # 16 patches
SEQ = N_PATCH + 1                       # +1 CLS token -> 17
SP = 24                                 # per-image sequence padded to a multiple of 8 sublanes
CPP = IN_CH * PATCH * PATCH             # flattened patch length = 48
EMBED_DIM = 32
NUM_HEADS = 4
HEAD_DIM = EMBED_DIM // NUM_HEADS       # 8
MLP_DIM = 4 * EMBED_DIM                 # 128
DEPTH = 2
LN_EPS = 1e-6                           # ViT uses LayerNorm(eps=1e-6)
ATTN_SCALE = HEAD_DIM ** -0.5
INV_SQRT2 = 0.7071067811865476


# ----------------------------- fused Pallas kernel -----------------------------
def _vit_fused_kernel(xp_ref, patch_w_ref, add_ref, mask_ref,
                      ln1_g_ref, ln1_b_ref, qkv_w_ref, qkv_b_ref,
                      proj_w_ref, proj_b_ref, ln2_g_ref, ln2_b_ref,
                      fc1_w_ref, fc1_b_ref, fc2_w_ref, fc2_b_ref,
                      norm_g_ref, norm_b_ref, o_ref):
    """One grid step processes G images (G = ROWS // SP) end-to-end, fully resident in vregs."""
    ROWS = add_ref.shape[0]
    G = ROWS // SP

    def ln(xv, g, b):                      # LayerNorm stats kept in f32 (v5e-friendly)
        mu = jnp.mean(xv, axis=-1, keepdims=True)
        d = xv - mu
        var = jnp.mean(d * d, axis=-1, keepdims=True)
        return d * jax.lax.rsqrt(var + LN_EPS) * g + b

    def lin(xv, w, bias):                  # bf16 MXU matmul (weights pre-cast), f32 accumulation
        return jnp.dot(xv.astype(jnp.bfloat16), w,
                       preferred_element_type=jnp.float32) + bias

    def erf(z):
        # Abramowitz & Stegun 7.1.26 rational approximation, |err| < 1.5e-7
        # (exact-erf GELU semantics within f32 rounding; uses only exp + VPU math).
        a1, a2, a3, a4, a5 = (0.254829592, -0.284496736, 1.421413741,
                              -1.453152027, 1.061405429)
        pc = 0.3275911
        sgn = jnp.where(z >= 0.0, 1.0, -1.0)
        az = jnp.abs(z)
        t = 1.0 / (1.0 + pc * az)
        poly = ((((a5 * t + a4) * t + a3) * t + a2) * t + a1) * t
        return sgn * (1.0 - poly * jnp.exp(-az * az))

    def gelu(z):
        return 0.5 * z * (1.0 + erf(z * INV_SQRT2))

    # ---- patch embed (bf16 x bf16 -> f32); CLS/pos-embed/patch-bias pre-folded into add_ref ----
    x = jnp.dot(xp_ref[0], patch_w_ref[...],
                preferred_element_type=jnp.float32) + add_ref[...]          # (ROWS, D) f32

    # additive attention mask: 0 for valid same-image keys, -1e30 for padded / cross-image keys
    mask = mask_ref[...]                                                    # (ROWS, ROWS) f32

    for l in range(DEPTH):
        # ---------------- attention branch (pre-norm) ----------------
        h = ln(x, ln1_g_ref[l], ln1_b_ref[l])
        qkv = lin(h, qkv_w_ref[l], qkv_b_ref[l])                            # (ROWS, 3D) value

        heads = []
        for hd in range(NUM_HEADS):
            lo = hd * HEAD_DIM
            qh = qkv[:, lo:lo + HEAD_DIM].astype(jnp.bfloat16)              # scale folded into W_q
            kh = qkv[:, EMBED_DIM + lo:EMBED_DIM + lo + HEAD_DIM].astype(jnp.bfloat16)
            vh = qkv[:, 2 * EMBED_DIM + lo:2 * EMBED_DIM + lo + HEAD_DIM].astype(jnp.bfloat16)

            s = jax.lax.dot_general(qh, kh, (((1,), (1,)), ((), ())),
                                    preferred_element_type=jnp.float32) + mask
            s = s - jnp.max(s, axis=-1, keepdims=True)
            p = jnp.exp(s)
            p = p * pl.reciprocal(jnp.sum(p, axis=-1, keepdims=True), approx=True)
            heads.append(jnp.dot(p.astype(jnp.bfloat16), vh,
                                 preferred_element_type=jnp.float32))       # (ROWS, Dh)

        # head merge via static lane slots -> single output projection matmul
        merged = jnp.concatenate(heads, axis=-1).astype(jnp.bfloat16)       # (ROWS, D)
        attn = jnp.dot(merged, proj_w_ref[l],
                       preferred_element_type=jnp.float32) + proj_b_ref[l]
        x = x + attn

        # ---------------- MLP branch (pre-norm), GELU fused ----------------
        h2 = ln(x, ln2_g_ref[l], ln2_b_ref[l])
        f1 = gelu(lin(h2, fc1_w_ref[l], fc1_b_ref[l]))                      # (ROWS, MLP)
        x = x + lin(f1, fc2_w_ref[l], fc2_b_ref[l])

    # ---- final LayerNorm on the CLS row of each image in this grid step ----
    cls = jnp.concatenate([x[g * SP:g * SP + 1, :] for g in range(G)], axis=0)   # (G, D)
    o_ref[0] = ln(cls, norm_g_ref[...], norm_b_ref[...])


# ----------------------------- host-side packing -----------------------------
def _full_spec(shape):
    n = len(shape)
    return pl.BlockSpec(shape, lambda b, _n=n: (0,) * _n)


def images_per_step():
    """v7x (2 TensorCores/chip): keep one image per grid step so the 'parallel' batch axis maps
    across cores. Single-TC chips (v5e/v6e): fuse the whole batch into one grid step."""
    try:
        kind = jax.devices()[0].device_kind.lower()
    except Exception:
        kind = ""
    return 1 if "v7" in kind else B


def pack_params(params, group):
    """Stack per-layer weights, cast MXU operands to bf16, fold CLS/pos/patch-bias into one add
    term, fold the attention scale into the Q columns, and precompute the additive mask."""
    D = EMBED_DIM
    rows = group * SP

    def stack(name):
        return jnp.stack([blk[name] for blk in params["blocks"]], axis=0)

    # per-image additive term (CLS token + pos-embed + patch bias), replicated per image
    add = jnp.zeros((SP, D), jnp.float32)
    add = add.at[0].set(params["cls_token"].reshape(D) + params["pos_embed"][0, 0])
    add = add.at[1:SEQ].set(params["patch_b"][None, :] + params["pos_embed"][0, 1:SEQ])
    add = jnp.tile(add, (group, 1))                                      # (rows, D)

    # additive attention mask: valid iff same image and key index < SEQ within that image
    img = np.arange(rows) // SP
    col = np.arange(rows) % SP
    valid = (img[:, None] == img[None, :]) & (col[None, :] < SEQ)
    mask = np.where(valid, 0.0, -1e30).astype(np.float32)                # (rows, rows)

    # fold ATTN_SCALE into Q columns of qkv weights/bias
    qkv_w = stack("qkv_w")
    qkv_b = stack("qkv_b")
    qkv_w = qkv_w.at[:, :, :D].multiply(ATTN_SCALE)
    qkv_b = qkv_b.at[:, :D].multiply(ATTN_SCALE)

    return dict(
        patch_w=params["patch_w"].astype(jnp.bfloat16),
        add_term=add,
        attn_mask=jnp.asarray(mask),
        ln1_g=stack("ln1_g").reshape(DEPTH, 1, D),
        ln1_b=stack("ln1_b").reshape(DEPTH, 1, D),
        qkv_w=qkv_w.astype(jnp.bfloat16),
        qkv_b=qkv_b.reshape(DEPTH, 1, 3 * D),
        proj_w=stack("proj_w").astype(jnp.bfloat16),
        proj_b=stack("proj_b").reshape(DEPTH, 1, D),
        ln2_g=stack("ln2_g").reshape(DEPTH, 1, D),
        ln2_b=stack("ln2_b").reshape(DEPTH, 1, D),
        fc1_w=stack("fc1_w").astype(jnp.bfloat16),
        fc1_b=stack("fc1_b").reshape(DEPTH, 1, MLP_DIM),
        fc2_w=stack("fc2_w").astype(jnp.bfloat16),
        fc2_b=stack("fc2_b").reshape(DEPTH, 1, D),
        norm_g=params["norm_g"].reshape(1, D),
        norm_b=params["norm_b"].reshape(1, D),
    )


# ----------------------------- wrapper -----------------------------
@jax.jit
def vit_forward_features(x, pp):
    Bx, C, H, W = x.shape
    p = PATCH
    rows = pp["add_term"].shape[0]           # G*SP, static under jit
    G = rows // SP
    steps = Bx // G

    # unfold non-overlapping patches; each patch flattened in (c, i, j) order to match PyTorch
    # Conv2d(kernel=stride=patch) weight layout (O, C, p, p). Row 0 / rows >= SEQ of each image
    # are zero (CLS slot / sequence padding) so the in-kernel patch matmul produces exactly 0 there.
    xp = (x.reshape(Bx, C, H // p, p, W // p, p)
            .transpose(0, 2, 4, 1, 3, 5)
            .reshape(Bx, N_PATCH, C * p * p)).astype(jnp.bfloat16)
    xp_pad = jnp.zeros((Bx, SP, C * p * p), jnp.bfloat16).at[:, 1:SEQ, :].set(xp)
    xp_pad = xp_pad.reshape(steps, rows, C * p * p)

    out = pl.pallas_call(
        _vit_fused_kernel,
        grid=(steps,),
        in_specs=[
            pl.BlockSpec((1, rows, C * p * p), lambda b: (b, 0, 0)),   # per-step patches
            _full_spec(pp["patch_w"].shape),
            _full_spec(pp["add_term"].shape),
            _full_spec(pp["attn_mask"].shape),
            _full_spec(pp["ln1_g"].shape),
            _full_spec(pp["ln1_b"].shape),
            _full_spec(pp["qkv_w"].shape),
            _full_spec(pp["qkv_b"].shape),
            _full_spec(pp["proj_w"].shape),
            _full_spec(pp["proj_b"].shape),
            _full_spec(pp["ln2_g"].shape),
            _full_spec(pp["ln2_b"].shape),
            _full_spec(pp["fc1_w"].shape),
            _full_spec(pp["fc1_b"].shape),
            _full_spec(pp["fc2_w"].shape),
            _full_spec(pp["fc2_b"].shape),
            _full_spec(pp["norm_g"].shape),
            _full_spec(pp["norm_b"].shape),
        ],
        out_specs=pl.BlockSpec((1, G, EMBED_DIM), lambda b: (b, 0, 0)),
        out_shape=jax.ShapeDtypeStruct((steps, G, EMBED_DIM), jnp.float32),
        compiler_params=pltpu.CompilerParams(dimension_semantics=("parallel",)),
    )(xp_pad, pp["patch_w"], pp["add_term"], pp["attn_mask"],
      pp["ln1_g"], pp["ln1_b"], pp["qkv_w"], pp["qkv_b"],
      pp["proj_w"], pp["proj_b"], pp["ln2_g"], pp["ln2_b"],
      pp["fc1_w"], pp["fc1_b"], pp["fc2_w"], pp["fc2_b"],
      pp["norm_g"], pp["norm_b"])
    return out.reshape(Bx, EMBED_DIM)


# ----------------------------- deterministic param init -----------------------------
# TODO(synk): the original module loads pretrained `vit_model` weights; here we use deterministic
# random init since no checkpoint data is available in-script.
def init_params(key):
    keys = iter(jax.random.split(key, 8 + 8 * DEPTH))

    def nrm(shape, std=0.02):
        return (std * jax.random.normal(next(keys), shape)).astype(jnp.float32)

    params = dict(
        patch_w=nrm((CPP, EMBED_DIM)),
        patch_b=jnp.zeros((EMBED_DIM,), jnp.float32),
        cls_token=nrm((1, 1, EMBED_DIM)),
        pos_embed=nrm((1, SEQ, EMBED_DIM)),
        norm_g=jnp.ones((EMBED_DIM,), jnp.float32),
        norm_b=jnp.zeros((EMBED_DIM,), jnp.float32),
        blocks=[],
    )
    for _ in range(DEPTH):
        params["blocks"].append(
            dict(
                ln1_g=jnp.ones((EMBED_DIM,), jnp.float32),
                ln1_b=jnp.zeros((EMBED_DIM,), jnp.float32),
                qkv_w=nrm((EMBED_DIM, 3 * EMBED_DIM)),
                qkv_b=jnp.zeros((3 * EMBED_DIM,), jnp.float32),
                proj_w=nrm((EMBED_DIM, EMBED_DIM)),
                proj_b=jnp.zeros((EMBED_DIM,), jnp.float32),
                ln2_g=jnp.ones((EMBED_DIM,), jnp.float32),
                ln2_b=jnp.zeros((EMBED_DIM,), jnp.float32),
                fc1_w=nrm((EMBED_DIM, MLP_DIM)),
                fc1_b=jnp.zeros((MLP_DIM,), jnp.float32),
                fc2_w=nrm((MLP_DIM, EMBED_DIM)),
                fc2_b=jnp.zeros((EMBED_DIM,), jnp.float32),
            )
        )
    return params


# ----------------------------- main -----------------------------
if __name__ == "__main__":
    x = jax.random.normal(jax.random.PRNGKey(0), (B, IN_CH, IMG, IMG), dtype=jnp.float32)
    params = init_params(jax.random.PRNGKey(1))

    group = images_per_step()            # 1 image/step on v7x (2 TCs), whole batch fused otherwise
    packed = pack_params(params, group)  # one-time packing (stack layers, bf16 weights, fold consts)

    out = vit_forward_features(x, packed)
    out = jax.block_until_ready(out)

    assert out.shape == (B, EMBED_DIM), out.shape
    assert out.dtype == jnp.float32
    assert bool(jnp.all(jnp.isfinite(out)))
    print("KERNEL_OK")
</pallas_src>

<mosaic_0001>
module attributes {stable_mosaic.version = 11 : i64} {
  func.func @_vit_fused_kernel(%arg0: i32, %arg1: memref<1x48x48xbf16, #tpu.memory_space<vmem>>, %arg2: memref<48x32xbf16, #tpu.memory_space<vmem>>, %arg3: memref<48x32xf32, #tpu.memory_space<vmem>>, %arg4: memref<48x48xf32, #tpu.memory_space<vmem>>, %arg5: memref<2x1x32xf32, #tpu.memory_space<vmem>>, %arg6: memref<2x1x32xf32, #tpu.memory_space<vmem>>, %arg7: memref<2x32x96xbf16, #tpu.memory_space<vmem>>, %arg8: memref<2x1x96xf32, #tpu.memory_space<vmem>>, %arg9: memref<2x32x32xbf16, #tpu.memory_space<vmem>>, %arg10: memref<2x1x32xf32, #tpu.memory_space<vmem>>, %arg11: memref<2x1x32xf32, #tpu.memory_space<vmem>>, %arg12: memref<2x1x32xf32, #tpu.memory_space<vmem>>, %arg13: memref<2x32x128xbf16, #tpu.memory_space<vmem>>, %arg14: memref<2x1x128xf32, #tpu.memory_space<vmem>>, %arg15: memref<2x128x32xbf16, #tpu.memory_space<vmem>>, %arg16: memref<2x1x32xf32, #tpu.memory_space<vmem>>, %arg17: memref<1x32xf32, #tpu.memory_space<vmem>>, %arg18: memref<1x32xf32, #tpu.memory_space<vmem>>, %arg19: memref<1x2x32xf32, #tpu.memory_space<vmem>>) attributes {dimension_semantics = [#tpu.dimension_semantics<parallel>], iteration_bounds = array<i64: 1>, scalar_prefetch = 0 : i64, scratch_operands = 0 : i64, tpu.core_type = #tpu.core_type<tc>, window_params = [{transform_indices = @transform_0, window_bounds = array<i64: 1, 48, 48>}, {pipeline_mode = #tpu.pipeline_mode<synchronous>, transform_indices = @transform_1, window_bounds = array<i64: 48, 32>}, {pipeline_mode = #tpu.pipeline_mode<synchronous>, transform_indices = @transform_2, window_bounds = array<i64: 48, 32>}, {pipeline_mode = #tpu.pipeline_mode<synchronous>, transform_indices = @transform_3, window_bounds = array<i64: 48, 48>}, {pipeline_mode = #tpu.pipeline_mode<synchronous>, transform_indices = @transform_4, window_bounds = array<i64: 2, 1, 32>}, {pipeline_mode = #tpu.pipeline_mode<synchronous>, transform_indices = @transform_5, window_bounds = array<i64: 2, 1, 32>}, {pipeline_mode = #tpu.pipeline_mode<synchronous>, transform_indices = @transform_6, window_bounds = array<i64: 2, 32, 96>}, {pipeline_mode = #tpu.pipeline_mode<synchronous>, transform_indices = @transform_7, window_bounds = array<i64: 2, 1, 96>}, {pipeline_mode = #tpu.pipeline_mode<synchronous>, transform_indices = @transform_8, window_bounds = array<i64: 2, 32, 32>}, {pipeline_mode = #tpu.pipeline_mode<synchronous>, transform_indices = @transform_9, window_bounds = array<i64: 2, 1, 32>}, {pipeline_mode = #tpu.pipeline_mode<synchronous>, transform_indices = @transform_10, window_bounds = array<i64: 2, 1, 32>}, {pipeline_mode = #tpu.pipeline_mode<synchronous>, transform_indices = @transform_11, window_bounds = array<i64: 2, 1, 32>}, {pipeline_mode = #tpu.pipeline_mode<synchronous>, transform_indices = @transform_12, window_bounds = array<i64: 2, 32, 128>}, {pipeline_mode = #tpu.pipeline_mode<synchronous>, transform_indices = @transform_13, window_bounds = array<i64: 2, 1, 128>}, {pipeline_mode = #tpu.pipeline_mode<synchronous>, transform_indices = @transform_14, window_bounds = array<i64: 2, 128, 32>}, {pipeline_mode = #tpu.pipeline_mode<synchronous>, transform_indices = @transform_15, window_bounds = array<i64: 2, 1, 32>}, {pipeline_mode = #tpu.pipeline_mode<synchronous>, transform_indices = @transform_16, window_bounds = array<i64: 1, 32>}, {pipeline_mode = #tpu.pipeline_mode<synchronous>, transform_indices = @transform_17, window_bounds = array<i64: 1, 32>}, {transform_indices = @transform_18, window_bounds = array<i64: 1, 2, 32>}]} {
    %c0 = arith.constant 0 : index
    %c0_0 = arith.constant 0 : index
    %c0_1 = arith.constant 0 : index
    %0 = vector.load %arg1[%c0, %c0_0, %c0_1] : memref<1x48x48xbf16, #tpu.memory_space<vmem>>, vector<1x48x48xbf16>
    %1 = vector.shape_cast %0 : vector<1x48x48xbf16> to vector<48x48xbf16>
    %c0_2 = arith.constant 0 : index
    %c0_3 = arith.constant 0 : index
    %2 = vector.load %arg2[%c0_2, %c0_3] : memref<48x32xbf16, #tpu.memory_space<vmem>>, vector<48x32xbf16>
    %cst = arith.constant dense<0.000000e+00> : vector<48x32xf32>
    %3 = tpu.matmul %1, %2, %cst {dimension_numbers = #tpu.dot_dimension_numbers<[1], [0], [0], [1], [0, 0, 1, 1], [], []>} : vector<48x48xbf16>, vector<48x32xbf16>, vector<48x32xf32> -> vector<48x32xf32>
    %c0_4 = arith.constant 0 : index
    %c0_5 = arith.constant 0 : index
    %4 = vector.load %arg3[%c0_4, %c0_5] : memref<48x32xf32, #tpu.memory_space<vmem>>, vector<48x32xf32>
    %5 = arith.addf %3, %4 : vector<48x32xf32>
    %c0_6 = arith.constant 0 : index
    %c0_7 = arith.constant 0 : index
    %6 = vector.load %arg4[%c0_6, %c0_7] : memref<48x48xf32, #tpu.memory_space<vmem>>, vector<48x48xf32>
    %c0_8 = arith.constant 0 : index
    %c0_9 = arith.constant 0 : index
    %c0_10 = arith.constant 0 : index
    %7 = vector.load %arg5[%c0_8, %c0_9, %c0_10] : memref<2x1x32xf32, #tpu.memory_space<vmem>>, vector<1x1x32xf32>
    %8 = vector.shape_cast %7 : vector<1x1x32xf32> to vector<1x32xf32>
    %c0_11 = arith.constant 0 : index
    %c0_12 = arith.constant 0 : index
    %c0_13 = arith.constant 0 : index
    %9 = vector.load %arg6[%c0_11, %c0_12, %c0_13] : memref<2x1x32xf32, #tpu.memory_space<vmem>>, vector<1x1x32xf32>
    %10 = vector.shape_cast %9 : vector<1x1x32xf32> to vector<1x32xf32>
    %cst_14 = arith.constant dense<0.000000e+00> : vector<48xf32>
    %11 = vector.multi_reduction <add>, %5, %cst_14 [1] : vector<48x32xf32> to vector<48xf32>
    %12 = vector.shape_cast %11 : vector<48xf32> to vector<48x1xf32>
    %cst_15 = arith.constant 3.200000e+01 : f32
    %13 = vector.broadcast %cst_15 : f32 to vector<48x1xf32>
    %14 = arith.divf %12, %13 : vector<48x1xf32>
    %15 = vector.broadcast %14 : vector<48x1xf32> to vector<48x32xf32>
    %16 = arith.subf %5, %15 : vector<48x32xf32>
    %17 = arith.mulf %16, %16 : vector<48x32xf32>
    %cst_16 = arith.constant dense<0.000000e+00> : vector<48xf32>
    %18 = vector.multi_reduction <add>, %17, %cst_16 [1] : vector<48x32xf32> to vector<48xf32>
    %19 = vector.shape_cast %18 : vector<48xf32> to vector<48x1xf32>
    %cst_17 = arith.constant 3.200000e+01 : f32
    %20 = vector.broadcast %cst_17 : f32 to vector<48x1xf32>
    %21 = arith.divf %19, %20 : vector<48x1xf32>
    %cst_18 = arith.constant 9.99999997E-7 : f32
    %22 = vector.broadcast %cst_18 : f32 to vector<48x1xf32>
    %23 = arith.addf %21, %22 : vector<48x1xf32>
    %24 = math.rsqrt %23 : vector<48x1xf32>
    %25 = vector.broadcast %24 : vector<48x1xf32> to vector<48x32xf32>
    %26 = arith.mulf %16, %25 : vector<48x32xf32>
    %27 = vector.broadcast %8 : vector<1x32xf32> to vector<48x32xf32>
    %28 = arith.mulf %26, %27 : vector<48x32xf32>
    %29 = vector.broadcast %10 : vector<1x32xf32> to vector<48x32xf32>
    %30 = arith.addf %28, %29 : vector<48x32xf32>
    %c0_19 = arith.constant 0 : index
    %c0_20 = arith.constant 0 : index
    %c0_21 = arith.constant 0 : index
    %31 = vector.load %arg7[%c0_19, %c0_20, %c0_21] : memref<2x32x96xbf16, #tpu.memory_space<vmem>>, vector<1x32x96xbf16>
    %32 = vector.shape_cast %31 : vector<1x32x96xbf16> to vector<32x96xbf16>
    %c0_22 = arith.constant 0 : index
    %c0_23 = arith.constant 0 : index
    %c0_24 = arith.constant 0 : index
    %33 = vector.load %arg8[%c0_22, %c0_23, %c0_24] : memref<2x1x96xf32, #tpu.memory_space<vmem>>, vector<1x1x96xf32>
    %34 = vector.shape_cast %33 : vector<1x1x96xf32> to vector<1x96xf32>
    %35 = arith.truncf %30 : vector<48x32xf32> to vector<48x32xbf16>
    %cst_25 = arith.constant dense<0.000000e+00> : vector<48x96xf32>
    %36 = tpu.matmul %35, %32, %cst_25 {dimension_numbers = #tpu.dot_dimension_numbers<[1], [0], [0], [1], [0, 0, 1, 1], [], []>} : vector<48x32xbf16>, vector<32x96xbf16>, vector<48x96xf32> -> vector<48x96xf32>
    %37 = vector.broadcast %34 : vector<1x96xf32> to vector<48x96xf32>
    %38 = arith.addf %36, %37 : vector<48x96xf32>
    %39 = vector.extract_strided_slice %38 {offsets = [0, 0], sizes = [48, 8], strides = [1, 1]} : vector<48x96xf32> to vector<48x8xf32>
    %40 = arith.truncf %39 : vector<48x8xf32> to vector<48x8xbf16>
    %41 = vector.extract_strided_slice %38 {offsets = [0, 32], sizes = [48, 8], strides = [1, 1]} : vector<48x96xf32> to vector<48x8xf32>
    %42 = arith.truncf %41 : vector<48x8xf32> to vector<48x8xbf16>
    %43 = vector.extract_strided_slice %38 {offsets = [0, 64], sizes = [48, 8], strides = [1, 1]} : vector<48x96xf32> to vector<48x8xf32>
    %44 = arith.truncf %43 : vector<48x8xf32> to vector<48x8xbf16>
    %cst_26 = arith.constant dense<0.000000e+00> : vector<48x48xf32>
    %45 = tpu.matmul %40, %42, %cst_26 {dimension_numbers = #tpu.dot_dimension_numbers<[1], [1], [0], [0], [0, 0, 1, 0], [], []>} : vector<48x8xbf16>, vector<48x8xbf16>, vector<48x48xf32> -> vector<48x48xf32>
    %46 = arith.addf %45, %6 : vector<48x48xf32>
    %cst_27 = arith.constant dense<0xFF800000> : vector<48xf32>
    %47 = vector.multi_reduction <maximumf>, %46, %cst_27 [1] : vector<48x48xf32> to vector<48xf32>
    %48 = vector.shape_cast %47 : vector<48xf32> to vector<48x1xf32>
    %49 = vector.broadcast %48 : vector<48x1xf32> to vector<48x48xf32>
    %50 = arith.subf %46, %49 : vector<48x48xf32>
    %51 = math.exp %50 : vector<48x48xf32>
    %cst_28 = arith.constant dense<0.000000e+00> : vector<48xf32>
    %52 = vector.multi_reduction <add>, %51, %cst_28 [1] : vector<48x48xf32> to vector<48xf32>
    %53 = vector.shape_cast %52 : vector<48xf32> to vector<48x1xf32>
    %54 = tpu.reciprocal %53 {approx = true} : vector<48x1xf32> -> vector<48x1xf32>
    %55 = vector.broadcast %54 : vector<48x1xf32> to vector<48x48xf32>
    %56 = arith.mulf %51, %55 : vector<48x48xf32>
    %57 = arith.truncf %56 : vector<48x48xf32> to vector<48x48xbf16>
    %cst_29 = arith.constant dense<0.000000e+00> : vector<48x8xf32>
    %58 = tpu.matmul %57, %44, %cst_29 {dimension_numbers = #tpu.dot_dimension_numbers<[1], [0], [0], [1], [0, 0, 1, 1], [], []>} : vector<48x48xbf16>, vector<48x8xbf16>, vector<48x8xf32> -> vector<48x8xf32>
    %59 = vector.extract_strided_slice %38 {offsets = [0, 8], sizes = [48, 8], strides = [1, 1]} : vector<48x96xf32> to vector<48x8xf32>
    %60 = arith.truncf %59 : vector<48x8xf32> to vector<48x8xbf16>
    %61 = vector.extract_strided_slice %38 {offsets = [0, 40], sizes = [48, 8], strides = [1, 1]} : vector<48x96xf32> to vector<48x8xf32>
    %62 = arith.truncf %61 : vector<48x8xf32> to vector<48x8xbf16>
    %63 = vector.extract_strided_slice %38 {offsets = [0, 72], sizes = [48, 8], strides = [1, 1]} : vector<48x96xf32> to vector<48x8xf32>
    %64 = arith.truncf %63 : vector<48x8xf32> to vector<48x8xbf16>
    %cst_30 = arith.constant dense<0.000000e+00> : vector<48x48xf32>
    %65 = tpu.matmul %60, %62, %cst_30 {dimension_numbers = #tpu.dot_dimension_numbers<[1], [1], [0], [0], [0, 0, 1, 0], [], []>} : vector<48x8xbf16>, vector<48x8xbf16>, vector<48x48xf32> -> vector<48x48xf32>
    %66 = arith.addf %65, %6 : vector<48x48xf32>
    %cst_31 = arith.constant dense<0xFF800000> : vector<48xf32>
    %67 = vector.multi_reduction <maximumf>, %66, %cst_31 [1] : vector<48x48xf32> to vector<48xf32>
    %68 = vector.shape_cast %67 : vector<48xf32> to vector<48x1xf32>
    %69 = vector.broadcast %68 : vector<48x1xf32> to vector<48x48xf32>
    %70 = arith.subf %66, %69 : vector<48x48xf32>
    %71 = math.exp %70 : vector<48x48xf32>
    %cst_32 = arith.constant dense<0.000000e+00> : vector<48xf32>
    %72 = vector.multi_reduction <add>, %71, %cst_32 [1] : vector<48x48xf32> to vector<48xf32>
    %73 = vector.shape_cast %72 : vector<48xf32> to vector<48x1xf32>
    %74 = tpu.reciprocal %73 {approx = true} : vector<48x1xf32> -> vector<48x1xf32>
    %75 = vector.broadcast %74 : vector<48x1xf32> to vector<48x48xf32>
    %76 = arith.mulf %71, %75 : vector<48x48xf32>
    %77 = arith.truncf %76 : vector<48x48xf32> to vector<48x48xbf16>
    %cst_33 = arith.constant dense<0.000000e+00> : vector<48x8xf32>
    %78 = tpu.matmul %77, %64, %cst_33 {dimension_numbers = #tpu.dot_dimension_numbers<[1], [0], [0], [1], [0, 0, 1, 1], [], []>} : vector<48x48xbf16>, vector<48x8xbf16>, vector<48x8xf32> -> vector<48x8xf32>
    %79 = vector.extract_strided_slice %38 {offsets = [0, 16], sizes = [48, 8], strides = [1, 1]} : vector<48x96xf32> to vector<48x8xf32>
    %80 = arith.truncf %79 : vector<48x8xf32> to vector<48x8xbf16>
    %81 = vector.extract_strided_slice %38 {offsets = [0, 48], sizes = [48, 8], strides = [1, 1]} : vector<48x96xf32> to vector<48x8xf32>
    %82 = arith.truncf %81 : vector<48x8xf32> to vector<48x8xbf16>
    %83 = vector.extract_strided_slice %38 {offsets = [0, 80], sizes = [48, 8], strides = [1, 1]} : vector<48x96xf32> to vector<48x8xf32>
    %84 = arith.truncf %83 : vector<48x8xf32> to vector<48x8xbf16>
    %cst_34 = arith.constant dense<0.000000e+00> : vector<48x48xf32>
    %85 = tpu.matmul %80, %82, %cst_34 {dimension_numbers = #tpu.dot_dimension_numbers<[1], [1], [0], [0], [0, 0, 1, 0], [], []>} : vector<48x8xbf16>, vector<48x8xbf16>, vector<48x48xf32> -> vector<48x48xf32>
    %86 = arith.addf %85, %6 : vector<48x48xf32>
    %cst_35 = arith.constant dense<0xFF800000> : vector<48xf32>
    %87 = vector.multi_reduction <maximumf>, %86, %cst_35 [1] : vector<48x48xf32> to vector<48xf32>
    %88 = vector.shape_cast %87 : vector<48xf32> to vector<48x1xf32>
    %89 = vector.broadcast %88 : vector<48x1xf32> to vector<48x48xf32>
    %90 = arith.subf %86, %89 : vector<48x48xf32>
    %91 = math.exp %90 : vector<48x48xf32>
    %cst_36 = arith.constant dense<0.000000e+00> : vector<48xf32>
    %92 = vector.multi_reduction <add>, %91, %cst_36 [1] : vector<48x48xf32> to vector<48xf32>
    %93 = vector.shape_cast %92 : vector<48xf32> to vector<48x1xf32>
    %94 = tpu.reciprocal %93 {approx = true} : vector<48x1xf32> -> vector<48x1xf32>
    %95 = vector.broadcast %94 : vector<48x1xf32> to vector<48x48xf32>
    %96 = arith.mulf %91, %95 : vector<48x48xf32>
    %97 = arith.truncf %96 : vector<48x48xf32> to vector<48x48xbf16>
    %cst_37 = arith.constant dense<0.000000e+00> : vector<48x8xf32>
    %98 = tpu.matmul %97, %84, %cst_37 {dimension_numbers = #tpu.dot_dimension_numbers<[1], [0], [0], [1], [0, 0, 1, 1], [], []>} : vector<48x48xbf16>, vector<48x8xbf16>, vector<48x8xf32> -> vector<48x8xf32>
    %99 = vector.extract_strided_slice %38 {offsets = [0, 24], sizes = [48, 8], strides = [1, 1]} : vector<48x96xf32> to vector<48x8xf32>
    %100 = arith.truncf %99 : vector<48x8xf32> to vector<48x8xbf16>
    %101 = vector.extract_strided_slice %38 {offsets = [0, 56], sizes = [48, 8], strides = [1, 1]} : vector<48x96xf32> to vector<48x8xf32>
    %102 = arith.truncf %101 : vector<48x8xf32> to vector<48x8xbf16>
    %103 = vector.extract_strided_slice %38 {offsets = [0, 88], sizes = [48, 8], strides = [1, 1]} : vector<48x96xf32> to vector<48x8xf32>
    %104 = arith.truncf %103 : vector<48x8xf32> to vector<48x8xbf16>
    %cst_38 = arith.constant dense<0.000000e+00> : vector<48x48xf32>
    %105 = tpu.matmul %100, %102, %cst_38 {dimension_numbers = #tpu.dot_dimension_numbers<[1], [1], [0], [0], [0, 0, 1, 0], [], []>} : vector<48x8xbf16>, vector<48x8xbf16>, vector<48x48xf32> -> vector<48x48xf32>
    %106 = arith.addf %105, %6 : vector<48x48xf32>
    %cst_39 = arith.constant dense<0xFF800000> : vector<48xf32>
    %107 = vector.multi_reduction <maximumf>, %106, %cst_39 [1] : vector<48x48xf32> to vector<48xf32>
    %108 = vector.shape_cast %107 : vector<48xf32> to vector<48x1xf32>
    %109 = vector.broadcast %108 : vector<48x1xf32> to vector<48x48xf32>
    %110 = arith.subf %106, %109 : vector<48x48xf32>
    %111 = math.exp %110 : vector<48x48xf32>
    %cst_40 = arith.constant dense<0.000000e+00> : vector<48xf32>
    %112 = vector.multi_reduction <add>, %111, %cst_40 [1] : vector<48x48xf32> to vector<48xf32>
    %113 = vector.shape_cast %112 : vector<48xf32> to vector<48x1xf32>
    %114 = tpu.reciprocal %113 {approx = true} : vector<48x1xf32> -> vector<48x1xf32>
    %115 = vector.broadcast %114 : vector<48x1xf32> to vector<48x48xf32>
    %116 = arith.mulf %111, %115 : vector<48x48xf32>
    %117 = arith.truncf %116 : vector<48x48xf32> to vector<48x48xbf16>
    %cst_41 = arith.constant dense<0.000000e+00> : vector<48x8xf32>
    %118 = tpu.matmul %117, %104, %cst_41 {dimension_numbers = #tpu.dot_dimension_numbers<[1], [0], [0], [1], [0, 0, 1, 1], [], []>} : vector<48x48xbf16>, vector<48x8xbf16>, vector<48x8xf32> -> vector<48x8xf32>
    %119 = tpu.concatenate %58, %78, %98, %118 in 1 : vector<48x8xf32>, vector<48x8xf32>, vector<48x8xf32>, vector<48x8xf32> -> vector<48x32xf32>
    %120 = arith.truncf %119 : vector<48x32xf32> to vector<48x32xbf16>
    %c0_42 = arith.constant 0 : index
    %c0_43 = arith.constant 0 : index
    %c0_44 = arith.constant 0 : index
    %121 = vector.load %arg9[%c0_42, %c0_43, %c0_44] : memref<2x32x32xbf16, #tpu.memory_space<vmem>>, vector<1x32x32xbf16>
    %122 = vector.shape_cast %121 : vector<1x32x32xbf16> to vector<32x32xbf16>
    %cst_45 = arith.constant dense<0.000000e+00> : vector<48x32xf32>
    %123 = tpu.matmul %120, %122, %cst_45 {dimension_numbers = #tpu.dot_dimension_numbers<[1], [0], [0], [1], [0, 0, 1, 1], [], []>} : vector<48x32xbf16>, vector<32x32xbf16>, vector<48x32xf32> -> vector<48x32xf32>
    %c0_46 = arith.constant 0 : index
    %c0_47 = arith.constant 0 : index
    %c0_48 = arith.constant 0 : index
    %124 = vector.load %arg10[%c0_46, %c0_47, %c0_48] : memref<2x1x32xf32, #tpu.memory_space<vmem>>, vector<1x1x32xf32>
    %125 = vector.shape_cast %124 : vector<1x1x32xf32> to vector<1x32xf32>
    %126 = vector.broadcast %125 : vector<1x32xf32> to vector<48x32xf32>
    %127 = arith.addf %123, %126 : vector<48x32xf32>
    %128 = arith.addf %5, %127 : vector<48x32xf32>
    %c0_49 = arith.constant 0 : index
    %c0_50 = arith.constant 0 : index
    %c0_51 = arith.constant 0 : index
    %129 = vector.load %arg11[%c0_49, %c0_50, %c0_51] : memref<2x1x32xf32, #tpu.memory_space<vmem>>, vector<1x1x32xf32>
    %130 = vector.shape_cast %129 : vector<1x1x32xf32> to vector<1x32xf32>
    %c0_52 = arith.constant 0 : index
    %c0_53 = arith.constant 0 : index
    %c0_54 = arith.constant 0 : index
    %131 = vector.load %arg12[%c0_52, %c0_53, %c0_54] : memref<2x1x32xf32, #tpu.memory_space<vmem>>, vector<1x1x32xf32>
    %132 = vector.shape_cast %131 : vector<1x1x32xf32> to vector<1x32xf32>
    %cst_55 = arith.constant dense<0.000000e+00> : vector<48xf32>
    %133 = vector.multi_reduction <add>, %128, %cst_55 [1] : vector<48x32xf32> to vector<48xf32>
    %134 = vector.shape_cast %133 : vector<48xf32> to vector<48x1xf32>
    %cst_56 = arith.constant 3.200000e+01 : f32
    %135 = vector.broadcast %cst_56 : f32 to vector<48x1xf32>
    %136 = arith.divf %134, %135 : vector<48x1xf32>
    %137 = vector.broadcast %136 : vector<48x1xf32> to vector<48x32xf32>
    %138 = arith.subf %128, %137 : vector<48x32xf32>
    %139 = arith.mulf %138, %138 : vector<48x32xf32>
    %cst_57 = arith.constant dense<0.000000e+00> : vector<48xf32>
    %140 = vector.multi_reduction <add>, %139, %cst_57 [1] : vector<48x32xf32> to vector<48xf32>
    %141 = vector.shape_cast %140 : vector<48xf32> to vector<48x1xf32>
    %cst_58 = arith.constant 3.200000e+01 : f32
    %142 = vector.broadcast %cst_58 : f32 to vector<48x1xf32>
    %143 = arith.divf %141, %142 : vector<48x1xf32>
    %cst_59 = arith.constant 9.99999997E-7 : f32
    %144 = vector.broadcast %cst_59 : f32 to vector<48x1xf32>
    %145 = arith.addf %143, %144 : vector<48x1xf32>
    %146 = math.rsqrt %145 : vector<48x1xf32>
    %147 = vector.broadcast %146 : vector<48x1xf32> to vector<48x32xf32>
    %148 = arith.mulf %138, %147 : vector<48x32xf32>
    %149 = vector.broadcast %130 : vector<1x32xf32> to vector<48x32xf32>
    %150 = arith.mulf %148, %149 : vector<48x32xf32>
    %151 = vector.broadcast %132 : vector<1x32xf32> to vector<48x32xf32>
    %152 = arith.addf %150, %151 : vector<48x32xf32>
    %c0_60 = arith.constant 0 : index
    %c0_61 = arith.constant 0 : index
    %c0_62 = arith.constant 0 : index
    %153 = vector.load %arg13[%c0_60, %c0_61, %c0_62] : memref<2x32x128xbf16, #tpu.memory_space<vmem>>, vector<1x32x128xbf16>
    %154 = vector.shape_cast %153 : vector<1x32x128xbf16> to vector<32x128xbf16>
    %c0_63 = arith.constant 0 : index
    %c0_64 = arith.constant 0 : index
    %c0_65 = arith.constant 0 : index
    %155 = vector.load %arg14[%c0_63, %c0_64, %c0_65] : memref<2x1x128xf32, #tpu.memory_space<vmem>>, vector<1x1x128xf32>
    %156 = vector.shape_cast %155 : vector<1x1x128xf32> to vector<1x128xf32>
    %157 = arith.truncf %152 : vector<48x32xf32> to vector<48x32xbf16>
    %cst_66 = arith.constant dense<0.000000e+00> : vector<48x128xf32>
    %158 = tpu.matmul %157, %154, %cst_66 {dimension_numbers = #tpu.dot_dimension_numbers<[1], [0], [0], [1], [0, 0, 1, 1], [], []>} : vector<48x32xbf16>, vector<32x128xbf16>, vector<48x128xf32> -> vector<48x128xf32>
    %159 = vector.broadcast %156 : vector<1x128xf32> to vector<48x128xf32>
    %160 = arith.addf %158, %159 : vector<48x128xf32>
    %cst_67 = arith.constant 5.000000e-01 : f32
    %161 = vector.broadcast %cst_67 : f32 to vector<48x128xf32>
    %162 = arith.mulf %161, %160 : vector<48x128xf32>
    %cst_68 = arith.constant 0.707106769 : f32
    %163 = vector.broadcast %cst_68 : f32 to vector<48x128xf32>
    %164 = arith.mulf %160, %163 : vector<48x128xf32>
    %cst_69 = arith.constant 0.000000e+00 : f32
    %165 = vector.broadcast %cst_69 : f32 to vector<48x128xf32>
    %166 = arith.cmpf oge, %164, %165 : vector<48x128xf32>
    %cst_70 = arith.constant 1.000000e+00 : f32
    %cst_71 = arith.constant -1.000000e+00 : f32
    %167 = vector.broadcast %cst_70 : f32 to vector<48x128xf32>
    %168 = vector.broadcast %cst_71 : f32 to vector<48x128xf32>
    %169 = arith.select %166, %167, %168 : vector<48x128xi1>, vector<48x128xf32>
    %170 = math.absf %164 : vector<48x128xf32>
    %cst_72 = arith.constant 0.327591091 : f32
    %171 = vector.broadcast %cst_72 : f32 to vector<48x128xf32>
    %172 = arith.mulf %171, %170 : vector<48x128xf32>
    %cst_73 = arith.constant 1.000000e+00 : f32
    %173 = vector.broadcast %cst_73 : f32 to vector<48x128xf32>
    %174 = arith.addf %173, %172 : vector<48x128xf32>
    %cst_74 = arith.constant 1.000000e+00 : f32
    %175 = vector.broadcast %cst_74 : f32 to vector<48x128xf32>
    %176 = arith.divf %175, %174 : vector<48x128xf32>
    %cst_75 = arith.constant 1.06140542 : f32
    %177 = vector.broadcast %cst_75 : f32 to vector<48x128xf32>
    %178 = arith.mulf %177, %176 : vector<48x128xf32>
    %cst_76 = arith.constant -1.45315206 : f32
    %179 = vector.broadcast %cst_76 : f32 to vector<48x128xf32>
    %180 = arith.addf %178, %179 : vector<48x128xf32>
    %181 = arith.mulf %180, %176 : vector<48x128xf32>
    %cst_77 = arith.constant 1.42141378 : f32
    %182 = vector.broadcast %cst_77 : f32 to vector<48x128xf32>
    %183 = arith.addf %181, %182 : vector<48x128xf32>
    %184 = arith.mulf %183, %176 : vector<48x128xf32>
    %cst_78 = arith.constant -0.284496725 : f32
    %185 = vector.broadcast %cst_78 : f32 to vector<48x128xf32>
    %186 = arith.addf %184, %185 : vector<48x128xf32>
    %187 = arith.mulf %186, %176 : vector<48x128xf32>
    %cst_79 = arith.constant 0.254829586 : f32
    %188 = vector.broadcast %cst_79 : f32 to vector<48x128xf32>
    %189 = arith.addf %187, %188 : vector<48x128xf32>
    %190 = arith.mulf %189, %176 : vector<48x128xf32>
    %cst_80 = arith.constant 0.000000e+00 : f32
    %191 = vector.broadcast %cst_80 : f32 to vector<48x128xf32>
    %192 = arith.subf %191, %170 : vector<48x128xf32>
    %193 = arith.mulf %192, %170 : vector<48x128xf32>
    %194 = math.exp %193 : vector<48x128xf32>
    %195 = arith.mulf %190, %194 : vector<48x128xf32>
    %cst_81 = arith.constant 1.000000e+00 : f32
    %196 = vector.broadcast %cst_81 : f32 to vector<48x128xf32>
    %197 = arith.subf %196, %195 : vector<48x128xf32>
    %198 = arith.mulf %169, %197 : vector<48x128xf32>
    %cst_82 = arith.constant 1.000000e+00 : f32
    %199 = vector.broadcast %cst_82 : f32 to vector<48x128xf32>
    %200 = arith.addf %199, %198 : vector<48x128xf32>
    %201 = arith.mulf %162, %200 : vector<48x128xf32>
    %c0_83 = arith.constant 0 : index
    %c0_84 = arith.constant 0 : index
    %c0_85 = arith.constant 0 : index
    %202 = vector.load %arg15[%c0_83, %c0_84, %c0_85] : memref<2x128x32xbf16, #tpu.memory_space<vmem>>, vector<1x128x32xbf16>
    %203 = vector.shape_cast %202 : vector<1x128x32xbf16> to vector<128x32xbf16>
    %c0_86 = arith.constant 0 : index
    %c0_87 = arith.constant 0 : index
    %c0_88 = arith.constant 0 : index
    %204 = vector.load %arg16[%c0_86, %c0_87, %c0_88] : memref<2x1x32xf32, #tpu.memory_space<vmem>>, vector<1x1x32xf32>
    %205 = vector.shape_cast %204 : vector<1x1x32xf32> to vector<1x32xf32>
    %206 = arith.truncf %201 : vector<48x128xf32> to vector<48x128xbf16>
    %cst_89 = arith.constant dense<0.000000e+00> : vector<48x32xf32>
    %207 = tpu.matmul %206, %203, %cst_89 {dimension_numbers = #tpu.dot_dimension_numbers<[1], [0], [0], [1], [0, 0, 1, 1], [], []>} : vector<48x128xbf16>, vector<128x32xbf16>, vector<48x32xf32> -> vector<48x32xf32>
    %208 = vector.broadcast %205 : vector<1x32xf32> to vector<48x32xf32>
    %209 = arith.addf %207, %208 : vector<48x32xf32>
    %210 = arith.addf %128, %209 : vector<48x32xf32>
    %c1 = arith.constant 1 : index
    %c0_90 = arith.constant 0 : index
    %c0_91 = arith.constant 0 : index
    %211 = vector.load %arg5[%c1, %c0_90, %c0_91] : memref<2x1x32xf32, #tpu.memory_space<vmem>>, vector<1x1x32xf32>
    %212 = vector.shape_cast %211 : vector<1x1x32xf32> to vector<1x32xf32>
    %c1_92 = arith.constant 1 : index
    %c0_93 = arith.constant 0 : index
    %c0_94 = arith.constant 0 : index
    %213 = vector.load %arg6[%c1_92, %c0_93, %c0_94] : memref<2x1x32xf32, #tpu.memory_space<vmem>>, vector<1x1x32xf32>
    %214 = vector.shape_cast %213 : vector<1x1x32xf32> to vector<1x32xf32>
    %cst_95 = arith.constant dense<0.000000e+00> : vector<48xf32>
    %215 = vector.multi_reduction <add>, %210, %cst_95 [1] : vector<48x32xf32> to vector<48xf32>
    %216 = vector.shape_cast %215 : vector<48xf32> to vector<48x1xf32>
    %cst_96 = arith.constant 3.200000e+01 : f32
    %217 = vector.broadcast %cst_96 : f32 to vector<48x1xf32>
    %218 = arith.divf %216, %217 : vector<48x1xf32>
    %219 = vector.broadcast %218 : vector<48x1xf32> to vector<48x32xf32>
    %220 = arith.subf %210, %219 : vector<48x32xf32>
    %221 = arith.mulf %220, %220 : vector<48x32xf32>
    %cst_97 = arith.constant dense<0.000000e+00> : vector<48xf32>
    %222 = vector.multi_reduction <add>, %221, %cst_97 [1] : vector<48x32xf32> to vector<48xf32>
    %223 = vector.shape_cast %222 : vector<48xf32> to vector<48x1xf32>
    %cst_98 = arith.constant 3.200000e+01 : f32
    %224 = vector.broadcast %cst_98 : f32 to vector<48x1xf32>
    %225 = arith.divf %223, %224 : vector<48x1xf32>
    %cst_99 = arith.constant 9.99999997E-7 : f32
    %226 = vector.broadcast %cst_99 : f32 to vector<48x1xf32>
    %227 = arith.addf %225, %226 : vector<48x1xf32>
    %228 = math.rsqrt %227 : vector<48x1xf32>
    %229 = vector.broadcast %228 : vector<48x1xf32> to vector<48x32xf32>
    %230 = arith.mulf %220, %229 : vector<48x32xf32>
    %231 = vector.broadcast %212 : vector<1x32xf32> to vector<48x32xf32>
    %232 = arith.mulf %230, %231 : vector<48x32xf32>
    %233 = vector.broadcast %214 : vector<1x32xf32> to vector<48x32xf32>
    %234 = arith.addf %232, %233 : vector<48x32xf32>
    %c1_100 = arith.constant 1 : index
    %c0_101 = arith.constant 0 : index
    %c0_102 = arith.constant 0 : index
    %235 = vector.load %arg7[%c1_100, %c0_101, %c0_102] : memref<2x32x96xbf16, #tpu.memory_space<vmem>>, vector<1x32x96xbf16>
    %236 = vector.shape_cast %235 : vector<1x32x96xbf16> to vector<32x96xbf16>
    %c1_103 = arith.constant 1 : index
    %c0_104 = arith.constant 0 : index
    %c0_105 = arith.constant 0 : index
    %237 = vector.load %arg8[%c1_103, %c0_104, %c0_105] : memref<2x1x96xf32, #tpu.memory_space<vmem>>, vector<1x1x96xf32>
    %238 = vector.shape_cast %237 : vector<1x1x96xf32> to vector<1x96xf32>
    %239 = arith.truncf %234 : vector<48x32xf32> to vector<48x32xbf16>
    %cst_106 = arith.constant dense<0.000000e+00> : vector<48x96xf32>
    %240 = tpu.matmul %239, %236, %cst_106 {dimension_numbers = #tpu.dot_dimension_numbers<[1], [0], [0], [1], [0, 0, 1, 1], [], []>} : vector<48x32xbf16>, vector<32x96xbf16>, vector<48x96xf32> -> vector<48x96xf32>
    %241 = vector.broadcast %238 : vector<1x96xf32> to vector<48x96xf32>
    %242 = arith.addf %240, %241 : vector<48x96xf32>
    %243 = vector.extract_strided_slice %242 {offsets = [0, 0], sizes = [48, 8], strides = [1, 1]} : vector<48x96xf32> to vector<48x8xf32>
    %244 = arith.truncf %243 : vector<48x8xf32> to vector<48x8xbf16>
    %245 = vector.extract_strided_slice %242 {offsets = [0, 32], sizes = [48, 8], strides = [1, 1]} : vector<48x96xf32> to vector<48x8xf32>
    %246 = arith.truncf %245 : vector<48x8xf32> to vector<48x8xbf16>
    %247 = vector.extract_strided_slice %242 {offsets = [0, 64], sizes = [48, 8], strides = [1, 1]} : vector<48x96xf32> to vector<48x8xf32>
    %248 = arith.truncf %247 : vector<48x8xf32> to vector<48x8xbf16>
    %cst_107 = arith.constant dense<0.000000e+00> : vector<48x48xf32>
    %249 = tpu.matmul %244, %246, %cst_107 {dimension_numbers = #tpu.dot_dimension_numbers<[1], [1], [0], [0], [0, 0, 1, 0], [], []>} : vector<48x8xbf16>, vector<48x8xbf16>, vector<48x48xf32> -> vector<48x48xf32>
    %250 = arith.addf %249, %6 : vector<48x48xf32>
    %cst_108 = arith.constant dense<0xFF800000> : vector<48xf32>
    %251 = vector.multi_reduction <maximumf>, %250, %cst_108 [1] : vector<48x48xf32> to vector<48xf32>
    %252 = vector.shape_cast %251 : vector<48xf32> to vector<48x1xf32>
    %253 = vector.broadcast %252 : vector<48x1xf32> to vector<48x48xf32>
    %254 = arith.subf %250, %253 : vector<48x48xf32>
    %255 = math.exp %254 : vector<48x48xf32>
    %cst_109 = arith.constant dense<0.000000e+00> : vector<48xf32>
    %256 = vector.multi_reduction <add>, %255, %cst_109 [1] : vector<48x48xf32> to vector<48xf32>
    %257 = vector.shape_cast %256 : vector<48xf32> to vector<48x1xf32>
    %258 = tpu.reciprocal %257 {approx = true} : vector<48x1xf32> -> vector<48x1xf32>
    %259 = vector.broadcast %258 : vector<48x1xf32> to vector<48x48xf32>
    %260 = arith.mulf %255, %259 : vector<48x48xf32>
    %261 = arith.truncf %260 : vector<48x48xf32> to vector<48x48xbf16>
    %cst_110 = arith.constant dense<0.000000e+00> : vector<48x8xf32>
    %262 = tpu.matmul %261, %248, %cst_110 {dimension_numbers = #tpu.dot_dimension_numbers<[1], [0], [0], [1], [0, 0, 1, 1], [], []>} : vector<48x48xbf16>, vector<48x8xbf16>, vector<48x8xf32> -> vector<48x8xf32>
    %263 = vector.extract_strided_slice %242 {offsets = [0, 8], sizes = [48, 8], strides = [1, 1]} : vector<48x96xf32> to vector<48x8xf32>
    %264 = arith.truncf %263 : vector<48x8xf32> to vector<48x8xbf16>
    %265 = vector.extract_strided_slice %242 {offsets = [0, 40], sizes = [48, 8], strides = [1, 1]} : vector<48x96xf32> to vector<48x8xf32>
    %266 = arith.truncf %265 : vector<48x8xf32> to vector<48x8xbf16>
    %267 = vector.extract_strided_slice %242 {offsets = [0, 72], sizes = [48, 8], strides = [1, 1]} : vector<48x96xf32> to vector<48x8xf32>
    %268 = arith.truncf %267 : vector<48x8xf32> to vector<48x8xbf16>
    %cst_111 = arith.constant dense<0.000000e+00> : vector<48x48xf32>
    %269 = tpu.matmul %264, %266, %cst_111 {dimension_numbers = #tpu.dot_dimension_numbers<[1], [1], [0], [0], [0, 0, 1, 0], [], []>} : vector<48x8xbf16>, vector<48x8xbf16>, vector<48x48xf32> -> vector<48x48xf32>
    %270 = arith.addf %269, %6 : vector<48x48xf32>
    %cst_112 = arith.constant dense<0xFF800000> : vector<48xf32>
    %271 = vector.multi_reduction <maximumf>, %270, %cst_112 [1] : vector<48x48xf32> to vector<48xf32>
    %272 = vector.shape_cast %271 : vector<48xf32> to vector<48x1xf32>
    %273 = vector.broadcast %272 : vector<48x1xf32> to vector<48x48xf32>
    %274 = arith.subf %270, %273 : vector<48x48xf32>
    %275 = math.exp %274 : vector<48x48xf32>
    %cst_113 = arith.constant dense<0.000000e+00> : vector<48xf32>
    %276 = vector.multi_reduction <add>, %275, %cst_113 [1] : vector<48x48xf32> to vector<48xf32>
    %277 = vector.shape_cast %276 : vector<48xf32> to vector<48x1xf32>
    %278 = tpu.reciprocal %277 {approx = true} : vector<48x1xf32> -> vector<48x1xf32>
    %279 = vector.broadcast %278 : vector<48x1xf32> to vector<48x48xf32>
    %280 = arith.mulf %275, %279 : vector<48x48xf32>
    %281 = arith.truncf %280 : vector<48x48xf32> to vector<48x48xbf16>
    %cst_114 = arith.constant dense<0.000000e+00> : vector<48x8xf32>
    %282 = tpu.matmul %281, %268, %cst_114 {dimension_numbers = #tpu.dot_dimension_numbers<[1], [0], [0], [1], [0, 0, 1, 1], [], []>} : vector<48x48xbf16>, vector<48x8xbf16>, vector<48x8xf32> -> vector<48x8xf32>
    %283 = vector.extract_strided_slice %242 {offsets = [0, 16], sizes = [48, 8], strides = [1, 1]} : vector<48x96xf32> to vector<48x8xf32>
    %284 = arith.truncf %283 : vector<48x8xf32> to vector<48x8xbf16>
    %285 = vector.extract_strided_slice %242 {offsets = [0, 48], sizes = [48, 8], strides = [1, 1]} : vector<48x96xf32> to vector<48x8xf32>
    %286 = arith.truncf %285 : vector<48x8xf32> to vector<48x8xbf16>
    %287 = vector.extract_strided_slice %242 {offsets = [0, 80], sizes = [48, 8], strides = [1, 1]} : vector<48x96xf32> to vector<48x8xf32>
    %288 = arith.truncf %287 : vector<48x8xf32> to vector<48x8xbf16>
    %cst_115 = arith.constant dense<0.000000e+00> : vector<48x48xf32>
    %289 = tpu.matmul %284, %286, %cst_115 {dimension_numbers = #tpu.dot_dimension_numbers<[1], [1], [0], [0], [0, 0, 1, 0], [], []>} : vector<48x8xbf16>, vector<48x8xbf16>, vector<48x48xf32> -> vector<48x48xf32>
    %290 = arith.addf %289, %6 : vector<48x48xf32>
    %cst_116 = arith.constant dense<0xFF800000> : vector<48xf32>
    %291 = vector.multi_reduction <maximumf>, %290, %cst_116 [1] : vector<48x48xf32> to vector<48xf32>
    %292 = vector.shape_cast %291 : vector<48xf32> to vector<48x1xf32>
    %293 = vector.broadcast %292 : vector<48x1xf32> to vector<48x48xf32>
    %294 = arith.subf %290, %293 : vector<48x48xf32>
    %295 = math.exp %294 : vector<48x48xf32>
    %cst_117 = arith.constant dense<0.000000e+00> : vector<48xf32>
    %296 = vector.multi_reduction <add>, %295, %cst_117 [1] : vector<48x48xf32> to vector<48xf32>
    %297 = vector.shape_cast %296 : vector<48xf32> to vector<48x1xf32>
    %298 = tpu.reciprocal %297 {approx = true} : vector<48x1xf32> -> vector<48x1xf32>
    %299 = vector.broadcast %298 : vector<48x1xf32> to vector<48x48xf32>
    %300 = arith.mulf %295, %299 : vector<48x48xf32>
    %301 = arith.truncf %300 : vector<48x48xf32> to vector<48x48xbf16>
    %cst_118 = arith.constant dense<0.000000e+00> : vector<48x8xf32>
    %302 = tpu.matmul %301, %288, %cst_118 {dimension_numbers = #tpu.dot_dimension_numbers<[1], [0], [0], [1], [0, 0, 1, 1], [], []>} : vector<48x48xbf16>, vector<48x8xbf16>, vector<48x8xf32> -> vector<48x8xf32>
    %303 = vector.extract_strided_slice %242 {offsets = [0, 24], sizes = [48, 8], strides = [1, 1]} : vector<48x96xf32> to vector<48x8xf32>
    %304 = arith.truncf %303 : vector<48x8xf32> to vector<48x8xbf16>
    %305 = vector.extract_strided_slice %242 {offsets = [0, 56], sizes = [48, 8], strides = [1, 1]} : vector<48x96xf32> to vector<48x8xf32>
    %306 = arith.truncf %305 : vector<48x8xf32> to vector<48x8xbf16>
    %307 = vector.extract_strided_slice %242 {offsets = [0, 88], sizes = [48, 8], strides = [1, 1]} : vector<48x96xf32> to vector<48x8xf32>
    %308 = arith.truncf %307 : vector<48x8xf32> to vector<48x8xbf16>
    %cst_119 = arith.constant dense<0.000000e+00> : vector<48x48xf32>
    %309 = tpu.matmul %304, %306, %cst_119 {dimension_numbers = #tpu.dot_dimension_numbers<[1], [1], [0], [0], [0, 0, 1, 0], [], []>} : vector<48x8xbf16>, vector<48x8xbf16>, vector<48x48xf32> -> vector<48x48xf32>
    %310 = arith.addf %309, %6 : vector<48x48xf32>
    %cst_120 = arith.constant dense<0xFF800000> : vector<48xf32>
    %311 = vector.multi_reduction <maximumf>, %310, %cst_120 [1] : vector<48x48xf32> to vector<48xf32>
    %312 = vector.shape_cast %311 : vector<48xf32> to vector<48x1xf32>
    %313 = vector.broadcast %312 : vector<48x1xf32> to vector<48x48xf32>
    %314 = arith.subf %310, %313 : vector<48x48xf32>
    %315 = math.exp %314 : vector<48x48xf32>
    %cst_121 = arith.constant dense<0.000000e+00> : vector<48xf32>
    %316 = vector.multi_reduction <add>, %315, %cst_121 [1] : vector<48x48xf32> to vector<48xf32>
    %317 = vector.shape_cast %316 : vector<48xf32> to vector<48x1xf32>
    %318 = tpu.reciprocal %317 {approx = true} : vector<48x1xf32> -> vector<48x1xf32>
    %319 = vector.broadcast %318 : vector<48x1xf32> to vector<48x48xf32>
    %320 = arith.mulf %315, %319 : vector<48x48xf32>
    %321 = arith.truncf %320 : vector<48x48xf32> to vector<48x48xbf16>
    %cst_122 = arith.constant dense<0.000000e+00> : vector<48x8xf32>
    %322 = tpu.matmul %321, %308, %cst_122 {dimension_numbers = #tpu.dot_dimension_numbers<[1], [0], [0], [1], [0, 0, 1, 1], [], []>} : vector<48x48xbf16>, vector<48x8xbf16>, vector<48x8xf32> -> vector<48x8xf32>
    %323 = tpu.concatenate %262, %282, %302, %322 in 1 : vector<48x8xf32>, vector<48x8xf32>, vector<48x8xf32>, vector<48x8xf32> -> vector<48x32xf32>
    %324 = arith.truncf %323 : vector<48x32xf32> to vector<48x32xbf16>
    %c1_123 = arith.constant 1 : index
    %c0_124 = arith.constant 0 : index
    %c0_125 = arith.constant 0 : index
    %325 = vector.load %arg9[%c1_123, %c0_124, %c0_125] : memref<2x32x32xbf16, #tpu.memory_space<vmem>>, vector<1x32x32xbf16>
    %326 = vector.shape_cast %325 : vector<1x32x32xbf16> to vector<32x32xbf16>
    %cst_126 = arith.constant dense<0.000000e+00> : vector<48x32xf32>
    %327 = tpu.matmul %324, %326, %cst_126 {dimension_numbers = #tpu.dot_dimension_numbers<[1], [0], [0], [1], [0, 0, 1, 1], [], []>} : vector<48x32xbf16>, vector<32x32xbf16>, vector<48x32xf32> -> vector<48x32xf32>
    %c1_127 = arith.constant 1 : index
    %c0_128 = arith.constant 0 : index
    %c0_129 = arith.constant 0 : index
    %328 = vector.load %arg10[%c1_127, %c0_128, %c0_129] : memref<2x1x32xf32, #tpu.memory_space<vmem>>, vector<1x1x32xf32>
    %329 = vector.shape_cast %328 : vector<1x1x32xf32> to vector<1x32xf32>
    %330 = vector.broadcast %329 : vector<1x32xf32> to vector<48x32xf32>
    %331 = arith.addf %327, %330 : vector<48x32xf32>
    %332 = arith.addf %210, %331 : vector<48x32xf32>
    %c1_130 = arith.constant 1 : index
    %c0_131 = arith.constant 0 : index
    %c0_132 = arith.constant 0 : index
    %333 = vector.load %arg11[%c1_130, %c0_131, %c0_132] : memref<2x1x32xf32, #tpu.memory_space<vmem>>, vector<1x1x32xf32>
    %334 = vector.shape_cast %333 : vector<1x1x32xf32> to vector<1x32xf32>
    %c1_133 = arith.constant 1 : index
    %c0_134 = arith.constant 0 : index
    %c0_135 = arith.constant 0 : index
    %335 = vector.load %arg12[%c1_133, %c0_134, %c0_135] : memref<2x1x32xf32, #tpu.memory_space<vmem>>, vector<1x1x32xf32>
    %336 = vector.shape_cast %335 : vector<1x1x32xf32> to vector<1x32xf32>
    %cst_136 = arith.constant dense<0.000000e+00> : vector<48xf32>
    %337 = vector.multi_reduction <add>, %332, %cst_136 [1] : vector<48x32xf32> to vector<48xf32>
    %338 = vector.shape_cast %337 : vector<48xf32> to vector<48x1xf32>
    %cst_137 = arith.constant 3.200000e+01 : f32
    %339 = vector.broadcast %cst_137 : f32 to vector<48x1xf32>
    %340 = arith.divf %338, %339 : vector<48x1xf32>
    %341 = vector.broadcast %340 : vector<48x1xf32> to vector<48x32xf32>
    %342 = arith.subf %332, %341 : vector<48x32xf32>
    %343 = arith.mulf %342, %342 : vector<48x32xf32>
    %cst_138 = arith.constant dense<0.000000e+00> : vector<48xf32>
    %344 = vector.multi_reduction <add>, %343, %cst_138 [1] : vector<48x32xf32> to vector<48xf32>
    %345 = vector.shape_cast %344 : vector<48xf32> to vector<48x1xf32>
    %cst_139 = arith.constant 3.200000e+01 : f32
    %346 = vector.broadcast %cst_139 : f32 to vector<48x1xf32>
    %347 = arith.divf %345, %346 : vector<48x1xf32>
    %cst_140 = arith.constant 9.99999997E-7 : f32
    %348 = vector.broadcast %cst_140 : f32 to vector<48x1xf32>
    %349 = arith.addf %347, %348 : vector<48x1xf32>
    %350 = math.rsqrt %349 : vector<48x1xf32>
    %351 = vector.broadcast %350 : vector<48x1xf32> to vector<48x32xf32>
    %352 = arith.mulf %342, %351 : vector<48x32xf32>
    %353 = vector.broadcast %334 : vector<1x32xf32> to vector<48x32xf32>
    %354 = arith.mulf %352, %353 : vector<48x32xf32>
    %355 = vector.broadcast %336 : vector<1x32xf32> to vector<48x32xf32>
    %356 = arith.addf %354, %355 : vector<48x32xf32>
    %c1_141 = arith.constant 1 : index
    %c0_142 = arith.constant 0 : index
    %c0_143 = arith.constant 0 : index
    %357 = vector.load %arg13[%c1_141, %c0_142, %c0_143] : memref<2x32x128xbf16, #tpu.memory_space<vmem>>, vector<1x32x128xbf16>
    %358 = vector.shape_cast %357 : vector<1x32x128xbf16> to vector<32x128xbf16>
    %c1_144 = arith.constant 1 : index
    %c0_145 = arith.constant 0 : index
    %c0_146 = arith.constant 0 : index
    %359 = vector.load %arg14[%c1_144, %c0_145, %c0_146] : memref<2x1x128xf32, #tpu.memory_space<vmem>>, vector<1x1x128xf32>
    %360 = vector.shape_cast %359 : vector<1x1x128xf32> to vector<1x128xf32>
    %361 = arith.truncf %356 : vector<48x32xf32> to vector<48x32xbf16>
    %cst_147 = arith.constant dense<0.000000e+00> : vector<48x128xf32>
    %362 = tpu.matmul %361, %358, %cst_147 {dimension_numbers = #tpu.dot_dimension_numbers<[1], [0], [0], [1], [0, 0, 1, 1], [], []>} : vector<48x32xbf16>, vector<32x128xbf16>, vector<48x128xf32> -> vector<48x128xf32>
    %363 = vector.broadcast %360 : vector<1x128xf32> to vector<48x128xf32>
    %364 = arith.addf %362, %363 : vector<48x128xf32>
    %cst_148 = arith.constant 5.000000e-01 : f32
    %365 = vector.broadcast %cst_148 : f32 to vector<48x128xf32>
    %366 = arith.mulf %365, %364 : vector<48x128xf32>
    %cst_149 = arith.constant 0.707106769 : f32
    %367 = vector.broadcast %cst_149 : f32 to vector<48x128xf32>
    %368 = arith.mulf %364, %367 : vector<48x128xf32>
    %cst_150 = arith.constant 0.000000e+00 : f32
    %369 = vector.broadcast %cst_150 : f32 to vector<48x128xf32>
    %370 = arith.cmpf oge, %368, %369 : vector<48x128xf32>
    %cst_151 = arith.constant 1.000000e+00 : f32
    %cst_152 = arith.constant -1.000000e+00 : f32
    %371 = vector.broadcast %cst_151 : f32 to vector<48x128xf32>
    %372 = vector.broadcast %cst_152 : f32 to vector<48x128xf32>
    %373 = arith.select %370, %371, %372 : vector<48x128xi1>, vector<48x128xf32>
    %374 = math.absf %368 : vector<48x128xf32>
    %cst_153 = arith.constant 0.327591091 : f32
    %375 = vector.broadcast %cst_153 : f32 to vector<48x128xf32>
    %376 = arith.mulf %375, %374 : vector<48x128xf32>
    %cst_154 = arith.constant 1.000000e+00 : f32
    %377 = vector.broadcast %cst_154 : f32 to vector<48x128xf32>
    %378 = arith.addf %377, %376 : vector<48x128xf32>
    %cst_155 = arith.constant 1.000000e+00 : f32
    %379 = vector.broadcast %cst_155 : f32 to vector<48x128xf32>
    %380 = arith.divf %379, %378 : vector<48x128xf32>
    %cst_156 = arith.constant 1.06140542 : f32
    %381 = vector.broadcast %cst_156 : f32 to vector<48x128xf32>
    %382 = arith.mulf %381, %380 : vector<48x128xf32>
    %cst_157 = arith.constant -1.45315206 : f32
    %383 = vector.broadcast %cst_157 : f32 to vector<48x128xf32>
    %384 = arith.addf %382, %383 : vector<48x128xf32>
    %385 = arith.mulf %384, %380 : vector<48x128xf32>
    %cst_158 = arith.constant 1.42141378 : f32
    %386 = vector.broadcast %cst_158 : f32 to vector<48x128xf32>
    %387 = arith.addf %385, %386 : vector<48x128xf32>
    %388 = arith.mulf %387, %380 : vector<48x128xf32>
    %cst_159 = arith.constant -0.284496725 : f32
    %389 = vector.broadcast %cst_159 : f32 to vector<48x128xf32>
    %390 = arith.addf %388, %389 : vector<48x128xf32>
    %391 = arith.mulf %390, %380 : vector<48x128xf32>
    %cst_160 = arith.constant 0.254829586 : f32
    %392 = vector.broadcast %cst_160 : f32 to vector<48x128xf32>
    %393 = arith.addf %391, %392 : vector<48x128xf32>
    %394 = arith.mulf %393, %380 : vector<48x128xf32>
    %cst_161 = arith.constant 0.000000e+00 : f32
    %395 = vector.broadcast %cst_161 : f32 to vector<48x128xf32>
    %396 = arith.subf %395, %374 : vector<48x128xf32>
    %397 = arith.mulf %396, %374 : vector<48x128xf32>
    %398 = math.exp %397 : vector<48x128xf32>
    %399 = arith.mulf %394, %398 : vector<48x128xf32>
    %cst_162 = arith.constant 1.000000e+00 : f32
    %400 = vector.broadcast %cst_162 : f32 to vector<48x128xf32>
    %401 = arith.subf %400, %399 : vector<48x128xf32>
    %402 = arith.mulf %373, %401 : vector<48x128xf32>
    %cst_163 = arith.constant 1.000000e+00 : f32
    %403 = vector.broadcast %cst_163 : f32 to vector<48x128xf32>
    %404 = arith.addf %403, %402 : vector<48x128xf32>
    %405 = arith.mulf %366, %404 : vector<48x128xf32>
    %c1_164 = arith.constant 1 : index
    %c0_165 = arith.constant 0 : index
    %c0_166 = arith.constant 0 : index
    %406 = vector.load %arg15[%c1_164, %c0_165, %c0_166] : memref<2x128x32xbf16, #tpu.memory_space<vmem>>, vector<1x128x32xbf16>
    %407 = vector.shape_cast %406 : vector<1x128x32xbf16> to vector<128x32xbf16>
    %c1_167 = arith.constant 1 : index
    %c0_168 = arith.constant 0 : index
    %c0_169 = arith.constant 0 : index
    %408 = vector.load %arg16[%c1_167, %c0_168, %c0_169] : memref<2x1x32xf32, #tpu.memory_space<vmem>>, vector<1x1x32xf32>
    %409 = vector.shape_cast %408 : vector<1x1x32xf32> to vector<1x32xf32>
    %410 = arith.truncf %405 : vector<48x128xf32> to vector<48x128xbf16>
    %cst_170 = arith.constant dense<0.000000e+00> : vector<48x32xf32>
    %411 = tpu.matmul %410, %407, %cst_170 {dimension_numbers = #tpu.dot_dimension_numbers<[1], [0], [0], [1], [0, 0, 1, 1], [], []>} : vector<48x128xbf16>, vector<128x32xbf16>, vector<48x32xf32> -> vector<48x32xf32>
    %412 = vector.broadcast %409 : vector<1x32xf32> to vector<48x32xf32>
    %413 = arith.addf %411, %412 : vector<48x32xf32>
    %414 = arith.addf %332, %413 : vector<48x32xf32>
    %415 = vector.extract_strided_slice %414 {offsets = [0, 0], sizes = [1, 32], strides = [1, 1]} : vector<48x32xf32> to vector<1x32xf32>
    %416 = vector.extract_strided_slice %414 {offsets = [24, 0], sizes = [1, 32], strides = [1, 1]} : vector<48x32xf32> to vector<1x32xf32>
    %417 = tpu.concatenate %415, %416 in 0 : vector<1x32xf32>, vector<1x32xf32> -> vector<2x32xf32>
    %c0_171 = arith.constant 0 : index
    %c0_172 = arith.constant 0 : index
    %418 = vector.load %arg17[%c0_171, %c0_172] : memref<1x32xf32, #tpu.memory_space<vmem>>, vector<1x32xf32>
    %c0_173 = arith.constant 0 : index
    %c0_174 = arith.constant 0 : index
    %419 = vector.load %arg18[%c0_173, %c0_174] : memref<1x32xf32, #tpu.memory_space<vmem>>, vector<1x32xf32>
    %cst_175 = arith.constant dense<0.000000e+00> : vector<2xf32>
    %420 = vector.multi_reduction <add>, %417, %cst_175 [1] : vector<2x32xf32> to vector<2xf32>
    %421 = vector.shape_cast %420 : vector<2xf32> to vector<2x1xf32>
    %cst_176 = arith.constant 3.200000e+01 : f32
    %422 = vector.broadcast %cst_176 : f32 to vector<2x1xf32>
    %423 = arith.divf %421, %422 : vector<2x1xf32>
    %424 = vector.broadcast %423 : vector<2x1xf32> to vector<2x32xf32>
    %425 = arith.subf %417, %424 : vector<2x32xf32>
    %426 = arith.mulf %425, %425 : vector<2x32xf32>
    %cst_177 = arith.constant dense<0.000000e+00> : vector<2xf32>
    %427 = vector.multi_reduction <add>, %426, %cst_177 [1] : vector<2x32xf32> to vector<2xf32>
    %428 = vector.shape_cast %427 : vector<2xf32> to vector<2x1xf32>
    %cst_178 = arith.constant 3.200000e+01 : f32
    %429 = vector.broadcast %cst_178 : f32 to vector<2x1xf32>
    %430 = arith.divf %428, %429 : vector<2x1xf32>
    %cst_179 = arith.constant 9.99999997E-7 : f32
    %431 = vector.broadcast %cst_179 : f32 to vector<2x1xf32>
    %432 = arith.addf %430, %431 : vector<2x1xf32>
    %433 = math.rsqrt %432 : vector<2x1xf32>
    %434 = vector.broadcast %433 : vector<2x1xf32> to vector<2x32xf32>
    %435 = arith.mulf %425, %434 : vector<2x32xf32>
    %436 = vector.broadcast %418 : vector<1x32xf32> to vector<2x32xf32>
    %437 = arith.mulf %435, %436 : vector<2x32xf32>
    %438 = vector.broadcast %419 : vector<1x32xf32> to vector<2x32xf32>
    %439 = arith.addf %437, %438 : vector<2x32xf32>
    %c0_180 = arith.constant 0 : index
    %c0_181 = arith.constant 0 : index
    %c0_182 = arith.constant 0 : index
    %440 = vector.load %arg19[%c0_180, %c0_181, %c0_182] : memref<1x2x32xf32, #tpu.memory_space<vmem>>, vector<1x2x32xf32>
    %441 = vector.shape_cast %440 : vector<1x2x32xf32> to vector<2x32xf32>
    %442 = vector.shape_cast %439 : vector<2x32xf32> to vector<1x2x32xf32>
    tpu.vector_store %arg19[%c0_180, %c0_181, %c0_182], %442 {strides = array<i32>} : memref<1x2x32xf32, #tpu.memory_space<vmem>>, vector<1x2x32xf32>,
    return
  }
  func.func @transform_0(%arg0: i32) -> (i32, i32, i32) {
    %c0_i32 = arith.constant 0 : i32
    %c0_i32_0 = arith.constant 0 : i32
    %c0_i32_1 = arith.constant 0 : i32
    return %arg0, %c0_i32, %c0_i32_0 : i32, i32, i32
  }
  func.func @transform_1(%arg0: i32) -> (i32, i32) {
    %c0_i32 = arith.constant 0 : i32
    %c0_i32_0 = arith.constant 0 : i32
    %c0_i32_1 = arith.constant 0 : i32
    return %c0_i32, %c0_i32_0 : i32, i32
  }
  func.func @transform_2(%arg0: i32) -> (i32, i32) {
    %c0_i32 = arith.constant 0 : i32
    %c0_i32_0 = arith.constant 0 : i32
    %c0_i32_1 = arith.constant 0 : i32
    return %c0_i32, %c0_i32_0 : i32, i32
  }
  func.func @transform_3(%arg0: i32) -> (i32, i32) {
    %c0_i32 = arith.constant 0 : i32
    %c0_i32_0 = arith.constant 0 : i32
    %c0_i32_1 = arith.constant 0 : i32
    return %c0_i32, %c0_i32_0 : i32, i32
  }
  func.func @transform_4(%arg0: i32) -> (i32, i32, i32) {
    %c0_i32 = arith.constant 0 : i32
    %c0_i32_0 = arith.constant 0 : i32
    %c0_i32_1 = arith.constant 0 : i32
    %c0_i32_2 = arith.constant 0 : i32
    return %c0_i32, %c0_i32_0, %c0_i32_1 : i32, i32, i32
  }
  func.func @transform_5(%arg0: i32) -> (i32, i32, i32) {
    %c0_i32 = arith.constant 0 : i32
    %c0_i32_0 = arith.constant 0 : i32
    %c0_i32_1 = arith.constant 0 : i32
    %c0_i32_2 = arith.constant 0 : i32
    return %c0_i32, %c0_i32_0, %c0_i32_1 : i32, i32, i32
  }
  func.func @transform_6(%arg0: i32) -> (i32, i32, i32) {
    %c0_i32 = arith.constant 0 : i32
    %c0_i32_0 = arith.constant 0 : i32
    %c0_i32_1 = arith.constant 0 : i32
    %c0_i32_2 = arith.constant 0 : i32
    return %c0_i32, %c0_i32_0, %c0_i32_1 : i32, i32, i32
  }
  func.func @transform_7(%arg0: i32) -> (i32, i32, i32) {
    %c0_i32 = arith.constant 0 : i32
    %c0_i32_0 = arith.constant 0 : i32
    %c0_i32_1 = arith.constant 0 : i32
    %c0_i32_2 = arith.constant 0 : i32
    return %c0_i32, %c0_i32_0, %c0_i32_1 : i32, i32, i32
  }
  func.func @transform_8(%arg0: i32) -> (i32, i32, i32) {
    %c0_i32 = arith.constant 0 : i32
    %c0_i32_0 = arith.constant 0 : i32
    %c0_i32_1 = arith.constant 0 : i32
    %c0_i32_2 = arith.constant 0 : i32
    return %c0_i32, %c0_i32_0, %c0_i32_1 : i32, i32, i32
  }
  func.func @transform_9(%arg0: i32) -> (i32, i32, i32) {
    %c0_i32 = arith.constant 0 : i32
    %c0_i32_0 = arith.constant 0 : i32
    %c0_i32_1 = arith.constant 0 : i32
    %c0_i32_2 = arith.constant 0 : i32
    return %c0_i32, %c0_i32_0, %c0_i32_1 : i32, i32, i32
  }
  func.func @transform_10(%arg0: i32) -> (i32, i32, i32) {
    %c0_i32 = arith.constant 0 : i32
    %c0_i32_0 = arith.constant 0 : i32
    %c0_i32_1 = arith.constant 0 : i32
    %c0_i32_2 = arith.constant 0 : i32
    return %c0_i32, %c0_i32_0, %c0_i32_1 : i32, i32, i32
  }
  func.func @transform_11(%arg0: i32) -> (i32, i32, i32) {
    %c0_i32 = arith.constant 0 : i32
    %c0_i32_0 = arith.constant 0 : i32
    %c0_i32_1 = arith.constant 0 : i32
    %c0_i32_2 = arith.constant 0 : i32
    return %c0_i32, %c0_i32_0, %c0_i32_1 : i32, i32, i32
  }
  func.func @transform_12(%arg0: i32) -> (i32, i32, i32) {
    %c0_i32 = arith.constant 0 : i32
    %c0_i32_0 = arith.constant 0 : i32
    %c0_i32_1 = arith.constant 0 : i32
    %c0_i32_2 = arith.constant 0 : i32
    return %c0_i32, %c0_i32_0, %c0_i32_1 : i32, i32, i32
  }
  func.func @transform_13(%arg0: i32) -> (i32, i32, i32) {
    %c0_i32 = arith.constant 0 : i32
    %c0_i32_0 = arith.constant 0 : i32
    %c0_i32_1 = arith.constant 0 : i32
    %c0_i32_2 = arith.constant 0 : i32
    return %c0_i32, %c0_i32_0, %c0_i32_1 : i32, i32, i32
  }
  func.func @transform_14(%arg0: i32) -> (i32, i32, i32) {
    %c0_i32 = arith.constant 0 : i32
    %c0_i32_0 = arith.constant 0 : i32
    %c0_i32_1 = arith.constant 0 : i32
    %c0_i32_2 = arith.constant 0 : i32
    return %c0_i32, %c0_i32_0, %c0_i32_1 : i32, i32, i32
  }
  func.func @transform_15(%arg0: i32) -> (i32, i32, i32) {
    %c0_i32 = arith.constant 0 : i32
    %c0_i32_0 = arith.constant 0 : i32
    %c0_i32_1 = arith.constant 0 : i32
    %c0_i32_2 = arith.constant 0 : i32
    return %c0_i32, %c0_i32_0, %c0_i32_1 : i32, i32, i32
  }
  func.func @transform_16(%arg0: i32) -> (i32, i32) {
    %c0_i32 = arith.constant 0 : i32
    %c0_i32_0 = arith.constant 0 : i32
    %c0_i32_1 = arith.constant 0 : i32
    return %c0_i32, %c0_i32_0 : i32, i32
  }
  func.func @transform_17(%arg0: i32) -> (i32, i32) {
    %c0_i32 = arith.constant 0 : i32
    %c0_i32_0 = arith.constant 0 : i32
    %c0_i32_1 = arith.constant 0 : i32
    return %c0_i32, %c0_i32_0 : i32, i32
  }
  func.func @transform_18(%arg0: i32) -> (i32, i32, i32) {
    %c0_i32 = arith.constant 0 : i32
    %c0_i32_0 = arith.constant 0 : i32
    %c0_i32_1 = arith.constant 0 : i32
    return %arg0, %c0_i32, %c0_i32_0 : i32, i32, i32
  }
}

</mosaic_0001>

<bundles_post_ra>
// kernel: vit_forward_features.1
= control target key start
LH: loop header
LB: loop body
LE: loop exit
PB: predicated region body
PF: predicated region fallthrough
CT: control target
= control target key end

     0   :  { %s6919_s0 = inlined_call_operand.vmem [shape: bf16[1,48,48], index: 0, kind: input, shape index: {}]   ;;  %s6920_s1 = inlined_call_operand.vmem [shape: bf16[48,32], index: 1, kind: input, shape index: {}]   ;;  %s6921_s2 = inlined_call_operand.vmem [shape: f32[48,32], index: 2, kind: input, shape index: {}]   ;;  %s6922_s3 = inlined_call_operand.vmem [shape: f32[48,48], index: 3, kind: input, shape index: {}]   ;;  %s6923_s4 = inlined_call_operand.vmem [shape: f32[2,1,32], index: 4, kind: input, shape index: {}]   ;;  %s6924_s5 = inlined_call_operand.vmem [shape: f32[2,1,32], index: 5, kind: input, shape index: {}]   ;;  %s6925_s6 = inlined_call_operand.vmem [shape: bf16[2,32,96], index: 6, kind: input, shape index: {}]   ;;  %s6926_s7 = inlined_call_operand.vmem [shape: f32[2,1,96], index: 7, kind: input, shape index: {}]   ;;  %s6927_s8 = inlined_call_operand.vmem [shape: bf16[2,32,32], index: 8, kind: input, shape index: {}]   ;;  %s6928_s9 = inlined_call_operand.vmem [shape: f32[2,1,32], index: 9, kind: input, shape index: {}]   ;;  %s6929_s10 = inlined_call_operand.vmem [shape: f32[2,1,32], index: 10, kind: input, shape index: {}]   ;;  %s6930_s11 = inlined_call_operand.vmem [shape: f32[2,1,32], index: 11, kind: input, shape index: {}]   ;;  %s6931_s12 = inlined_call_operand.vmem [shape: bf16[2,32,128], index: 12, kind: input, shape index: {}]   ;;  %s6932_s13 = inlined_call_operand.vmem [shape: f32[2,1,128], index: 13, kind: input, shape index: {}]   ;;  %s6933_s14 = inlined_call_operand.vmem [shape: bf16[2,128,32], index: 14, kind: input, shape index: {}]   ;;  %s6934_s15 = inlined_call_operand.vmem [shape: f32[2,1,32], index: 15, kind: input, shape index: {}]   ;;  %s6935_s16 = inlined_call_operand.vmem [shape: f32[1,32], index: 16, kind: input, shape index: {}]   ;;  %s6936_s17 = inlined_call_operand.vmem [shape: f32[1,32], index: 17, kind: input, shape index: {}]   ;;  %s6937_s18 = inlined_call_operand.hbm [shape: f32[1,2,32], index: 18, kind: output, shape index: {}]  }
   0x1   :  { %6953 = sst [smem:[#allocation5_spill]] %s6919_s0 }
   0x2   :  { %6954 = sst [smem:[#allocation6_spill]] %s6920_s1 }
   0x3   :  { %6955 = sst [smem:[#allocation7_spill]] %s6921_s2 }
   0x4   :  { %s6956_s29 = sld [smem:[#allocation6_spill]]  ;;  %v5087_v1 = vmov 0.0   ;;  %vm5088_vm0 = vmmov 0   ;;  %vm112_vm1 = vcmask 392192   ;;  %s6957_s22 = sld [smem:[#allocation5_spill]] }
   0x5   :  { %4161 = vmatprep.subr.bf16.mxu0 %v5087_v1  ;;  %4179 = vmatprep.subr.bf16.mxu1 %v5087_v1 }
   0x6   :  { %4167 = vmatprep.mubr.msk.bf16.mxu0 %vm5088_vm0, %v5087_v1  ;;  %4183 = vmatprep.mubr.msk.bf16.mxu1 %vm5088_vm0, %v5087_v1 }
   0xa   :  { %v4733_v0 = vld [vmem:[%s6956_s29] sm:$0xff]   ;;  %v4734_v2 = vld [vmem:[%s6956_s29 + $0x8] sm:$0xff]   ;;  %v4735_v3 = vld [vmem:[%s6956_s29 + $0x10] sm:$0xff]  }
   0xb   :  { %4162 = vmatpush3.bf16.msra.mxu0 %v4733_v0  ;;  %v4736_v4 = vld [vmem:[%s6957_s22] sm:$0xff]   ;;  %v4737_v5 = vld [vmem:[%s6957_s22 + $0x8] sm:$0xff]   ;;  %v4738_v6 = vld [vmem:[%s6957_s22 + $0x10] sm:$0xff]  }
   0xc   :  { %4163 = vmatprep.subr.bf16.mxu0 %v5087_v1 }
   0xf   :  { %4164 = vmatpush3.bf16.msra.mxu0 %v4734_v2 }
  0x10   :  { %4165 = vmatprep.subr.bf16.mxu0 %v5087_v1 }
  0x13   :  { %4166 = vmatpush3.bf16.msra.mxu0 %v4735_v3 }
  0x14   :  { %4213 = vmatprep.subr.bf16.mxu0 %v5087_v1 }
  0x16   :  { %4168 = vmatmul.mubr.msk.bf16.vlgmr.msra.gmra.mrb[0].mxu0 %vm112_vm1, %v4736_v4 }
  0x17   :  { %4171 = vmatprep.mubr.msk.bf16.mxu0 %vm5088_vm0, %v5087_v1 }
  0x1e   :  { %4172 = vmatmul.mubr.msk.bf16.gmra.mrb[4].mxu0 %vm112_vm1, %v4737_v5 }
  0x1f   :  { %4175 = vmatprep.mubr.msk.bf16.mxu0 %vm5088_vm0, %v5087_v1 }
  0x20   :  { %23 = vsyncpa [#allocation3], 0  ;;  %s6958_s28 = sld [smem:[#allocation7_spill]]  ;;  %vm187_vm2 = vcmask 261120   ;;  %v4739_v4 = vld [vmem:[%s6925_s6] sm:$0xff]   ;;  %v4740_v5 = vld [vmem:[%s6925_s6 + $0x8] sm:$0xff]  }
  0x21   :  { %4180 = vmatpush3.bf16.msra.mxu1 %v4739_v4  ;;  %s5089_s20 = smov 96   ;;  %s5090_s21 = smov 88   ;;  %vm395_vm3 = vcmask 64512   ;;  %vm1386_vm4 = vcmask 130048   ;;  %vm1393_vm5 = vcmask 195584  }
  0x22   :  { %4181 = vmatprep.subr.bf16.mxu1 %v5087_v1  ;;  %s5091_s22 = smov 120   ;;  %s5092_s2 = smov 112  }
  0x23   :  { %s5093_s23 = smov 80   ;;  %s5094_s24 = smov 104  }
  0x24   :  { %s5095_s25 = smov 72   ;;  %s5096_s26 = smov 64  }
  0x25   :  { %4182 = vmatpush3.bf16.msra.mxu1 %v4740_v5  ;;  %s6951_s27 = smov 56   ;;  %s6941_s29 = smov 40  }
  0x26   :  { %4176 = vmatmul.mubr.msk.bf16.gmra.mrb[8].mxu0 %vm112_vm1, %v4738_v6  ;;  %v73_v7 = vld [vmem:[%s6958_s28] sm:$0xff]  ;;  %v74_v9 = vld [vmem:[%s6958_s28 + $0x8] sm:$0xff]  ;;  %v75_v16 = vld [vmem:[%s6958_s28 + $0x10] sm:$0xff]  ;;  %4195 = vmatprep.subr.bf16.mxu1 %v5087_v1  ;;  %s6949_s30 = smov 8   ;;  %s6947_s0 = smov 16  }
  0x27   :  { %4219 = vmatprep.mubr.msk.bf16.mxu0 %vm5088_vm0, %v5087_v1  ;;  %v76_v19 = vld [vmem:[%s6958_s28 + $0x18] sm:$0xff]  ;;  %v77_v26 = vld [vmem:[%s6958_s28 + $0x20] sm:$0xff]  ;;  %v78_v29 = vld [vmem:[%s6958_s28 + $0x28] sm:$0xff]  ;;  %s6943_s28 = smov 48   ;;  %s6945_s19 = smov 24  }
  0xe9   :  { %v156_v8 = vpop.f32.mrb[0].mxu0 }
  0xea   :  { %v5242_v10 = vadd.f32 %v156_v8, %v73_v7  ;;  %v4169_v11 = vpop.f32.mrb[1].mxu0 }
  0xeb   :  { %v159_v12 = vpop.f32.mrb[2].mxu0 }
  0xec   :  { %v5244_v13 = vadd.f32 %v159_v12, %v74_v9  ;;  %v4170_v14 = vpop.f32.mrb[3].mxu0  ;;  %v188_v15 = vsel %vm187_vm2, %v5242_v10, 0.0 }
  0xed   :  { %189 = vadd.xlane.f32.xlu0 %v188_v15 }
  0xee   :  { %v191_v17 = vsel %vm187_vm2, %v5244_v13, 0.0 }
  0xf1   :  { %192 = vadd.xlane.f32.xlu0 %v191_v17  ;;  %v164_v18 = vpop.f32.mrb[4].mxu0 }
  0xf2   :  { %v5256_v20 = vadd.f32 %v164_v18, %v75_v16  ;;  %v4173_v21 = vpop.f32.mrb[5].mxu0 }
  0xf3   :  { %v167_v22 = vpop.f32.mrb[6].mxu0 }
  0xf4   :  { %v5258_v23 = vadd.f32 %v167_v22, %v76_v19  ;;  %v4174_v24 = vpop.f32.mrb[7].mxu0  ;;  %v194_v25 = vsel %vm187_vm2, %v5256_v20, 0.0 }
  0xf5   :  { %195 = vadd.xlane.f32.xlu1 %v194_v25 }
  0xf6   :  { %v197_v27 = vsel %vm187_vm2, %v5258_v23, 0.0 }
  0xf9   :  { %198 = vadd.xlane.f32.xlu1 %v197_v27  ;;  %v172_v28 = vpop.f32.mrb[8].mxu0 }
  0xfa   :  { %v5270_v30 = vadd.f32 %v172_v28, %v77_v26  ;;  %v4177_v31 = vpop.f32.mrb[9].mxu0  ;;  %v3859_v26 = vld [vmem:[%s6923_s4] ss:$0 sm:$0xff] }
  0xfb   :  { %v175_v32 = vpop.f32.mrb[10].mxu0 }
  0xfc   :  { %v5272_v33 = vadd.f32 %v175_v32, %v78_v29  ;;  %v4178_v34 = vpop.f32.mrb[11].mxu0  ;;  %v200_v35 = vsel %vm187_vm2, %v5270_v30, 0.0 }
  0xfd   :  { %201 = vadd.xlane.f32.xlu0 %v200_v35 }
  0xfe   :  { %v203_v36 = vsel %vm187_vm2, %v5272_v33, 0.0 }
  0xff   :  { %204 = vadd.xlane.f32.xlu1 %v203_v36  ;;  %v3860_v36 = vld [vmem:[%s6924_s5] ss:$0 sm:$0xff] }
 0x17a   :  { %v190_v37 = vpop.xlane.xlu0 %189 }
 0x17b   :  { %v207_v38 = vmul.f32 0.03125, %v190_v37 }
 0x17d   :  { %v213_v39 = vsub.f32 %v5242_v10, %v207_v38 }
 0x17e   :  { %v193_v40 = vpop.xlane.xlu0 %192 }
 0x17f   :  { %v208_v41 = vmul.f32 0.03125, %v193_v40  ;;  %v219_v42 = vmul.f32 %v213_v39, %v213_v39 }
 0x181   :  { %v214_v43 = vsub.f32 %v5244_v13, %v208_v41  ;;  %v225_v44 = vsel %vm187_vm2, %v219_v42, 0.0 }
 0x182   :  { %v196_v45 = vpop.xlane.xlu1 %195  ;;  %226 = vadd.xlane.f32.xlu0 %v225_v44 }
 0x183   :  { %v209_v46 = vmul.f32 0.03125, %v196_v45  ;;  %v220_v47 = vmul.f32 %v214_v43, %v214_v43 }
 0x185   :  { %v5282_v48 = vsub.f32 %v5256_v20, %v209_v46  ;;  %v228_v49 = vsel %vm187_vm2, %v220_v47, 0.0 }
 0x186   :  { %v199_v50 = vpop.xlane.xlu1 %198  ;;  %229 = vadd.xlane.f32.xlu1 %v228_v49 }
 0x187   :  { %v210_v51 = vmul.f32 0.03125, %v199_v50  ;;  %v221_v52 = vmul.f32 %v5282_v48, %v5282_v48 }
 0x189   :  { %v5288_v53 = vsub.f32 %v5258_v23, %v210_v51  ;;  %v231_v54 = vsel %vm187_vm2, %v221_v52, 0.0 }
 0x18a   :  { %232 = vadd.xlane.f32.xlu0 %v231_v54  ;;  %v202_v55 = vpop.xlane.xlu0 %201 }
 0x18b   :  { %v211_v56 = vmul.f32 0.03125, %v202_v55  ;;  %v222_v57 = vmul.f32 %v5288_v53, %v5288_v53 }
 0x18c   :  { %v205_v58 = vpop.xlane.xlu1 %204 }
 0x18d   :  { %v5294_v59 = vsub.f32 %v5270_v30, %v211_v56  ;;  %v212_v60 = vmul.f32 0.03125, %v205_v58  ;;  %v234_v61 = vsel %vm187_vm2, %v222_v57, 0.0 }
 0x18e   :  { %235 = vadd.xlane.f32.xlu1 %v234_v61 }
 0x18f   :  { %v218_v62 = vsub.f32 %v5272_v33, %v212_v60  ;;  %v223_v63 = vmul.f32 %v5294_v59, %v5294_v59 }
 0x191   :  { %v237_v0 = vsel %vm187_vm2, %v223_v63, 0.0  ;;  %v224_v2 = vmul.f32 %v218_v62, %v218_v62 }
 0x192   :  { %238 = vadd.xlane.f32.xlu0 %v237_v0 }
 0x193   :  { %v240_v3 = vsel %vm187_vm2, %v224_v2, 0.0 }
 0x194   :  { %241 = vadd.xlane.f32.xlu1 %v240_v3 }
 0x20f   :  { %v227_v6 = vpop.xlane.xlu0 %226 }
 0x210   :  { %v243_v7 = vmul.f32 0.03125, %v227_v6 }
 0x212   :  { %v249_v8 = vadd.f32 1e-06, %v243_v7 }
 0x213   :  { %v230_v9 = vpop.xlane.xlu1 %229 }
 0x214   :  { %4767 = vrsqrt.f32 %v249_v8  ;;  %v244_v11 = vmul.f32 0.03125, %v230_v9 }
 0x216   :  { %v250_v12 = vadd.f32 1e-06, %v244_v11 }
 0x217   :  { %v233_v14 = vpop.xlane.xlu0 %232 }
 0x218   :  { %4769 = vrsqrt.f32 %v250_v12  ;;  %v245_v15 = vmul.f32 0.03125, %v233_v14 }
 0x21a   :  { %v251_v16 = vadd.f32 1e-06, %v245_v15 }
 0x21b   :  { %v236_v17 = vpop.xlane.xlu1 %235 }
 0x21c   :  { %4771 = vrsqrt.f32 %v251_v16  ;;  %v246_v18 = vmul.f32 0.03125, %v236_v17 }
 0x21e   :  { %v4768_v19 = vpop.eup %4767  ;;  %v252_v21 = vadd.f32 1e-06, %v246_v18 }
 0x21f   :  { %v239_v22 = vpop.xlane.xlu0 %238  ;;  %v261_v24 = vmul.f32 %v4768_v19, %v213_v39 }
 0x220   :  { %4773 = vrsqrt.f32 %v252_v21  ;;  %v247_v25 = vmul.f32 0.03125, %v239_v22 }
 0x221   :  { %v242_v27 = vpop.xlane.xlu1 %241  ;;  %v273_v34 = vmul.f32 %v3859_v26, %v261_v24 }
 0x222   :  { %v4770_v28 = vpop.eup %4769  ;;  %v253_v29 = vadd.f32 1e-06, %v247_v25  ;;  %v248_v31 = vmul.f32 0.03125, %v242_v27 }
 0x223   :  { %v262_v32 = vmul.f32 %v4770_v28, %v214_v43  ;;  %v285_v39 = vadd.f32 %v3860_v36, %v273_v34 }
 0x224   :  { %4775 = vrsqrt.f32 %v253_v29  ;;  %v254_v35 = vadd.f32 1e-06, %v248_v31 }
 0x225   :  { %v274_v37 = vmul.f32 %v3859_v26, %v262_v32 }
 0x226   :  { %v4772_v38 = vpop.eup %4771  ;;  %4777 = vrsqrt.f32 %v254_v35 }
 0x227   :  { %v286_v40 = vadd.f32 %v3860_v36, %v274_v37  ;;  %v263_v41 = vmul.f32 %v4772_v38, %v5282_v48 }
 0x229   :  { %v296_v42 = vpack.c.bf16 %v286_v40, %v285_v39  ;;  %v275_v45 = vmul.f32 %v3859_v26, %v263_v41 }
 0x22a   :  { %v4774_v44 = vpop.eup %4773 }
 0x22b   :  { %4184 = vmatmul.mubr.msk.bf16.vlgmr.msra.gmra.mrb[0].mxu1 %vm187_vm2, %v296_v42  ;;  %v264_v43 = vmul.f32 %v4774_v44, %v5288_v53  ;;  %v287_v49 = vadd.f32 %v3860_v36, %v275_v45 }
 0x22c   :  { %4187 = vmatprep.mubr.msk.bf16.mxu1 %vm5088_vm0, %v5087_v1 }
 0x22d   :  { %v276_v46 = vmul.f32 %v3859_v26, %v264_v43 }
 0x22e   :  { %v4776_v47 = vpop.eup %4775 }
 0x22f   :  { %v288_v50 = vadd.f32 %v3860_v36, %v276_v46  ;;  %v265_v51 = vmul.f32 %v4776_v47, %v5294_v59  ;;  %v3861_v59 = vld [vmem:[%s6926_s7] ss:$0 sm:$0xff] }
 0x230   :  { %v4778_v52 = vpop.eup %4777 }
 0x231   :  { %v297_v54 = vpack.c.bf16 %v288_v50, %v287_v49  ;;  %v266_v55 = vmul.f32 %v4778_v52, %v218_v62  ;;  %v277_v48 = vmul.f32 %v3859_v26, %v265_v51 }
 0x233   :  { %4188 = vmatmul.mubr.msk.bf16.gmra.mrb[4].mxu1 %vm187_vm2, %v297_v54  ;;  %v278_v56 = vmul.f32 %v3859_v26, %v266_v55  ;;  %v289_v57 = vadd.f32 %v3860_v36, %v277_v48 }
 0x234   :  { %4191 = vmatprep.mubr.msk.bf16.mxu1 %vm5088_vm0, %v5087_v1 }
 0x235   :  { %v290_v53 = vadd.f32 %v3860_v36, %v278_v56 }
 0x237   :  { %v298_v58 = vpack.c.bf16 %v290_v53, %v289_v57 }
 0x23b   :  { %4192 = vmatmul.mubr.msk.bf16.gmra.mrb[8].mxu1 %vm187_vm2, %v298_v58 }
 0x23c   :  { %4201 = vmatprep.mubr.msk.bf16.mxu1 %vm5088_vm0, %v5087_v1 }
 0x2fe   :  { %v360_v60 = vpop.f32.mrb[0].mxu1 }
 0x2ff   :  { %v4185_v61 = vpop.f32.mrb[1].mxu1  ;;  %v361_v63 = vadd.f32 %v3861_v59, %v360_v60 }
 0x300   :  { %v363_v62 = vpop.f32.mrb[2].mxu1  ;;  %v5460_v61 = vld [vmem:[%s6922_s3] sm:$0xff] }
 0x301   :  { %v364_v0 = vadd.f32 %v3861_v59, %v363_v62  ;;  %v4186_v2 = vpop.f32.mrb[3].mxu1 }
 0x303   :  { %v5331_v3 = vpack.c.bf16 %v364_v0, %v361_v63  ;;  %v5465_v63 = vld [vmem:[%s6922_s3 + $0x8] sm:$0xff] }
 0x305   :  { %389 = vrot.lane.b32.xlu0 %v5331_v3, %s5089_s20 }
 0x306   :  { %v368_v4 = vpop.f32.mrb[4].mxu1 }
 0x307   :  { %v4189_v5 = vpop.f32.mrb[5].mxu1  ;;  %v369_v7 = vadd.f32 %v3861_v59, %v368_v4 }
 0x308   :  { %v371_v6 = vpop.f32.mrb[6].mxu1 }
 0x309   :  { %v372_v8 = vadd.f32 %v3861_v59, %v371_v6  ;;  %v4190_v9 = vpop.f32.mrb[7].mxu1 }
 0x30a   :  { %v5480_v9 = vld [vmem:[%s6922_s3 + $0x10] sm:$0xff] }
 0x30b   :  { %v5335_v11 = vpack.c.bf16 %v372_v8, %v369_v7 }
 0x30d   :  { %623 = vrot.lane.b32.xlu0 %v5335_v11, %s5090_s21  ;;  %391 = vrot.lane.b32.xlu1 %v5335_v11, %s5089_s20 }
 0x30e   :  { %v376_v12 = vpop.f32.mrb[8].mxu1 }
 0x30f   :  { %v4193_v14 = vpop.f32.mrb[9].mxu1  ;;  %v377_v16 = vadd.f32 %v3861_v59, %v376_v12 }
 0x310   :  { %v379_v15 = vpop.f32.mrb[10].mxu1  ;;  %v5485_v14 = vld [vmem:[%s6922_s3 + $0x18] sm:$0xff] }
 0x311   :  { %v380_v17 = vadd.f32 %v3861_v59, %v379_v15  ;;  %615 = vrot.lane.b32.xlu0 %v5331_v3, %s5091_s22  ;;  %v4194_v18 = vpop.f32.mrb[11].mxu1 }
 0x313   :  { %v5343_v19 = vpack.c.bf16 %v380_v17, %v377_v16 }
 0x315   :  { %617 = vrot.lane.b32.xlu0 %v5335_v11, %s5091_s22  ;;  %393 = vrot.lane.b32.xlu1 %v5343_v19, %s5089_s20 }
 0x319   :  { %619 = vrot.lane.b32.xlu0 %v5343_v19, %s5091_s22  ;;  %621 = vrot.lane.b32.xlu1 %v5331_v3, %s5090_s21 }
 0x31d   :  { %846 = vrot.lane.b32.xlu0 %v5331_v3, %s5092_s2  ;;  %625 = vrot.lane.b32.xlu1 %v5343_v19, %s5090_s21 }
 0x321   :  { %848 = vrot.lane.b32.xlu0 %v5335_v11, %s5092_s2  ;;  %852 = vrot.lane.b32.xlu1 %v5331_v3, %s5093_s23 }
 0x325   :  { %850 = vrot.lane.b32.xlu0 %v5343_v19, %s5092_s2  ;;  %854 = vrot.lane.b32.xlu1 %v5335_v11, %s5093_s23 }
 0x329   :  { %1077 = vrot.lane.b32.xlu0 %v5331_v3, %s5094_s24  ;;  %856 = vrot.lane.b32.xlu1 %v5343_v19, %s5093_s23 }
 0x32d   :  { %1081 = vrot.lane.b32.xlu0 %v5343_v19, %s5094_s24  ;;  %1083 = vrot.lane.b32.xlu1 %v5331_v3, %s5095_s25 }
 0x331   :  { %542 = vrot.lane.b32.xlu0 %v5335_v11, %s5096_s26  ;;  %1085 = vrot.lane.b32.xlu1 %v5335_v11, %s5095_s25 }
 0x335   :  { %773 = vrot.lane.b32.xlu0 %v5335_v11, %s6951_s27  ;;  %1087 = vrot.lane.b32.xlu1 %v5343_v19, %s5095_s25 }
 0x339   :  { %1079 = vrot.lane.b32.xlu1 %v5335_v11, %s5094_s24 }
 0x33d   :  { %540 = vrot.lane.b32.xlu1 %v5331_v3, %s5096_s26 }
 0x341   :  { %771 = vrot.lane.b32.xlu1 %v5331_v3, %s6951_s27 }
 0x345   :  { %544 = vrot.lane.b32.xlu1 %v5343_v19, %s5096_s26 }
 0x377   :  { %v390_v21 = vpop.permute.xlu0 %389 }
 0x378   :  { %v406_v22 = vsel %vm395_vm3, %v390_v21, 0 }
 0x379   :  { %4196 = vmatpush3.bf16.xpose.msra.mxu1 %v406_v22 }
 0x37a   :  { %4197 = vmatprep.subr.bf16.mxu1 %v5087_v1 }
 0x37f   :  { %v624_v24 = vpop.permute.xlu0 %623  ;;  %v392_v25 = vpop.permute.xlu1 %391 }
 0x380   :  { %v409_v26 = vsel %vm395_vm3, %v392_v25, 0  ;;  %v640_v40 = vsel %vm395_vm3, %v624_v24, 0  ;;  %v5498_v24 = vld [vmem:[%s6922_s3 + $0x20] sm:$0xff] }
 0x381   :  { %4198 = vmatpush3.bf16.xpose.msra.mxu1 %v409_v26 }
 0x382   :  { %4199 = vmatprep.subr.bf16.mxu1 %v5087_v1 }
 0x383   :  { %v616_v27 = vpop.permute.xlu0 %615 }
 0x387   :  { %v394_v28 = vpop.permute.xlu1 %393  ;;  %v618_v31 = vpop.permute.xlu0 %617 }
 0x388   :  { %v412_v29 = vsel %vm395_vm3, %v394_v28, 0 }
 0x389   :  { %4200 = vmatpush3.bf16.xpose.msra.mxu1 %v412_v29 }
 0x38a   :  { %4231 = vmatprep.subr.bf16.mxu1 %v5087_v1 }
 0x38b   :  { %v622_v32 = vpop.permute.xlu1 %621  ;;  %v620_v34 = vpop.permute.xlu0 %619 }
 0x38c   :  { %v637_v36 = vsel %vm395_vm3, %v622_v32, 0 }
 0x38f   :  { %v626_v35 = vpop.permute.xlu1 %625  ;;  %v847_v38 = vpop.permute.xlu0 %846 }
 0x390   :  { %4202 = vmatmul.mubr.msk.bf16.vlgmr.msra.gmra.mrb[12].mxu1 %vm395_vm3, %v5331_v3  ;;  %v643_v43 = vsel %vm395_vm3, %v626_v35, 0 }
 0x391   :  { %4232 = vmatpush3.bf16.xpose.msra.mxu1 %v637_v36  ;;  %4205 = vmatprep.mubr.msk.bf16.mxu1 %vm5088_vm0, %v5087_v1 }
 0x392   :  { %4233 = vmatprep.subr.bf16.mxu1 %v5087_v1 }
 0x393   :  { %v853_v37 = vpop.permute.xlu1 %852  ;;  %v849_v41 = vpop.permute.xlu0 %848 }
 0x394   :  { %v868_v50 = vsel %vm395_vm3, %v853_v37, 0 }
 0x397   :  { %v855_v39 = vpop.permute.xlu1 %854  ;;  %v851_v45 = vpop.permute.xlu0 %850 }
 0x398   :  { %4206 = vmatmul.mubr.msk.bf16.gmra.mrb[16].mxu1 %vm395_vm3, %v5335_v11  ;;  %v871_v55 = vsel %vm395_vm3, %v855_v39, 0 }
 0x399   :  { %4234 = vmatpush3.bf16.xpose.msra.mxu1 %v640_v40  ;;  %4209 = vmatprep.mubr.msk.bf16.mxu1 %vm5088_vm0, %v5087_v1 }
 0x39a   :  { %4235 = vmatprep.subr.bf16.mxu1 %v5087_v1 }
 0x39b   :  { %v857_v42 = vpop.permute.xlu1 %856  ;;  %v1078_v47 = vpop.permute.xlu0 %1077 }
 0x39c   :  { %v874_v57 = vsel %vm395_vm3, %v857_v42, 0 }
 0x39f   :  { %v1084_v44 = vpop.permute.xlu1 %1083  ;;  %v1082_v52 = vpop.permute.xlu0 %1081 }
 0x3a0   :  { %4210 = vmatmul.mubr.msk.bf16.gmra.mrb[20].mxu1 %vm395_vm3, %v5343_v19  ;;  %v1099_v58 = vsel %vm395_vm3, %v1084_v44, 0 }
 0x3a1   :  { %4236 = vmatpush3.bf16.xpose.msra.mxu1 %v643_v43  ;;  %4237 = vmatprep.mubr.msk.bf16.mxu1 %vm5088_vm0, %v5087_v1 }
 0x3a2   :  { %4267 = vmatprep.subr.bf16.mxu1 %v5087_v1 }
 0x3a3   :  { %v1086_v46 = vpop.permute.xlu1 %1085  ;;  %v543_v48 = vpop.permute.xlu0 %542 }
 0x3a4   :  { %v1102_v59 = vsel %vm395_vm3, %v1086_v46, 0 }
 0x3a7   :  { %v1088_v49 = vpop.permute.xlu1 %1087 }
 0x3a8   :  { %4238 = vmatmul.mubr.msk.bf16.vlgmr.msra.gmra.mrb[24].mxu1 %vm395_vm3, %v616_v27  ;;  %v1105_v60 = vsel %vm395_vm3, %v1088_v49, 0  ;;  %v5505_v27 = vld [vmem:[%s6922_s3 + $0x28] sm:$0xff] }
 0x3a9   :  { %4268 = vmatpush3.bf16.xpose.msra.mxu1 %v868_v50  ;;  %4241 = vmatprep.mubr.msk.bf16.mxu1 %vm5088_vm0, %v5087_v1 }
 0x3aa   :  { %4269 = vmatprep.subr.bf16.mxu1 %v5087_v1 }
 0x3ab   :  { %v1080_v51 = vpop.permute.xlu1 %1079 }
 0x3af   :  { %v541_v54 = vpop.permute.xlu1 %540 }
 0x3b0   :  { %4214 = vmatpush3.bf16.msra.mxu0 %v541_v54  ;;  %4242 = vmatmul.mubr.msk.bf16.gmra.mrb[28].mxu1 %vm395_vm3, %v618_v31 }
 0x3b1   :  { %4270 = vmatpush3.bf16.xpose.msra.mxu1 %v871_v55  ;;  %4215 = vmatprep.subr.bf16.mxu0 %v5087_v1 }
 0x3b2   :  { %4245 = vmatprep.mubr.msk.bf16.mxu1 %vm5088_vm0, %v5087_v1  ;;  %4271 = vmatprep.subr.bf16.mxu1 %v5087_v1 }
 0x3b3   :  { %v5424_v56 = vpop.permute.xlu1 %771 }
 0x3b4   :  { %4216 = vmatpush3.bf16.msra.mxu0 %v543_v48 }
 0x3b5   :  { %4217 = vmatprep.subr.bf16.mxu0 %v5087_v1 }
 0x3b7   :  { %v545_v53 = vpop.permute.xlu1 %544 }
 0x3b8   :  { %4218 = vmatpush3.bf16.msra.mxu0 %v545_v53  ;;  %4246 = vmatmul.mubr.msk.bf16.gmra.mrb[32].mxu1 %vm395_vm3, %v620_v34 }
 0x3b9   :  { %4272 = vmatpush3.bf16.xpose.msra.mxu1 %v874_v57  ;;  %4273 = vmatprep.mubr.msk.bf16.mxu1 %vm5088_vm0, %v5087_v1 }
 0x3ba   :  { %4303 = vmatprep.subr.bf16.mxu1 %v5087_v1  ;;  %4249 = vmatprep.subr.bf16.mxu0 %v5087_v1 }
 0x3c0   :  { %4274 = vmatmul.mubr.msk.bf16.vlgmr.msra.gmra.mrb[36].mxu1 %vm395_vm3, %v847_v38 }
 0x3c1   :  { %4304 = vmatpush3.bf16.xpose.msra.mxu1 %v1099_v58  ;;  %4277 = vmatprep.mubr.msk.bf16.mxu1 %vm5088_vm0, %v5087_v1 }
 0x3c2   :  { %4305 = vmatprep.subr.bf16.mxu1 %v5087_v1 }
 0x3c8   :  { %4278 = vmatmul.mubr.msk.bf16.gmra.mrb[40].mxu1 %vm395_vm3, %v849_v41 }
 0x3c9   :  { %4306 = vmatpush3.bf16.xpose.msra.mxu1 %v1102_v59  ;;  %4281 = vmatprep.mubr.msk.bf16.mxu1 %vm5088_vm0, %v5087_v1 }
 0x3ca   :  { %4307 = vmatprep.subr.bf16.mxu1 %v5087_v1 }
 0x3d0   :  { %4282 = vmatmul.mubr.msk.bf16.gmra.mrb[44].mxu1 %vm395_vm3, %v851_v45 }
 0x3d1   :  { %4308 = vmatpush3.bf16.xpose.msra.mxu1 %v1105_v60  ;;  %4309 = vmatprep.mubr.msk.bf16.mxu1 %vm5088_vm0, %v5087_v1 }
 0x3d2   :  { %4619 = vmatprep.subr.bf16.mxu1 %v5087_v1 }
 0x3d8   :  { %4310 = vmatmul.mubr.msk.bf16.vlgmr.msra.gmra.mrb[48].mxu1 %vm395_vm3, %v1078_v47 }
 0x3d9   :  { %4313 = vmatprep.mubr.msk.bf16.mxu1 %vm5088_vm0, %v5087_v1 }
 0x3e0   :  { %4314 = vmatmul.mubr.msk.bf16.gmra.mrb[52].mxu1 %vm395_vm3, %v1080_v51 }
 0x3e1   :  { %4317 = vmatprep.mubr.msk.bf16.mxu1 %vm5088_vm0, %v5087_v1 }
 0x3e8   :  { %4318 = vmatmul.mubr.msk.bf16.gmra.mrb[56].mxu1 %vm395_vm3, %v1082_v52 }
 0x3e9   :  { %4331 = vmatprep.mubr.msk.bf16.mxu1 %vm5088_vm0, %v5087_v1 }
 0x463   :  { %v448_v62 = vpop.f32.mrb[12].mxu1 }
 0x464   :  { %v5468_v0 = vadd.f32 %v448_v62, %v5460_v61  ;;  %v4203_v2 = vpop.f32.mrb[13].mxu1 }
 0x465   :  { %v451_v4 = vpop.f32.mrb[14].mxu1 }
 0x466   :  { %v5471_v5 = vadd.f32 %v451_v4, %v5465_v63  ;;  %v4204_v6 = vpop.f32.mrb[15].mxu1  ;;  %v471_v7 = vsel %vm112_vm1, %v5468_v0, -inf }
 0x467   :  { %472 = vmax.xlane.f32.xlu1 %v471_v7 }
 0x468   :  { %v474_v8 = vsel %vm112_vm1, %v5471_v5, -inf }
 0x469   :  { %475 = vmax.xlane.f32.xlu0 %v474_v8 }
 0x46b   :  { %v456_v12 = vpop.f32.mrb[16].mxu1 }
 0x46c   :  { %v5488_v15 = vadd.f32 %v456_v12, %v5480_v9  ;;  %v4207_v16 = vpop.f32.mrb[17].mxu1 }
 0x46d   :  { %v459_v17 = vpop.f32.mrb[18].mxu1 }
 0x46e   :  { %v5491_v18 = vadd.f32 %v459_v17, %v5485_v14  ;;  %v4208_v21 = vpop.f32.mrb[19].mxu1  ;;  %v477_v22 = vsel %vm112_vm1, %v5488_v15, -inf }
 0x46f   :  { %478 = vmax.xlane.f32.xlu0 %v477_v22 }
 0x470   :  { %v480_v25 = vsel %vm112_vm1, %v5491_v18, -inf }
 0x473   :  { %481 = vmax.xlane.f32.xlu0 %v480_v25  ;;  %v464_v26 = vpop.f32.mrb[20].mxu1 }
 0x474   :  { %v5508_v28 = vadd.f32 %v464_v26, %v5498_v24  ;;  %v4211_v29 = vpop.f32.mrb[21].mxu1 }
 0x475   :  { %v467_v31 = vpop.f32.mrb[22].mxu1 }
 0x476   :  { %v5511_v32 = vadd.f32 %v467_v31, %v5505_v27  ;;  %v4212_v34 = vpop.f32.mrb[23].mxu1  ;;  %v483_v35 = vsel %vm112_vm1, %v5508_v28, -inf }
 0x477   :  { %484 = vmax.xlane.f32.xlu1 %v483_v35 }
 0x478   :  { %v486_v36 = vsel %vm112_vm1, %v5511_v32, -inf }
 0x479   :  { %487 = vmax.xlane.f32.xlu0 %v486_v36 }
 0x47b   :  { %v679_v37 = vpop.f32.mrb[24].mxu1 }
 0x47c   :  { %v5518_v38 = vadd.f32 %v679_v37, %v5460_v61  ;;  %v4239_v39 = vpop.f32.mrb[25].mxu1 }
 0x47d   :  { %v682_v40 = vpop.f32.mrb[26].mxu1 }
 0x47e   :  { %v5521_v41 = vadd.f32 %v682_v40, %v5465_v63  ;;  %v4240_v42 = vpop.f32.mrb[27].mxu1  ;;  %v702_v44 = vsel %vm112_vm1, %v5518_v38, -inf }
 0x47f   :  { %703 = vmax.xlane.f32.xlu1 %v702_v44 }
 0x480   :  { %v705_v43 = vsel %vm112_vm1, %v5521_v41, -inf }
 0x481   :  { %706 = vmax.xlane.f32.xlu0 %v705_v43 }
 0x483   :  { %v687_v45 = vpop.f32.mrb[28].mxu1 }
 0x484   :  { %v5528_v46 = vadd.f32 %v687_v45, %v5480_v9  ;;  %v4243_v47 = vpop.f32.mrb[29].mxu1 }
 0x485   :  { %v690_v49 = vpop.f32.mrb[30].mxu1 }
 0x486   :  { %v5531_v50 = vadd.f32 %v690_v49, %v5485_v14  ;;  %v4244_v51 = vpop.f32.mrb[31].mxu1  ;;  %v708_v52 = vsel %vm112_vm1, %v5528_v46, -inf }
 0x487   :  { %709 = vmax.xlane.f32.xlu1 %v708_v52 }
 0x488   :  { %v711_v54 = vsel %vm112_vm1, %v5531_v50, -inf }
 0x489   :  { %712 = vmax.xlane.f32.xlu0 %v711_v54 }
 0x48b   :  { %v695_v55 = vpop.f32.mrb[32].mxu1 }
 0x48c   :  { %v5538_v48 = vadd.f32 %v695_v55, %v5498_v24  ;;  %v4247_v53 = vpop.f32.mrb[33].mxu1 }
 0x48d   :  { %v698_v57 = vpop.f32.mrb[34].mxu1 }
 0x48e   :  { %v4248_v58 = vpop.f32.mrb[35].mxu1  ;;  %v714_v59 = vsel %vm112_vm1, %v5538_v48, -inf  ;;  %v5549_v42 = vadd.f32 %v698_v57, %v5505_v27 }
 0x48f   :  { %715 = vmax.xlane.f32.xlu1 %v714_v59 }
 0x490   :  { %v717_v49 = vsel %vm112_vm1, %v5549_v42, -inf }
 0x493   :  { %v910_v60 = vpop.f32.mrb[36].mxu1 }
 0x494   :  { %v4275_v62 = vpop.f32.mrb[37].mxu1  ;;  %v5552_v45 = vadd.f32 %v910_v60, %v5460_v61 }
 0x495   :  { %v913_v2 = vpop.f32.mrb[38].mxu1 }
 0x496   :  { %v4276_v4 = vpop.f32.mrb[39].mxu1  ;;  %v5555_v47 = vadd.f32 %v913_v2, %v5465_v63  ;;  %v933_v52 = vsel %vm112_vm1, %v5552_v45, -inf }
 0x498   :  { %v936_v55 = vsel %vm112_vm1, %v5555_v47, -inf }
 0x49b   :  { %v918_v6 = vpop.f32.mrb[40].mxu1 }
 0x49c   :  { %v4279_v7 = vpop.f32.mrb[41].mxu1  ;;  %v5560_v51 = vadd.f32 %v918_v6, %v5480_v9 }
 0x49d   :  { %v921_v8 = vpop.f32.mrb[42].mxu1 }
 0x49e   :  { %v4280_v12 = vpop.f32.mrb[43].mxu1  ;;  %v5565_v54 = vadd.f32 %v921_v8, %v5485_v14  ;;  %v939_v57 = vsel %vm112_vm1, %v5560_v51, -inf }
 0x49f   :  { %1002 = vrot.lane.b32.xlu0 %v5331_v3, %s6943_s28 }
 0x4a0   :  { %775 = vrot.lane.b32.xlu1 %v5343_v19, %s6951_s27  ;;  %v942_v59 = vsel %vm112_vm1, %v5565_v54, -inf }
 0x4a3   :  { %1004 = vrot.lane.b32.xlu0 %v5335_v11, %s6943_s28  ;;  %v926_v16 = vpop.f32.mrb[44].mxu1 }
 0x4a4   :  { %v4283_v17 = vpop.f32.mrb[45].mxu1  ;;  %v5570_v53 = vadd.f32 %v926_v16, %v5498_v24 }
 0x4a5   :  { %v929_v21 = vpop.f32.mrb[46].mxu1 }
 0x4a6   :  { %v4284_v22 = vpop.f32.mrb[47].mxu1  ;;  %v5575_v58 = vadd.f32 %v929_v21, %v5505_v27  ;;  %v945_v62 = vsel %vm112_vm1, %v5570_v53, -inf }
 0x4a8   :  { %v948_v4 = vsel %vm112_vm1, %v5575_v58, -inf }
 0x4ab   :  { %v1141_v25 = vpop.f32.mrb[48].mxu1 }
 0x4ac   :  { %v4311_v26 = vpop.f32.mrb[49].mxu1  ;;  %v5580_v60 = vadd.f32 %v1141_v25, %v5460_v61 }
 0x4ad   :  { %v1144_v29 = vpop.f32.mrb[50].mxu1 }
 0x4ae   :  { %v4312_v31 = vpop.f32.mrb[51].mxu1  ;;  %v5585_v2 = vadd.f32 %v1144_v29, %v5465_v63  ;;  %v1164_v7 = vsel %vm112_vm1, %v5580_v60, -inf }
 0x4b0   :  { %v1167_v8 = vsel %vm112_vm1, %v5585_v2, -inf }
 0x4b3   :  { %v1149_v34 = vpop.f32.mrb[52].mxu1 }
 0x4b4   :  { %v4315_v35 = vpop.f32.mrb[53].mxu1  ;;  %v5590_v6 = vadd.f32 %v1149_v34, %v5480_v9 }
 0x4b5   :  { %v1152_v36 = vpop.f32.mrb[54].mxu1 }
 0x4b6   :  { %v4316_v37 = vpop.f32.mrb[55].mxu1  ;;  %v5595_v61 = vadd.f32 %v1152_v36, %v5485_v14  ;;  %v1170_v12 = vsel %vm112_vm1, %v5590_v6, -inf }
 0x4b8   :  { %v1173_v16 = vsel %vm112_vm1, %v5595_v61, -inf }
 0x4bb   :  { %v1157_v39 = vpop.f32.mrb[56].mxu1 }
 0x4bc   :  { %v4319_v40 = vpop.f32.mrb[57].mxu1  ;;  %v5600_v63 = vadd.f32 %v1157_v39, %v5498_v24  ;;  %v5613_v24 = vpop.permute.xlu0 %773 }
 0x4bd   :  { %v1160_v44 = vpop.f32.mrb[58].mxu1 }
 0x4be   :  { %v4320_v43 = vpop.f32.mrb[59].mxu1  ;;  %v5605_v9 = vadd.f32 %v1160_v44, %v5505_v27  ;;  %v1176_v14 = vsel %vm112_vm1, %v5600_v63, -inf }
 0x4c0   :  { %v1179_v17 = vsel %vm112_vm1, %v5605_v9, -inf }
 0x4c2   :  { %718 = vmax.xlane.f32.xlu0 %v717_v49 }
 0x4c4   :  { %934 = vmax.xlane.f32.xlu1 %v933_v52 }
 0x4c6   :  { %937 = vmax.xlane.f32.xlu0 %v936_v55 }
 0x4c8   :  { %940 = vmax.xlane.f32.xlu1 %v939_v57 }
 0x4ca   :  { %943 = vmax.xlane.f32.xlu0 %v942_v59 }
 0x4cc   :  { %946 = vmax.xlane.f32.xlu1 %v945_v62 }
 0x4ce   :  { %949 = vmax.xlane.f32.xlu0 %v948_v4 }
 0x4d0   :  { %1165 = vmax.xlane.f32.xlu1 %v1164_v7 }
 0x4d2   :  { %1168 = vmax.xlane.f32.xlu0 %v1167_v8 }
 0x4d4   :  { %1171 = vmax.xlane.f32.xlu1 %v1170_v12 }
 0x4d6   :  { %1174 = vmax.xlane.f32.xlu0 %v1173_v16 }
 0x4d8   :  { %1177 = vmax.xlane.f32.xlu1 %v1176_v14 }
 0x4da   :  { %1180 = vmax.xlane.f32.xlu0 %v1179_v17 }
 0x4f4   :  { %v473_v21 = vpop.xlane.xlu1 %472 }
 0x4f5   :  { %v489_v22 = vsub.f32 %v5468_v0, %v473_v21 }
 0x4f6   :  { %v476_v25 = vpop.xlane.xlu0 %475 }
 0x4f7   :  { %v495_v27 = vmul.f32 1.442695, %v489_v22  ;;  %v490_v26 = vsub.f32 %v5471_v5, %v476_v25 }
 0x4f9   :  { %4779 = vpow2.f32 %v495_v27  ;;  %v497_v29 = vmul.f32 1.442695, %v490_v26 }
 0x4fb   :  { %4781 = vpow2.f32 %v497_v29 }
 0x4fc   :  { %v479_v31 = vpop.xlane.xlu0 %478 }
 0x4fd   :  { %v491_v34 = vsub.f32 %v5488_v15, %v479_v31 }
 0x4ff   :  { %v499_v35 = vmul.f32 1.442695, %v491_v34 }
 0x500   :  { %v482_v36 = vpop.xlane.xlu0 %481 }
 0x501   :  { %4783 = vpow2.f32 %v499_v35  ;;  %v492_v37 = vsub.f32 %v5491_v18, %v482_v36 }
 0x503   :  { %v5619_v39 = vpop.eup %4779  ;;  %v501_v40 = vmul.f32 1.442695, %v492_v37 }
 0x504   :  { %v485_v44 = vpop.xlane.xlu1 %484  ;;  %v507_v0 = vsel %vm112_vm1, %v5619_v39, 0.0 }
 0x505   :  { %v5623_v43 = vpop.eup %4781  ;;  %4785 = vpow2.f32 %v501_v40  ;;  %v493_v5 = vsub.f32 %v5508_v28, %v485_v44  ;;  %508 = vadd.xlane.f32.xlu1 %v507_v0 }
 0x506   :  { %v488_v49 = vpop.xlane.xlu0 %487  ;;  %v510_v15 = vsel %vm112_vm1, %v5623_v43, 0.0 }
 0x507   :  { %v503_v52 = vmul.f32 1.442695, %v493_v5  ;;  %v494_v18 = vsub.f32 %v5511_v32, %v488_v49  ;;  %511 = vadd.xlane.f32.xlu0 %v510_v15 }
 0x509   :  { %4787 = vpow2.f32 %v503_v52  ;;  %v505_v55 = vmul.f32 1.442695, %v494_v18 }
 0x50b   :  { %v5629_v57 = vpop.eup %4783  ;;  %4789 = vpow2.f32 %v505_v55 }
 0x50c   :  { %v704_v59 = vpop.xlane.xlu1 %703  ;;  %v513_v62 = vsel %vm112_vm1, %v5629_v57, 0.0 }
 0x50d   :  { %v720_v28 = vsub.f32 %v5518_v38, %v704_v59  ;;  %514 = vadd.xlane.f32.xlu1 %v513_v62 }
 0x50e   :  { %v707_v21 = vpop.xlane.xlu0 %706 }
 0x50f   :  { %v5634_v4 = vpop.eup %4785  ;;  %v726_v7 = vmul.f32 1.442695, %v720_v28  ;;  %v721_v22 = vsub.f32 %v5521_v41, %v707_v21 }
 0x510   :  { %v516_v8 = vsel %vm112_vm1, %v5634_v4, 0.0 }
 0x511   :  { %4791 = vpow2.f32 %v726_v7  ;;  %517 = vadd.xlane.f32.xlu0 %v516_v8  ;;  %v728_v27 = vmul.f32 1.442695, %v721_v22 }
 0x513   :  { %v5638_v32 = vpop.eup %4787  ;;  %4793 = vpow2.f32 %v728_v27 }
 0x514   :  { %v519_v12 = vsel %vm112_vm1, %v5638_v32, 0.0  ;;  %v710_v25 = vpop.xlane.xlu1 %709 }
 0x515   :  { %v5642_v16 = vpop.eup %4789  ;;  %520 = vadd.xlane.f32.xlu1 %v519_v12  ;;  %v722_v26 = vsub.f32 %v5528_v46, %v710_v25 }
 0x516   :  { %v522_v38 = vsel %vm112_vm1, %v5642_v16, 0.0  ;;  %v713_v29 = vpop.xlane.xlu0 %712 }
 0x517   :  { %523 = vadd.xlane.f32.xlu0 %v522_v38  ;;  %v730_v31 = vmul.f32 1.442695, %v722_v26  ;;  %v723_v34 = vsub.f32 %v5531_v50, %v713_v29 }
 0x519   :  { %4795 = vpow2.f32 %v730_v31  ;;  %v732_v36 = vmul.f32 1.442695, %v723_v34 }
 0x51a   :  { %v5658_v37 = vpop.permute.xlu0 %1002 }
 0x51b   :  { %v5646_v14 = vpop.eup %4791  ;;  %4797 = vpow2.f32 %v732_v36 }
 0x51c   :  { %v738_v17 = vsel %vm112_vm1, %v5646_v14, 0.0  ;;  %v716_v35 = vpop.xlane.xlu1 %715 }
 0x51d   :  { %739 = vadd.xlane.f32.xlu1 %v738_v17  ;;  %v5660_v44 = vpop.eup %4793 }
 0x51e   :  { %v5662_v41 = vpop.permute.xlu0 %1004  ;;  %v741_v46 = vsel %vm112_vm1, %v5660_v44, 0.0 }
 0x520   :  { %v5668_v50 = vpop.permute.xlu1 %775 }
 0x523   :  { %v5666_v0 = vpop.eup %4795 }
 0x525   :  { %v5672_v49 = vpop.eup %4797 }
 0x526   :  { %v747_v62 = vsel %vm112_vm1, %v5672_v49, 0.0 }
 0x52d   :  { %1233 = vrot.lane.b32.xlu0 %v5331_v3, %s6941_s29  ;;  %v724_v3 = vsub.f32 %v5538_v48, %v716_v35  ;;  %v744_v48 = vsel %vm112_vm1, %v5666_v0, 0.0 }
 0x52e   :  { %1006 = vrot.lane.b32.xlu1 %v5343_v19, %s6943_s28 }
 0x52f   :  { %v734_v40 = vmul.f32 1.442695, %v724_v3 }
 0x531   :  { %4799 = vpow2.f32 %v734_v40 }
 0x53b   :  { %v5678_v28 = vpop.eup %4799 }
 0x54c   :  { %742 = vadd.xlane.f32.xlu0 %v741_v46 }
 0x54f   :  { %v719_v5 = vpop.xlane.xlu0 %718 }
 0x550   :  { %v725_v15 = vsub.f32 %v5549_v42, %v719_v5  ;;  %745 = vadd.xlane.f32.xlu0 %v744_v48 }
 0x551   :  { %v935_v52 = vpop.xlane.xlu1 %934 }
 0x552   :  { %v736_v18 = vmul.f32 1.442695, %v725_v15  ;;  %v951_v55 = vsub.f32 %v5552_v45, %v935_v52  ;;  %v750_v45 = vsel %vm112_vm1, %v5678_v28, 0.0 }
 0x553   :  { %v938_v59 = vpop.xlane.xlu0 %937 }
 0x554   :  { %4801 = vpow2.f32 %v736_v18  ;;  %v957_v7 = vmul.f32 1.442695, %v951_v55  ;;  %v952_v8 = vsub.f32 %v5555_v47, %v938_v59  ;;  %748 = vadd.xlane.f32.xlu0 %v747_v62 }
 0x555   :  { %v941_v12 = vpop.xlane.xlu1 %940 }
 0x556   :  { %4803 = vpow2.f32 %v957_v7  ;;  %v959_v38 = vmul.f32 1.442695, %v952_v8  ;;  %v953_v42 = vsub.f32 %v5560_v51, %v941_v12 }
 0x557   :  { %v944_v17 = vpop.xlane.xlu0 %943 }
 0x558   :  { %4805 = vpow2.f32 %v959_v38  ;;  %v961_v21 = vmul.f32 1.442695, %v953_v42  ;;  %v954_v22 = vsub.f32 %v5565_v54, %v944_v17  ;;  %751 = vadd.xlane.f32.xlu0 %v750_v45 }
 0x559   :  { %v947_v25 = vpop.xlane.xlu1 %946 }
 0x55a   :  { %4807 = vpow2.f32 %v961_v21  ;;  %v963_v27 = vmul.f32 1.442695, %v954_v22  ;;  %v955_v47 = vsub.f32 %v5570_v53, %v947_v25 }
 0x55b   :  { %v950_v26 = vpop.xlane.xlu0 %949 }
 0x55c   :  { %4809 = vpow2.f32 %v963_v27  ;;  %v965_v29 = vmul.f32 1.442695, %v955_v47  ;;  %v956_v31 = vsub.f32 %v5575_v58, %v950_v26 }
 0x55d   :  { %v1166_v51 = vpop.xlane.xlu1 %1165 }
 0x55e   :  { %v5687_v34 = vpop.eup %4801  ;;  %4811 = vpow2.f32 %v965_v29  ;;  %v967_v35 = vmul.f32 1.442695, %v956_v31  ;;  %v1182_v36 = vsub.f32 %v5580_v60, %v1166_v51 }
 0x55f   :  { %v1169_v3 = vpop.xlane.xlu0 %1168  ;;  %v753_v54 = vsel %vm112_vm1, %v5687_v34, 0.0 }
 0x560   :  { %v5692_v40 = vpop.eup %4803  ;;  %v1188_v46 = vmul.f32 1.442695, %v1182_v36  ;;  %v1183_v53 = vsub.f32 %v5585_v2, %v1169_v3  ;;  %754 = vadd.xlane.f32.xlu0 %v753_v54  ;;  %4813 = vpow2.f32 %v967_v35 }
 0x561   :  { %v1172_v5 = vpop.xlane.xlu1 %1171  ;;  %v969_v58 = vsel %vm112_vm1, %v5692_v40, 0.0 }
 0x562   :  { %v5697_v48 = vpop.eup %4805  ;;  %4815 = vpow2.f32 %v1188_v46  ;;  %v1190_v15 = vmul.f32 1.442695, %v1183_v53  ;;  %v1184_v60 = vsub.f32 %v5590_v6, %v1172_v5  ;;  %970 = vadd.xlane.f32.xlu1 %v969_v58 }
 0x563   :  { %v1175_v52 = vpop.xlane.xlu0 %1174  ;;  %v972_v18 = vsel %vm112_vm1, %v5697_v48, 0.0 }
 0x564   :  { %v5702_v55 = vpop.eup %4807  ;;  %v1192_v2 = vmul.f32 1.442695, %v1184_v60  ;;  %v1185_v59 = vsub.f32 %v5595_v61, %v1175_v52  ;;  %973 = vadd.xlane.f32.xlu0 %v972_v18  ;;  %4817 = vpow2.f32 %v1190_v15 }
 0x565   :  { %v1178_v62 = vpop.xlane.xlu1 %1177  ;;  %v975_v42 = vsel %vm112_vm1, %v5702_v55, 0.0 }
 0x566   :  { %v5705_v7 = vpop.eup %4809  ;;  %4819 = vpow2.f32 %v1192_v2  ;;  %v1194_v8 = vmul.f32 1.442695, %v1185_v59  ;;  %v1186_v12 = vsub.f32 %v5600_v63, %v1178_v62 }
 0x567   :  { %v1181_v6 = vpop.xlane.xlu0 %1180  ;;  %v978_v38 = vsel %vm112_vm1, %v5705_v7, 0.0 }
 0x568   :  { %v5712_v17 = vpop.eup %4811  ;;  %979 = vadd.xlane.f32.xlu1 %v978_v38  ;;  %976 = vadd.xlane.f32.xlu0 %v975_v42  ;;  %4821 = vpow2.f32 %v1194_v8  ;;  %v1196_v61 = vmul.f32 1.442695, %v1186_v12  ;;  %v1187_v45 = vsub.f32 %v5605_v9, %v1181_v6 }
 0x569   :  { %v981_v63 = vsel %vm112_vm1, %v5712_v17, 0.0 }
 0x56a   :  { %v5715_v21 = vpop.eup %4813  ;;  %4823 = vpow2.f32 %v1196_v61  ;;  %v1198_v27 = vmul.f32 1.442695, %v1187_v45 }
 0x56b   :  { %v984_v26 = vsel %vm112_vm1, %v5715_v21, 0.0 }
 0x56c   :  { %v5719_v22 = vpop.eup %4815  ;;  %982 = vadd.xlane.f32.xlu0 %v981_v63  ;;  %4825 = vpow2.f32 %v1198_v27 }
 0x56d   :  { %v1200_v25 = vsel %vm112_vm1, %v5719_v22, 0.0 }
 0x56e   :  { %1201 = vadd.xlane.f32.xlu1 %v1200_v25  ;;  %v5723_v47 = vpop.eup %4817 }
 0x56f   :  { %v1203_v31 = vsel %vm112_vm1, %v5723_v47, 0.0 }
 0x570   :  { %v5727_v9 = vpop.eup %4819  ;;  %985 = vadd.xlane.f32.xlu0 %v984_v26 }
 0x571   :  { %v1206_v29 = vsel %vm112_vm1, %v5727_v9, 0.0 }
 0x572   :  { %1207 = vadd.xlane.f32.xlu1 %v1206_v29  ;;  %v5733_v51 = vpop.eup %4821 }
 0x573   :  { %v1209_v35 = vsel %vm112_vm1, %v5733_v51, 0.0 }
 0x574   :  { %1204 = vadd.xlane.f32.xlu0 %v1203_v31  ;;  %v5737_v36 = vpop.eup %4823 }
 0x575   :  { %v1212_v3 = vsel %vm112_vm1, %v5737_v36, 0.0 }
 0x576   :  { %v5741_v54 = vpop.eup %4825 }
 0x577   :  { %v1215_v46 = vsel %vm112_vm1, %v5741_v54, 0.0 }
 0x578   :  { %1210 = vadd.xlane.f32.xlu0 %v1209_v35 }
 0x57c   :  { %1213 = vadd.xlane.f32.xlu0 %v1212_v3 }
 0x580   :  { %1216 = vadd.xlane.f32.xlu0 %v1215_v46 }
 0x583   :  { %1235 = vrot.lane.b32.xlu1 %v5335_v11, %s6941_s29 }
 0x592   :  { %v509_v53 = vpop.xlane.xlu1 %508 }
 0x593   :  { %4827 = vrcp.f32 %v509_v53 }
 0x594   :  { %v512_v5 = vpop.xlane.xlu0 %511 }
 0x595   :  { %4829 = vrcp.f32 %v512_v5 }
 0x596   :  { %1237 = vrot.lane.b32.xlu0 %v5343_v19, %s6941_s29  ;;  %s6962_s29 = smov 8  }
 0x59a   :  { %v515_v58 = vpop.xlane.xlu1 %514 }
 0x59b   :  { %4831 = vrcp.f32 %v515_v58 }
 0x59d   :  { %v4828_v15 = vpop.eup %4827 }
 0x59e   :  { %v518_v60 = vpop.xlane.xlu0 %517  ;;  %v531_v18 = vmul.f32 %v4828_v15, %v5619_v39 }
 0x59f   :  { %v4830_v52 = vpop.eup %4829  ;;  %4833 = vrcp.f32 %v518_v60 }
 0x5a0   :  { %v532_v2 = vmul.f32 %v4830_v52, %v5623_v43 }
 0x5a2   :  { %v537_v59 = vpack.c.bf16 %v532_v2, %v531_v18  ;;  %v521_v62 = vpop.xlane.xlu1 %520 }
 0x5a3   :  { %4835 = vrcp.f32 %v521_v62 }
 0x5a4   :  { %v524_v11 = vpop.xlane.xlu0 %523  ;;  %4220 = vmatmul.mubr.msk.bf16.vlgmr.msra.gmra.mrb[12].mxu0 %vm112_vm1, %v537_v59 }
 0x5a5   :  { %4837 = vrcp.f32 %v524_v11  ;;  %4250 = vmatpush3.bf16.msra.mxu0 %v5424_v56  ;;  %4223 = vmatprep.mubr.msk.bf16.mxu0 %vm5088_vm0, %v5087_v1  ;;  %v4832_v19 = vpop.eup %4831 }
 0x5a6   :  { %4251 = vmatprep.subr.bf16.mxu0 %v5087_v1  ;;  %v533_v43 = vmul.f32 %v4832_v19, %v5629_v57 }
 0x5a8   :  { %v5756_v8 = vpop.permute.xlu0 %1233 }
 0x5a9   :  { %v4834_v39 = vpop.eup %4833  ;;  %4252 = vmatpush3.bf16.msra.mxu0 %v5613_v24  ;;  %4622 = vmatpush3.bf16.msra.mxu1 %v5756_v8 }
 0x5aa   :  { %4253 = vmatprep.subr.bf16.mxu0 %v5087_v1  ;;  %v534_v12 = vmul.f32 %v4834_v39, %v5634_v4  ;;  %4620 = vmatprep.subr.bf16.mxu1 %v5087_v1  ;;  %v740_v4 = vpop.xlane.xlu1 %739 }
 0x5ab   :  { %4839 = vrcp.f32 %v740_v4 }
 0x5ac   :  { %v538_v56 = vpack.c.bf16 %v534_v12, %v533_v43 }
 0x5ad   :  { %4254 = vmatpush3.bf16.msra.mxu0 %v5668_v50  ;;  %v4836_v6 = vpop.eup %4835 }
 0x5ae   :  { %4224 = vmatmul.mubr.msk.bf16.gmra.mrb[16].mxu0 %vm112_vm1, %v538_v56  ;;  %4285 = vmatprep.subr.bf16.mxu0 %v5087_v1  ;;  %v535_v57 = vmul.f32 %v4836_v6, %v5638_v32  ;;  %v1007_v35 = vpop.permute.xlu1 %1006 }
 0x5af   :  { %v4838_v38 = vpop.eup %4837  ;;  %4227 = vmatprep.mubr.msk.bf16.mxu0 %vm5088_vm0, %v5087_v1 }
 0x5b0   :  { %v536_v24 = vmul.f32 %v4838_v38, %v5642_v16 }
 0x5b2   :  { %v539_v42 = vpack.c.bf16 %v536_v24, %v535_v57 }
 0x5b5   :  { %v4840_v63 = vpop.eup %4839 }
 0x5b6   :  { %4228 = vmatmul.mubr.msk.bf16.gmra.mrb[20].mxu0 %vm112_vm1, %v539_v42  ;;  %v762_v16 = vmul.f32 %v4840_v63, %v5646_v14 }
 0x5b7   :  { %4255 = vmatprep.mubr.msk.bf16.mxu0 %vm5088_vm0, %v5087_v1 }
 0x5d9   :  { %v743_v50 = vpop.xlane.xlu0 %742 }
 0x5da   :  { %4841 = vrcp.f32 %v743_v50 }
 0x5dd   :  { %v746_v61 = vpop.xlane.xlu0 %745 }
 0x5de   :  { %4843 = vrcp.f32 %v746_v61 }
 0x5e1   :  { %v749_v45 = vpop.xlane.xlu0 %748 }
 0x5e2   :  { %4845 = vrcp.f32 %v749_v45 }
 0x5e4   :  { %v4842_v25 = vpop.eup %4841 }
 0x5e5   :  { %v763_v32 = vmul.f32 %v4842_v25, %v5660_v44  ;;  %v752_v26 = vpop.xlane.xlu0 %751 }
 0x5e6   :  { %4847 = vrcp.f32 %v752_v26 }
 0x5e7   :  { %v768_v27 = vpack.c.bf16 %v763_v32, %v762_v16 }
 0x5e8   :  { %v4844_v29 = vpop.eup %4843 }
 0x5e9   :  { %4256 = vmatmul.mubr.msk.bf16.vlgmr.msra.gmra.mrb[24].mxu0 %vm112_vm1, %v768_v27  ;;  %v764_v14 = vmul.f32 %v4844_v29, %v5666_v0 }
 0x5ea   :  { %4286 = vmatpush3.bf16.msra.mxu0 %v5658_v37  ;;  %4259 = vmatprep.mubr.msk.bf16.mxu0 %vm5088_vm0, %v5087_v1 }
 0x5eb   :  { %4287 = vmatprep.subr.bf16.mxu0 %v5087_v1 }
 0x5ec   :  { %v4846_v31 = vpop.eup %4845 }
 0x5ed   :  { %v755_v3 = vpop.xlane.xlu0 %754  ;;  %v765_v44 = vmul.f32 %v4846_v31, %v5672_v49 }
 0x5ee   :  { %4849 = vrcp.f32 %v755_v3  ;;  %4288 = vmatpush3.bf16.msra.mxu0 %v5662_v41 }
 0x5ef   :  { %4289 = vmatprep.subr.bf16.mxu0 %v5087_v1  ;;  %v769_v46 = vpack.c.bf16 %v765_v44, %v764_v14  ;;  %v971_v37 = vpop.xlane.xlu1 %970 }
 0x5f0   :  { %v4848_v49 = vpop.eup %4847 }
 0x5f1   :  { %v974_v53 = vpop.xlane.xlu0 %973  ;;  %4260 = vmatmul.mubr.msk.bf16.gmra.mrb[28].mxu0 %vm112_vm1, %v769_v46  ;;  %v766_v15 = vmul.f32 %v4848_v49, %v5678_v28 }
 0x5f2   :  { %4851 = vrcp.f32 %v974_v53  ;;  %4290 = vmatpush3.bf16.msra.mxu0 %v1007_v35  ;;  %4263 = vmatprep.mubr.msk.bf16.mxu0 %vm5088_vm0, %v5087_v1 }
 0x5f3   :  { %4321 = vmatprep.subr.bf16.mxu0 %v5087_v1  ;;  %4853 = vrcp.f32 %v971_v37 }
 0x5f5   :  { %v977_v0 = vpop.xlane.xlu0 %976  ;;  %v980_v5 = vpop.xlane.xlu1 %979 }
 0x5f6   :  { %4855 = vrcp.f32 %v977_v0 }
 0x5f7   :  { %4857 = vrcp.f32 %v980_v5 }
 0x5f8   :  { %v4850_v58 = vpop.eup %4849 }
 0x5f9   :  { %v983_v41 = vpop.xlane.xlu0 %982  ;;  %v767_v60 = vmul.f32 %v4850_v58, %v5687_v34 }
 0x5fb   :  { %v1202_v52 = vpop.xlane.xlu1 %1201  ;;  %v770_v18 = vpack.c.bf16 %v767_v60, %v766_v15 }
 0x5fc   :  { %v4852_v2 = vpop.eup %4851 }
 0x5fd   :  { %v986_v59 = vpop.xlane.xlu0 %985  ;;  %4264 = vmatmul.mubr.msk.bf16.gmra.mrb[32].mxu0 %vm112_vm1, %v770_v18  ;;  %v4854_v62 = vpop.eup %4853  ;;  %v994_v11 = vmul.f32 %v4852_v2, %v5697_v48 }
 0x5fe   :  { %4291 = vmatprep.mubr.msk.bf16.mxu0 %vm5088_vm0, %v5087_v1  ;;  %v993_v39 = vmul.f32 %v4854_v62, %v5692_v40  ;;  %4859 = vrcp.f32 %v986_v59 }
 0x5ff   :  { %v1208_v19 = vpop.xlane.xlu1 %1207  ;;  %4861 = vrcp.f32 %v983_v41 }
 0x600   :  { %v4856_v28 = vpop.eup %4855  ;;  %v999_v34 = vpack.c.bf16 %v994_v11, %v993_v39  ;;  %4863 = vrcp.f32 %v1208_v19 }
 0x601   :  { %v1205_v43 = vpop.xlane.xlu0 %1204  ;;  %v4858_v56 = vpop.eup %4857  ;;  %v995_v40 = vmul.f32 %v4856_v28, %v5702_v55 }
 0x602   :  { %v996_v48 = vmul.f32 %v4858_v56, %v5705_v7 }
 0x603   :  { %v1236_v12 = vpop.permute.xlu1 %1235 }
 0x604   :  { %4623 = vmatpush3.bf16.msra.mxu1 %v1236_v12  ;;  %v1000_v24 = vpack.c.bf16 %v996_v48, %v995_v40 }
 0x605   :  { %v1211_v6 = vpop.xlane.xlu0 %1210  ;;  %4292 = vmatmul.mubr.msk.bf16.vlgmr.msra.gmra.mrb[36].mxu0 %vm112_vm1, %v999_v34  ;;  %4621 = vmatprep.subr.bf16.mxu1 %v5087_v1 }
 0x606   :  { %4865 = vrcp.f32 %v1211_v6  ;;  %4322 = vmatpush3.bf16.msra.mxu0 %v5756_v8  ;;  %4295 = vmatprep.mubr.msk.bf16.mxu0 %vm5088_vm0, %v5087_v1 }
 0x607   :  { %4323 = vmatprep.subr.bf16.mxu0 %v5087_v1  ;;  %4867 = vrcp.f32 %v1205_v43 }
 0x608   :  { %4869 = vrcp.f32 %v1202_v52  ;;  %v4860_v57 = vpop.eup %4859 }
 0x609   :  { %v1214_v38 = vpop.xlane.xlu0 %1213  ;;  %v4862_v42 = vpop.eup %4861  ;;  %v998_v55 = vmul.f32 %v4860_v57, %v5715_v21 }
 0x60a   :  { %4324 = vmatpush3.bf16.msra.mxu0 %v1236_v12  ;;  %4871 = vrcp.f32 %v1214_v38  ;;  %v4864_v4 = vpop.eup %4863  ;;  %v997_v63 = vmul.f32 %v4862_v42, %v5712_v17  ;;  %v4741_v38 = vld [vmem:[%s6927_s8] sm:$0xff]  }
 0x60b   :  { %4325 = vmatprep.subr.bf16.mxu0 %v5087_v1  ;;  %v1226_v50 = vmul.f32 %v4864_v4, %v5727_v9 }
 0x60c   :  { %v1001_v16 = vpack.c.bf16 %v998_v55, %v997_v63 }
 0x60d   :  { %v1217_v8 = vpop.xlane.xlu0 %1216  ;;  %4296 = vmatmul.mubr.msk.bf16.gmra.mrb[40].mxu0 %vm112_vm1, %v1000_v24 }
 0x60e   :  { %4873 = vrcp.f32 %v1217_v8  ;;  %4299 = vmatprep.mubr.msk.bf16.mxu0 %vm5088_vm0, %v5087_v1 }
 0x610   :  { %v4866_v7 = vpop.eup %4865 }
 0x611   :  { %v1227_v61 = vmul.f32 %v4866_v7, %v5733_v51  ;;  %v1238_v45 = vpop.permute.xlu0 %1237  ;;  %v4868_v32 = vpop.eup %4867 }
 0x612   :  { %4326 = vmatpush3.bf16.msra.mxu0 %v1238_v45  ;;  %4624 = vmatpush3.bf16.msra.mxu1 %v1238_v45  ;;  %v4870_v27 = vpop.eup %4869  ;;  %v1225_v17 = vmul.f32 %v4868_v32, %v5723_v47 }
 0x613   :  { %v1231_v25 = vpack.c.bf16 %v1227_v61, %v1226_v50  ;;  %4339 = vmatprep.subr.bf16.mxu1 %v5087_v1  ;;  %4355 = vmatprep.subr.bf16.mxu0 %v5087_v1  ;;  %v1224_v51 = vmul.f32 %v4870_v27, %v5719_v22  ;;  %v4742_v61 = vld [vmem:[%s6927_s8 + $0x8] sm:$0xff]  }
 0x614   :  { %v4872_v21 = vpop.eup %4871 }
 0x615   :  { %4300 = vmatmul.mubr.msk.bf16.gmra.mrb[44].mxu0 %vm112_vm1, %v1001_v16  ;;  %4332 = vmatmul.mubr.msk.bf16.vlgmr.msra.gmra.mrb[60].mxu1 %vm112_vm1, %v1231_v25  ;;  %v1228_v26 = vmul.f32 %v4872_v21, %v5737_v36  ;;  %v1230_v31 = vpack.c.bf16 %v1225_v17, %v1224_v51 }
 0x616   :  { %4327 = vmatprep.mubr.msk.bf16.mxu0 %vm5088_vm0, %v5087_v1  ;;  %4335 = vmatprep.mubr.msk.bf16.mxu1 %vm5088_vm0, %v5087_v1 }
 0x617   :  { %4340 = vmatpush3.bf16.msra.mxu1 %v4741_v38 }
 0x618   :  { %v4874_v9 = vpop.eup %4873  ;;  %4341 = vmatprep.subr.bf16.mxu1 %v5087_v1 }
 0x619   :  { %v1229_v29 = vmul.f32 %v4874_v9, %v5741_v54 }
 0x61b   :  { %v1232_v35 = vpack.c.bf16 %v1229_v29, %v1228_v26  ;;  %4342 = vmatpush3.bf16.msra.mxu1 %v4742_v61 }
 0x61c   :  { %4371 = vmatprep.subr.bf16.mxu1 %v5087_v1 }
 0x61d   :  { %4328 = vmatmul.mubr.msk.bf16.vlgmr.msra.gmra.mrb[48].mxu0 %vm112_vm1, %v1230_v31  ;;  %4336 = vmatmul.mubr.msk.bf16.gmra.mrb[64].mxu1 %vm112_vm1, %v1232_v35 }
 0x61e   :  { %4343 = vmatprep.mubr.msk.bf16.mxu1 %vm5088_vm0, %v5087_v1  ;;  %4359 = vmatprep.mubr.msk.bf16.mxu0 %vm5088_vm0, %v5087_v1 }
 0x677   :  { %v5830_v47 = vpop.f32.mrb[12].mxu0 }
 0x678   :  { %v4221_v3 = vpop.f32.mrb[13].mxu0 }
 0x679   :  { %v5832_v22 = vpop.f32.mrb[14].mxu0 }
 0x67a   :  { %v4222_v36 = vpop.f32.mrb[15].mxu0 }
 0x681   :  { %v5834_v14 = vpop.f32.mrb[16].mxu0 }
 0x682   :  { %v4225_v54 = vpop.f32.mrb[17].mxu0 }
 0x683   :  { %v5836_v44 = vpop.f32.mrb[18].mxu0 }
 0x684   :  { %v4226_v46 = vpop.f32.mrb[19].mxu0 }
 0x689   :  { %v5838_v37 = vpop.f32.mrb[20].mxu0 }
 0x68a   :  { %v4229_v53 = vpop.f32.mrb[21].mxu0 }
 0x68b   :  { %v5840_v0 = vpop.f32.mrb[22].mxu0 }
 0x68c   :  { %v4230_v49 = vpop.f32.mrb[23].mxu0 }
 0x6bc   :  { %v823_v5 = vpop.f32.mrb[24].mxu0 }
 0x6bd   :  { %v4257_v58 = vpop.f32.mrb[25].mxu0 }
 0x6be   :  { %v826_v41 = vpop.f32.mrb[26].mxu0 }
 0x6bf   :  { %v4643_v15 = vpack.i.bf16 %v826_v41, %v823_v5  ;;  %v4258_v60 = vpop.f32.mrb[27].mxu0 }
 0x6c1   :  { %4644 = vrot.lane.b32.xlu0 %v4643_v15, %s6949_s30 }
 0x6c4   :  { %v831_v52 = vpop.f32.mrb[28].mxu0 }
 0x6c5   :  { %v4261_v18 = vpop.f32.mrb[29].mxu0 }
 0x6c6   :  { %v834_v2 = vpop.f32.mrb[30].mxu0 }
 0x6c7   :  { %v4658_v59 = vpack.i.bf16 %v834_v2, %v831_v52  ;;  %v4262_v62 = vpop.f32.mrb[31].mxu0 }
 0x6d0   :  { %v839_v11 = vpop.f32.mrb[32].mxu0 }
 0x6d1   :  { %v4265_v19 = vpop.f32.mrb[33].mxu0 }
 0x6d2   :  { %v842_v39 = vpop.f32.mrb[34].mxu0 }
 0x6d3   :  { %v4673_v43 = vpack.i.bf16 %v842_v39, %v839_v11  ;;  %v4266_v28 = vpop.f32.mrb[35].mxu0 }
 0x6d8   :  { %v1054_v34 = vpop.f32.mrb[36].mxu0 }
 0x6d9   :  { %v4293_v12 = vpop.f32.mrb[37].mxu0 }
 0x6da   :  { %v1057_v56 = vpop.f32.mrb[38].mxu0 }
 0x6db   :  { %v4648_v6 = vpack.i.bf16 %v1057_v56, %v1054_v34  ;;  %v4294_v40 = vpop.f32.mrb[39].mxu0 }
 0x6dd   :  { %4649 = vrot.lane.b32.xlu0 %v4648_v6, %s6947_s0 }
 0x6e0   :  { %v1062_v48 = vpop.f32.mrb[40].mxu0 }
 0x6e1   :  { %4659 = vrot.lane.b32.xlu0 %v4658_v59, %s6949_s30  ;;  %v4297_v24 = vpop.f32.mrb[41].mxu0 }
 0x6e2   :  { %v1065_v57 = vpop.f32.mrb[42].mxu0 }
 0x6e3   :  { %v4663_v42 = vpack.i.bf16 %v1065_v57, %v1062_v48  ;;  %v4298_v8 = vpop.f32.mrb[43].mxu0 }
 0x6e8   :  { %v1070_v4 = vpop.f32.mrb[44].mxu0  ;;  %v1293_v55 = vpop.f32.mrb[60].mxu1 }
 0x6e9   :  { %v4301_v7 = vpop.f32.mrb[45].mxu0  ;;  %v4333_v50 = vpop.f32.mrb[61].mxu1 }
 0x6ea   :  { %v1073_v45 = vpop.f32.mrb[46].mxu0  ;;  %v1296_v63 = vpop.f32.mrb[62].mxu1 }
 0x6eb   :  { %v4678_v25 = vpack.i.bf16 %v1073_v45, %v1070_v4  ;;  %v4668_v16 = vpack.i.bf16 %v1296_v63, %v1293_v55  ;;  %v4302_v32 = vpop.f32.mrb[47].mxu0  ;;  %v4334_v27 = vpop.f32.mrb[63].mxu1 }
 0x6ed   :  { %4669 = vrot.lane.b32.xlu0 %v4668_v16, %s6945_s19 }
 0x6f0   :  { %v1285_v21 = vpop.f32.mrb[48].mxu0  ;;  %v1301_v17 = vpop.f32.mrb[64].mxu1 }
 0x6f1   :  { %v4337_v9 = vpop.f32.mrb[65].mxu1  ;;  %4679 = vrot.lane.b32.xlu0 %v4678_v25, %s6947_s0  ;;  %v4329_v51 = vpop.f32.mrb[49].mxu0 }
 0x6f2   :  { %v1288_v26 = vpop.f32.mrb[50].mxu0  ;;  %v1304_v29 = vpop.f32.mrb[66].mxu1 }
 0x6f3   :  { %v4653_v31 = vpack.i.bf16 %v1288_v26, %v1285_v21  ;;  %v4683_v35 = vpack.i.bf16 %v1304_v29, %v1301_v17  ;;  %v4330_v3 = vpop.f32.mrb[51].mxu0  ;;  %v4338_v36 = vpop.f32.mrb[67].mxu1 }
 0x6f5   :  { %4654 = vrot.lane.b32.xlu1 %v4653_v31, %s6945_s19 }
 0x6f9   :  { %4664 = vrot.lane.b32.xlu1 %v4663_v42, %s6947_s0 }
 0x6fd   :  { %4674 = vrot.lane.b32.xlu1 %v4673_v43, %s6949_s30 }
 0x701   :  { %4684 = vrot.lane.b32.xlu1 %v4683_v35, %s6945_s19 }
 0x733   :  { %v4645_v54 = vpop.permute.xlu0 %4644 }
 0x734   :  { %v4647_v53 = vunpack.i.h.bf16 %v4645_v54  ;;  %v4646_v49 = vunpack.i.l.bf16 %v4645_v54 }
 0x736   :  { %v1381_v60 = vsel %vm395_vm3, %v5832_v22, %v4647_v53  ;;  %v1380_v52 = vsel %vm395_vm3, %v5830_v47, %v4646_v49 }
 0x74f   :  { %v4650_v46 = vpop.permute.xlu0 %4649 }
 0x750   :  { %v4652_v5 = vunpack.i.h.bf16 %v4650_v46  ;;  %v4651_v58 = vunpack.i.l.bf16 %v4650_v46 }
 0x752   :  { %v1388_v59 = vsel %vm1386_vm4, %v1381_v60, %v4652_v5  ;;  %v1387_v62 = vsel %vm1386_vm4, %v1380_v52, %v4651_v58 }
 0x753   :  { %v4660_v41 = vpop.permute.xlu0 %4659 }
 0x754   :  { %v4662_v11 = vunpack.i.h.bf16 %v4660_v41  ;;  %v4661_v19 = vunpack.i.l.bf16 %v4660_v41 }
 0x756   :  { %v1383_v47 = vsel %vm395_vm3, %v5836_v44, %v4662_v11  ;;  %v1382_v6 = vsel %vm395_vm3, %v5834_v14, %v4661_v19 }
 0x75f   :  { %v4670_v39 = vpop.permute.xlu0 %4669 }
 0x760   :  { %v4672_v40 = vunpack.i.h.bf16 %v4670_v39  ;;  %v4671_v48 = vunpack.i.l.bf16 %v4670_v39 }
 0x763   :  { %v4680_v44 = vpop.permute.xlu0 %4679 }
 0x764   :  { %v4682_v61 = vunpack.i.h.bf16 %v4680_v44  ;;  %v4681_v45 = vunpack.i.l.bf16 %v4680_v44 }
 0x767   :  { %v4655_v15 = vpop.permute.xlu1 %4654 }
 0x768   :  { %v4657_v18 = vunpack.i.h.bf16 %v4655_v15  ;;  %v4656_v2 = vunpack.i.l.bf16 %v4655_v15 }
 0x76a   :  { %v1395_v43 = vsel %vm1393_vm5, %v1388_v59, %v4657_v18  ;;  %v1394_v28 = vsel %vm1393_vm5, %v1387_v62, %v4656_v2 }
 0x76b   :  { %v1400_v34 = vpack.c.bf16 %v1395_v43, %v1394_v28  ;;  %v4665_v12 = vpop.permute.xlu1 %4664 }
 0x76c   :  { %v4667_v56 = vunpack.i.h.bf16 %v4665_v12  ;;  %v4666_v22 = vunpack.i.l.bf16 %v4665_v12 }
 0x76d   :  { %4344 = vmatmul.mubr.msk.bf16.vlgmr.msra.gmra.mrb[68].mxu1 %vm187_vm2, %v1400_v34 }
 0x76e   :  { %v1390_v38 = vsel %vm1386_vm4, %v1383_v47, %v4667_v56  ;;  %v1389_v24 = vsel %vm1386_vm4, %v1382_v6, %v4666_v22  ;;  %4347 = vmatprep.mubr.msk.bf16.mxu1 %vm5088_vm0, %v5087_v1 }
 0x76f   :  { %v4675_v57 = vpop.permute.xlu1 %4674  ;;  %v1396_v42 = vsel %vm1393_vm5, %v1389_v24, %v4671_v48  ;;  %v1397_v8 = vsel %vm1393_vm5, %v1390_v38, %v4672_v40 }
 0x770   :  { %v4677_v4 = vunpack.i.h.bf16 %v4675_v57  ;;  %v4676_v55 = vunpack.i.l.bf16 %v4675_v57  ;;  %v1401_v14 = vpack.c.bf16 %v1397_v8, %v1396_v42 }
 0x772   :  { %v1385_v7 = vsel %vm395_vm3, %v5840_v0, %v4677_v4  ;;  %v1384_v50 = vsel %vm395_vm3, %v5838_v37, %v4676_v55  ;;  %v3891_v37 = vld [vmem:[%s6928_s9] ss:$0 sm:$0xff] }
 0x773   :  { %v4685_v63 = vpop.permute.xlu1 %4684  ;;  %v1391_v32 = vsel %vm1386_vm4, %v1384_v50, %v4681_v45  ;;  %v1392_v27 = vsel %vm1386_vm4, %v1385_v7, %v4682_v61 }
 0x774   :  { %v4687_v25 = vunpack.i.h.bf16 %v4685_v63  ;;  %v4686_v16 = vunpack.i.l.bf16 %v4685_v63 }
 0x775   :  { %4348 = vmatmul.mubr.msk.bf16.gmra.mrb[72].mxu1 %vm187_vm2, %v1401_v14 }
 0x776   :  { %v1398_v21 = vsel %vm1393_vm5, %v1391_v32, %v4686_v16  ;;  %v1399_v17 = vsel %vm1393_vm5, %v1392_v27, %v4687_v25  ;;  %4351 = vmatprep.mubr.msk.bf16.mxu1 %vm5088_vm0, %v5087_v1 }
 0x777   :  { %v1402_v0 = vpack.c.bf16 %v1399_v17, %v1398_v21  ;;  %v4743_v17 = vld [vmem:[%s6931_s12] sm:$0xff]  }
 0x778   :  { %4356 = vmatpush3.bf16.msra.mxu0 %v4743_v17  ;;  %v3899_v17 = vld [vmem:[%s6932_s13] ss:$0 sm:$0xff] }
 0x779   :  { %4357 = vmatprep.subr.bf16.mxu0 %v5087_v1 }
 0x77d   :  { %4352 = vmatmul.mubr.msk.bf16.gmra.mrb[76].mxu1 %vm187_vm2, %v1402_v0  ;;  %v4744_v0 = vld [vmem:[%s6931_s12 + $0x8] sm:$0xff]  }
 0x77e   :  { %4387 = vmatprep.mubr.msk.bf16.mxu1 %vm5088_vm0, %v5087_v1  ;;  %4358 = vmatpush3.bf16.msra.mxu0 %v4744_v0 }
 0x77f   :  { %4399 = vmatprep.subr.bf16.mxu0 %v5087_v1 }
 0x840   :  { %v1469_v9 = vpop.f32.mrb[68].mxu1 }
 0x841   :  { %v1470_v51 = vadd.f32 %v3891_v37, %v1469_v9  ;;  %v4345_v26 = vpop.f32.mrb[69].mxu1 }
 0x842   :  { %v1472_v29 = vpop.f32.mrb[70].mxu1 }
 0x843   :  { %v5896_v31 = vadd.f32 %v1470_v51, %v5242_v10  ;;  %v1473_v35 = vadd.f32 %v3891_v37, %v1472_v29  ;;  %v4346_v3 = vpop.f32.mrb[71].mxu1 }
 0x845   :  { %v5899_v36 = vadd.f32 %v1473_v35, %v5244_v13  ;;  %v1500_v54 = vsel %vm187_vm2, %v5896_v31, 0.0 }
 0x846   :  { %1501 = vadd.xlane.f32.xlu0 %v1500_v54 }
 0x847   :  { %v1503_v46 = vsel %vm187_vm2, %v5899_v36, 0.0 }
 0x848   :  { %1504 = vadd.xlane.f32.xlu1 %v1503_v46  ;;  %v1477_v53 = vpop.f32.mrb[72].mxu1 }
 0x849   :  { %v1478_v49 = vadd.f32 %v3891_v37, %v1477_v53  ;;  %v4349_v5 = vpop.f32.mrb[73].mxu1 }
 0x84a   :  { %v1480_v58 = vpop.f32.mrb[74].mxu1 }
 0x84b   :  { %v5906_v10 = vadd.f32 %v1478_v49, %v5256_v20  ;;  %v1481_v41 = vadd.f32 %v3891_v37, %v1480_v58  ;;  %v4350_v15 = vpop.f32.mrb[75].mxu1  ;;  %v3897_v58 = vld [vmem:[%s6929_s10] ss:$0 sm:$0xff] }
 0x84d   :  { %v5909_v13 = vadd.f32 %v1481_v41, %v5258_v23  ;;  %v1506_v60 = vsel %vm187_vm2, %v5906_v10, 0.0 }
 0x84e   :  { %1507 = vadd.xlane.f32.xlu0 %v1506_v60 }
 0x84f   :  { %v1509_v59 = vsel %vm187_vm2, %v5909_v13, 0.0 }
 0x850   :  { %v1485_v52 = vpop.f32.mrb[76].mxu1 }
 0x851   :  { %v1486_v18 = vadd.f32 %v3891_v37, %v1485_v52  ;;  %v4353_v2 = vpop.f32.mrb[77].mxu1 }
 0x852   :  { %1510 = vadd.xlane.f32.xlu0 %v1509_v59  ;;  %v1488_v62 = vpop.f32.mrb[78].mxu1 }
 0x853   :  { %v5916_v20 = vadd.f32 %v1486_v18, %v5270_v30  ;;  %v1489_v11 = vadd.f32 %v3891_v37, %v1488_v62  ;;  %v4354_v19 = vpop.f32.mrb[79].mxu1 }
 0x855   :  { %v5919_v23 = vadd.f32 %v1489_v11, %v5272_v33  ;;  %v1512_v39 = vsel %vm187_vm2, %v5916_v20, 0.0 }
 0x856   :  { %1513 = vadd.xlane.f32.xlu1 %v1512_v39  ;;  %v3898_v39 = vld [vmem:[%s6930_s11] ss:$0 sm:$0xff] }
 0x857   :  { %v1515_v43 = vsel %vm187_vm2, %v5919_v23, 0.0 }
 0x858   :  { %1516 = vadd.xlane.f32.xlu0 %v1515_v43 }
 0x8d3   :  { %v1502_v28 = vpop.xlane.xlu0 %1501 }
 0x8d4   :  { %v1518_v34 = vmul.f32 0.03125, %v1502_v28 }
 0x8d5   :  { %v1505_v12 = vpop.xlane.xlu1 %1504 }
 0x8d6   :  { %v1524_v56 = vsub.f32 %v5896_v31, %v1518_v34  ;;  %v1519_v30 = vmul.f32 0.03125, %v1505_v12 }
 0x8d8   :  { %v1525_v22 = vsub.f32 %v5899_v36, %v1519_v30  ;;  %v1530_v47 = vmul.f32 %v1524_v56, %v1524_v56 }
 0x8da   :  { %v1536_v33 = vsel %vm187_vm2, %v1530_v47, 0.0  ;;  %v1531_v6 = vmul.f32 %v1525_v22, %v1525_v22 }
 0x8db   :  { %v1508_v40 = vpop.xlane.xlu0 %1507  ;;  %1537 = vadd.xlane.f32.xlu1 %v1536_v33 }
 0x8dc   :  { %v1520_v48 = vmul.f32 0.03125, %v1508_v40  ;;  %v1539_v38 = vsel %vm187_vm2, %v1531_v6, 0.0 }
 0x8dd   :  { %1540 = vadd.xlane.f32.xlu0 %v1539_v38 }
 0x8de   :  { %v5930_v24 = vsub.f32 %v5906_v10, %v1520_v48 }
 0x8df   :  { %v1511_v57 = vpop.xlane.xlu0 %1510 }
 0x8e0   :  { %v1521_v42 = vmul.f32 0.03125, %v1511_v57  ;;  %v1532_v8 = vmul.f32 %v5930_v24, %v5930_v24 }
 0x8e2   :  { %v5935_v44 = vsub.f32 %v5909_v13, %v1521_v42  ;;  %v1542_v4 = vsel %vm187_vm2, %v1532_v8, 0.0 }
 0x8e3   :  { %1543 = vadd.xlane.f32.xlu1 %v1542_v4  ;;  %v1514_v55 = vpop.xlane.xlu1 %1513 }
 0x8e4   :  { %v1522_v14 = vmul.f32 0.03125, %v1514_v55  ;;  %v1533_v7 = vmul.f32 %v5935_v44, %v5935_v44 }
 0x8e5   :  { %v1517_v50 = vpop.xlane.xlu0 %1516 }
 0x8e6   :  { %v5941_v61 = vsub.f32 %v5916_v20, %v1522_v14  ;;  %v1523_v45 = vmul.f32 0.03125, %v1517_v50  ;;  %v1545_v63 = vsel %vm187_vm2, %v1533_v7, 0.0 }
 0x8e7   :  { %1546 = vadd.xlane.f32.xlu0 %v1545_v63  ;;  %v4747_v63 = vld [vmem:[%s6933_s14 + $0x10] sm:$0xff]  }
 0x8e8   :  { %v1529_v25 = vsub.f32 %v5919_v23, %v1523_v45  ;;  %v1534_v16 = vmul.f32 %v5941_v61, %v5941_v61  ;;  %v4746_v45 = vld [vmem:[%s6933_s14 + $0x8] sm:$0xff]  }
 0x8ea   :  { %v1548_v32 = vsel %vm187_vm2, %v1534_v16, 0.0  ;;  %v1535_v27 = vmul.f32 %v1529_v25, %v1529_v25  ;;  %v4749_v16 = vld [vmem:[%s6933_s14 + $0x20] sm:$0xff]  }
 0x8eb   :  { %1549 = vadd.xlane.f32.xlu1 %v1548_v32  ;;  %v4750_v32 = vld [vmem:[%s6933_s14 + $0x28] sm:$0xff]  }
 0x8ec   :  { %v1551_v21 = vsel %vm187_vm2, %v1535_v27, 0.0  ;;  %v4751_v27 = vld [vmem:[%s6933_s14 + $0x30] sm:$0xff]  }
 0x8ed   :  { %1552 = vadd.xlane.f32.xlu0 %v1551_v21  ;;  %v4752_v21 = vld [vmem:[%s6933_s14 + $0x38] sm:$0xff]  }
 0x968   :  { %v1538_v37 = vpop.xlane.xlu1 %1537 }
 0x969   :  { %v1554_v9 = vmul.f32 0.03125, %v1538_v37 }
 0x96a   :  { %v1541_v51 = vpop.xlane.xlu0 %1540 }
 0x96b   :  { %v1560_v26 = vadd.f32 1e-06, %v1554_v9  ;;  %v1555_v29 = vmul.f32 0.03125, %v1541_v51 }
 0x96d   :  { %4875 = vrsqrt.f32 %v1560_v26  ;;  %v1561_v35 = vadd.f32 1e-06, %v1555_v29 }
 0x96f   :  { %4877 = vrsqrt.f32 %v1561_v35 }
 0x970   :  { %v1544_v3 = vpop.xlane.xlu1 %1543 }
 0x971   :  { %v1556_v54 = vmul.f32 0.03125, %v1544_v3 }
 0x973   :  { %v1562_v46 = vadd.f32 1e-06, %v1556_v54 }
 0x974   :  { %v1547_v53 = vpop.xlane.xlu0 %1546 }
 0x975   :  { %4879 = vrsqrt.f32 %v1562_v46  ;;  %v1557_v49 = vmul.f32 0.03125, %v1547_v53 }
 0x977   :  { %v4876_v5 = vpop.eup %4875  ;;  %v1563_v41 = vadd.f32 1e-06, %v1557_v49 }
 0x978   :  { %v1572_v15 = vmul.f32 %v4876_v5, %v1524_v56  ;;  %v1550_v60 = vpop.xlane.xlu1 %1549 }
 0x979   :  { %v4878_v52 = vpop.eup %4877  ;;  %4881 = vrsqrt.f32 %v1563_v41  ;;  %v1558_v18 = vmul.f32 0.03125, %v1550_v60 }
 0x97a   :  { %v1584_v2 = vmul.f32 %v3897_v58, %v1572_v15  ;;  %v1573_v59 = vmul.f32 %v4878_v52, %v1525_v22  ;;  %v1553_v62 = vpop.xlane.xlu0 %1552 }
 0x97b   :  { %v1564_v11 = vadd.f32 1e-06, %v1558_v18  ;;  %v1559_v19 = vmul.f32 0.03125, %v1553_v62 }
 0x97c   :  { %v1585_v43 = vmul.f32 %v3897_v58, %v1573_v59  ;;  %v1596_v34 = vadd.f32 %v3898_v39, %v1584_v2 }
 0x97d   :  { %4883 = vrsqrt.f32 %v1564_v11  ;;  %v1565_v28 = vadd.f32 1e-06, %v1559_v19 }
 0x97e   :  { %v1597_v12 = vadd.f32 %v3898_v39, %v1585_v43 }
 0x97f   :  { %v4880_v30 = vpop.eup %4879  ;;  %4885 = vrsqrt.f32 %v1565_v28 }
 0x980   :  { %v1607_v56 = vpack.c.bf16 %v1597_v12, %v1596_v34  ;;  %v1574_v47 = vmul.f32 %v4880_v30, %v5930_v24 }
 0x982   :  { %4360 = vmatmul.mubr.msk.bf16.vlgmr.msra.gmra.mrb[52].mxu0 %vm187_vm2, %v1607_v56  ;;  %v1586_v6 = vmul.f32 %v3897_v58, %v1574_v47 }
 0x983   :  { %v4882_v22 = vpop.eup %4881  ;;  %4363 = vmatprep.mubr.msk.bf16.mxu0 %vm5088_vm0, %v5087_v1 }
 0x984   :  { %v1575_v33 = vmul.f32 %v4882_v22, %v5935_v44  ;;  %v1598_v38 = vadd.f32 %v3898_v39, %v1586_v6 }
 0x986   :  { %v1587_v40 = vmul.f32 %v3897_v58, %v1575_v33 }
 0x987   :  { %v4884_v48 = vpop.eup %4883 }
 0x988   :  { %v1599_v57 = vadd.f32 %v3898_v39, %v1587_v40  ;;  %v1576_v42 = vmul.f32 %v4884_v48, %v5941_v61  ;;  %v4745_v61 = vld [vmem:[%s6933_s14] sm:$0xff]  }
 0x989   :  { %v4886_v8 = vpop.eup %4885  ;;  %4372 = vmatpush3.bf16.msra.mxu1 %v4745_v61 }
 0x98a   :  { %v1608_v4 = vpack.c.bf16 %v1599_v57, %v1598_v38  ;;  %v1577_v55 = vmul.f32 %v4886_v8, %v1529_v25  ;;  %v1588_v24 = vmul.f32 %v3897_v58, %v1576_v42  ;;  %4373 = vmatprep.subr.bf16.mxu1 %v5087_v1  ;;  %v4748_v25 = vld [vmem:[%s6933_s14 + $0x18] sm:$0xff]  }
 0x98c   :  { %4364 = vmatmul.mubr.msk.bf16.gmra.mrb[56].mxu0 %vm187_vm2, %v1608_v4  ;;  %v1589_v14 = vmul.f32 %v3897_v58, %v1577_v55  ;;  %v1600_v50 = vadd.f32 %v3898_v39, %v1588_v24 }
 0x98d   :  { %4367 = vmatprep.mubr.msk.bf16.mxu0 %vm5088_vm0, %v5087_v1  ;;  %4374 = vmatpush3.bf16.msra.mxu1 %v4746_v45 }
 0x98e   :  { %v1601_v7 = vadd.f32 %v3898_v39, %v1589_v14  ;;  %4375 = vmatprep.subr.bf16.mxu1 %v5087_v1 }
 0x990   :  { %v1609_v44 = vpack.c.bf16 %v1601_v7, %v1600_v50 }
 0x991   :  { %4376 = vmatpush3.bf16.msra.mxu1 %v4747_v63 }
 0x992   :  { %4377 = vmatprep.subr.bf16.mxu1 %v5087_v1 }
 0x994   :  { %4368 = vmatmul.mubr.msk.bf16.gmra.mrb[60].mxu0 %vm187_vm2, %v1609_v44 }
 0x995   :  { %4403 = vmatprep.mubr.msk.bf16.mxu0 %vm5088_vm0, %v5087_v1  ;;  %4378 = vmatpush3.bf16.msra.mxu1 %v4748_v25 }
 0x996   :  { %4379 = vmatprep.subr.bf16.mxu1 %v5087_v1 }
 0x999   :  { %4380 = vmatpush3.bf16.msra.mxu1 %v4749_v16 }
 0x99a   :  { %4381 = vmatprep.subr.bf16.mxu1 %v5087_v1 }
 0x99d   :  { %4382 = vmatpush3.bf16.msra.mxu1 %v4750_v32 }
 0x99e   :  { %4383 = vmatprep.subr.bf16.mxu1 %v5087_v1 }
 0x9a1   :  { %4384 = vmatpush3.bf16.msra.mxu1 %v4751_v27 }
 0x9a2   :  { %4385 = vmatprep.subr.bf16.mxu1 %v5087_v1 }
 0x9a5   :  { %4386 = vmatpush3.bf16.msra.mxu1 %v4752_v21 }
 0x9a6   :  { %4433 = vmatprep.subr.bf16.mxu1 %v5087_v1 }
 0xa55   :  { %v1671_v0 = vpop.f32.mrb[52].mxu0 }
 0xa56   :  { %v6010_v37 = vadd.f32 %v3899_v17, %v1671_v0  ;;  %v4361_v9 = vpop.f32.mrb[53].mxu0 }
 0xa57   :  { %v1674_v51 = vpop.f32.mrb[54].mxu0 }
 0xa58   :  { %v6013_v26 = vmul.f32 0.70710677, %v6010_v37  ;;  %v6015_v29 = vadd.f32 %v3899_v17, %v1674_v51  ;;  %v4362_v35 = vpop.f32.mrb[55].mxu0 }
 0xa5a   :  { %v1718_v3 = vand.u32 2147483647, %v6013_v26  ;;  %v6019_v54 = vmul.f32 0.70710677, %v6015_v29  ;;  %vm1706_vm6 = vcmp.ge.f32.partialorder %v6013_v26, 0.0 }
 0xa5c   :  { %v1724_v46 = vmul.f32 0.3275911, %v1718_v3  ;;  %v1719_v53 = vand.u32 2147483647, %v6019_v54  ;;  %v1802_v11 = vsub.f32 0.0, %v1718_v3  ;;  %vm1707_vm7 = vcmp.ge.f32.partialorder %v6019_v54, 0.0 }
 0xa5e   :  { %v1730_v49 = vadd.f32 1.0, %v1724_v46  ;;  %v1725_v5 = vmul.f32 0.3275911, %v1719_v53  ;;  %v1808_v56 = vmul.f32 %v1802_v11, %v1718_v3  ;;  %v1803_v47 = vsub.f32 0.0, %v1719_v53 }
 0xa5f   :  { %v1679_v58 = vpop.f32.mrb[56].mxu0 }
 0xa60   :  { %4887 = vrcp.f32 %v1730_v49  ;;  %v1731_v41 = vadd.f32 1.0, %v1725_v5  ;;  %v4365_v15 = vpop.f32.mrb[57].mxu0  ;;  %v6022_v60 = vadd.f32 %v3899_v17, %v1679_v58  ;;  %v1814_v24 = vmul.f32 1.442695, %v1808_v56 }
 0xa61   :  { %v1682_v52 = vpop.f32.mrb[58].mxu0  ;;  %v1809_v14 = vmul.f32 %v1803_v47, %v1719_v53 }
 0xa62   :  { %v6024_v18 = vadd.f32 %v3899_v17, %v1682_v52  ;;  %v4366_v2 = vpop.f32.mrb[59].mxu0  ;;  %4889 = vrcp.f32 %v1731_v41  ;;  %v6027_v59 = vmul.f32 0.70710677, %v6022_v60 }
 0xa63   :  { %v1816_v32 = vmul.f32 1.442695, %v1809_v14 }
 0xa64   :  { %v6030_v62 = vmul.f32 0.70710677, %v6024_v18  ;;  %v1720_v19 = vand.u32 2147483647, %v6027_v59  ;;  %vm1708_vm8 = vcmp.ge.f32.partialorder %v6027_v59, 0.0 }
 0xa66   :  { %v1721_v39 = vand.u32 2147483647, %v6030_v62  ;;  %v1726_v43 = vmul.f32 0.3275911, %v1720_v19  ;;  %v1804_v63 = vsub.f32 0.0, %v1720_v19  ;;  %vm1709_vm9 = vcmp.ge.f32.partialorder %v6030_v62, 0.0 }
 0xa67   :  { %v1687_v28 = vpop.f32.mrb[60].mxu0 }
 0xa68   :  { %v1727_v34 = vmul.f32 0.3275911, %v1721_v39  ;;  %v6034_v12 = vadd.f32 %v3899_v17, %v1687_v28  ;;  %v4369_v30 = vpop.f32.mrb[61].mxu0  ;;  %v1732_v22 = vadd.f32 1.0, %v1726_v43  ;;  %v1810_v35 = vmul.f32 %v1804_v63, %v1720_v19 }
 0xa69   :  { %v1690_v33 = vpop.f32.mrb[62].mxu0 }
 0xa6a   :  { %v4888_v6 = vpop.eup %4887  ;;  %v1733_v40 = vadd.f32 1.0, %v1727_v34  ;;  %v6037_v48 = vmul.f32 0.70710677, %v6034_v12  ;;  %v4370_v38 = vpop.f32.mrb[63].mxu0  ;;  %4891 = vrcp.f32 %v1732_v22  ;;  %v6039_v42 = vadd.f32 %v3899_v17, %v1690_v33 }
 0xa6b   :  { %v1748_v57 = vmul.f32 1.0614054, %v4888_v6  ;;  %v1805_v17 = vsub.f32 0.0, %v1721_v39  ;;  %v1818_v28 = vmul.f32 1.442695, %v1810_v35 }
 0xa6c   :  { %4893 = vrcp.f32 %v1733_v40  ;;  %v1722_v8 = vand.u32 2147483647, %v6037_v48  ;;  %v4890_v4 = vpop.eup %4889  ;;  %v6043_v61 = vmul.f32 0.70710677, %v6039_v42  ;;  %vm1710_vm10 = vcmp.ge.f32.partialorder %v6037_v48, 0.0 }
 0xa6d   :  { %v1754_v55 = vadd.f32 -1.4531521, %v1748_v57  ;;  %v1749_v7 = vmul.f32 1.0614054, %v4890_v4  ;;  %4895 = vpow2.f32 %v1814_v24  ;;  %v1811_v41 = vmul.f32 %v1805_v17, %v1721_v39 }
 0xa6e   :  { %v1728_v50 = vmul.f32 0.3275911, %v1722_v8  ;;  %v1723_v27 = vand.u32 2147483647, %v6043_v61  ;;  %v1806_v2 = vsub.f32 0.0, %v1722_v8  ;;  %vm1711_vm11 = vcmp.ge.f32.partialorder %v6043_v61, 0.0 }
 0xa6f   :  { %v1760_v44 = vmul.f32 %v4888_v6, %v1754_v55  ;;  %v1755_v45 = vadd.f32 -1.4531521, %v1749_v7  ;;  %v1820_v47 = vmul.f32 1.442695, %v1811_v41  ;;  %v3905_v61 = vld [vmem:[%s6934_s15] ss:$0 sm:$0xff] }
 0xa70   :  { %v1734_v25 = vadd.f32 1.0, %v1728_v50  ;;  %v1729_v9 = vmul.f32 0.3275911, %v1723_v27  ;;  %v1812_v38 = vmul.f32 %v1806_v2, %v1722_v8  ;;  %v1807_v50 = vsub.f32 0.0, %v1723_v27 }
 0xa71   :  { %v1766_v16 = vadd.f32 1.4214138, %v1760_v44  ;;  %v1761_v21 = vmul.f32 %v4890_v4, %v1755_v45 }
 0xa72   :  { %4897 = vrcp.f32 %v1734_v25  ;;  %v1735_v53 = vadd.f32 1.0, %v1729_v9 }
 0xa73   :  { %v1772_v0 = vmul.f32 %v4888_v6, %v1766_v16  ;;  %v1767_v51 = vadd.f32 1.4214138, %v1761_v21  ;;  %4899 = vpow2.f32 %v1816_v32  ;;  %v1822_v16 = vmul.f32 1.442695, %v1812_v38 }
 0xa74   :  { %v6046_v3 = vpop.eup %4891  ;;  %4901 = vrcp.f32 %v1735_v53  ;;  %v5103_v32 = vmov -1.0  }
 0xa75   :  { %v1778_v46 = vadd.f32 -0.28449672, %v1772_v0  ;;  %v1773_v5 = vmul.f32 %v4890_v4, %v1767_v51  ;;  %v1750_v58 = vmul.f32 1.0614054, %v6046_v3  ;;  %4903 = vpow2.f32 %v1818_v28 }
 0xa76   :  { %v6048_v49 = vpop.eup %4893  ;;  %4905 = vpow2.f32 %v1820_v47  ;;  %v1712_v21 = vsel %vm1706_vm6, 1.0, %v5103_v32  ;;  %v1713_v41 = vsel %vm1707_vm7, 1.0, %v5103_v32 }
 0xa77   :  { %v1784_v15 = vmul.f32 %v4888_v6, %v1778_v46  ;;  %v1751_v52 = vmul.f32 1.0614054, %v6048_v49  ;;  %v1779_v11 = vadd.f32 -0.28449672, %v1773_v5  ;;  %v1756_v43 = vadd.f32 -1.4531521, %v1750_v58  ;;  %v4896_v22 = vpop.eup %4895 }
 0xa78   :  { %v1813_v46 = vmul.f32 %v1807_v50, %v1723_v27  ;;  %4907 = vpow2.f32 %v1822_v16 }
 0xa79   :  { %v1790_v19 = vadd.f32 0.2548296, %v1784_v15  ;;  %v1757_v34 = vadd.f32 -1.4531521, %v1751_v52  ;;  %v1785_v30 = vmul.f32 %v4890_v4, %v1779_v11  ;;  %v1762_v56 = vmul.f32 %v6046_v3, %v1756_v43 }
 0xa7a   :  { %v1694_v43 = vmul.f32 0.5, %v6010_v37  ;;  %v1824_v27 = vmul.f32 1.442695, %v1813_v46 }
 0xa7b   :  { %v1796_v33 = vmul.f32 %v4888_v6, %v1790_v19  ;;  %v1763_v40 = vmul.f32 %v6048_v49, %v1757_v34  ;;  %v1791_v57 = vadd.f32 0.2548296, %v1785_v30  ;;  %v1768_v55 = vadd.f32 1.4214138, %v1762_v56 }
 0xa7c   :  { %v6054_v39 = vpop.eup %4897  ;;  %v1695_v30 = vmul.f32 0.5, %v6015_v29  ;;  %4909 = vpow2.f32 %v1824_v27 }
 0xa7d   :  { %v1826_v24 = vmul.f32 %v4896_v22, %v1796_v33  ;;  %v1769_v14 = vadd.f32 1.4214138, %v1763_v40  ;;  %v1752_v7 = vmul.f32 1.0614054, %v6054_v39  ;;  %v1797_v44 = vmul.f32 %v4890_v4, %v1791_v57  ;;  %v4900_v6 = vpop.eup %4899 }
 0xa7e   :  { %v1774_v45 = vmul.f32 %v6046_v3, %v1768_v55  ;;  %v4902_v9 = vpop.eup %4901 }
 0xa7f   :  { %v1832_v63 = vsub.f32 1.0, %v1826_v24  ;;  %v1775_v8 = vmul.f32 %v6048_v49, %v1769_v14  ;;  %v1758_v25 = vadd.f32 -1.4531521, %v1752_v7  ;;  %v1827_v17 = vmul.f32 %v4900_v6, %v1797_v44  ;;  %v4904_v34 = vpop.eup %4903 }
 0xa80   :  { %v1780_v0 = vadd.f32 -0.28449672, %v1774_v45  ;;  %v1753_v58 = vmul.f32 1.0614054, %v4902_v9  ;;  %v4906_v38 = vpop.eup %4905  ;;  %v1714_v44 = vsel %vm1708_vm8, 1.0, %v5103_v32  ;;  %v1715_v6 = vsel %vm1709_vm9, 1.0, %v5103_v32 }
 0xa81   :  { %v1838_v4 = vmul.f32 %v1832_v63, %v1712_v21  ;;  %v1781_v51 = vadd.f32 -0.28449672, %v1775_v8  ;;  %v1764_v35 = vmul.f32 %v6054_v39, %v1758_v25  ;;  %v1833_v53 = vsub.f32 1.0, %v1827_v17 }
 0xa82   :  { %v1786_v5 = vmul.f32 %v6046_v3, %v1780_v0  ;;  %v1759_v11 = vadd.f32 -1.4531521, %v1753_v58  ;;  %v4908_v8 = vpop.eup %4907  ;;  %v1696_v17 = vmul.f32 0.5, %v6022_v60  ;;  %v1697_v0 = vmul.f32 0.5, %v6024_v18 }
 0xa83   :  { %v1787_v15 = vmul.f32 %v6048_v49, %v1781_v51  ;;  %v1770_v26 = vadd.f32 1.4214138, %v1764_v35  ;;  %v1844_v52 = vadd.f32 1.0, %v1838_v4  ;;  %v1839_v54 = vmul.f32 %v1833_v53, %v1713_v41 }
 0xa84   :  { %v1792_v2 = vadd.f32 0.2548296, %v1786_v5  ;;  %v1765_v22 = vmul.f32 %v4902_v9, %v1759_v11  ;;  %v1717_v18 = vsel %vm1711_vm11, 1.0, %v5103_v32 }
 0xa85   :  { %v1793_v28 = vadd.f32 0.2548296, %v1787_v15  ;;  %v1776_v19 = vmul.f32 %v6054_v39, %v1770_v26  ;;  %v1845_v56 = vadd.f32 1.0, %v1839_v54  ;;  %v1850_v57 = vmul.f32 %v1844_v52, %v1694_v43 }
 0xa86   :  { %v1798_v47 = vmul.f32 %v6046_v3, %v1792_v2  ;;  %v1771_v24 = vadd.f32 1.4214138, %v1765_v22  ;;  %v4910_v41 = vpop.eup %4909  ;;  %v1698_v2 = vmul.f32 0.5, %v6034_v12 }
 0xa87   :  { %v1799_v33 = vmul.f32 %v6048_v49, %v1793_v28  ;;  %v1782_v40 = vadd.f32 -0.28449672, %v1776_v19  ;;  %v1851_v55 = vmul.f32 %v1845_v56, %v1695_v30 }
 0xa88   :  { %v1828_v37 = vmul.f32 %v4904_v34, %v1798_v47  ;;  %v1777_v3 = vmul.f32 %v4902_v9, %v1771_v24 }
 0xa89   :  { %v1829_v14 = vmul.f32 %v4906_v38, %v1799_v33  ;;  %v1788_v7 = vmul.f32 %v6054_v39, %v1782_v40  ;;  %v1873_v29 = vpack.c.bf16 %v1851_v55, %v1850_v57 }
 0xa8a   :  { %v1834_v50 = vsub.f32 1.0, %v1828_v37  ;;  %v1783_v63 = vadd.f32 -0.28449672, %v1777_v3 }
 0xa8b   :  { %v1835_v59 = vsub.f32 1.0, %v1829_v14  ;;  %v1794_v45 = vadd.f32 0.2548296, %v1788_v7  ;;  %4388 = vmatmul.mubr.bf16.vlgmr.msra.gmra.mrb[80].mxu1 %v1873_v29 }
 0xa8c   :  { %v1840_v49 = vmul.f32 %v1834_v50, %v1714_v44  ;;  %4391 = vmatprep.mubr.msk.bf16.mxu1 %vm5088_vm0, %v5087_v1  ;;  %v1789_v21 = vmul.f32 %v4902_v9, %v1783_v63 }
 0xa8d   :  { %v1841_v25 = vmul.f32 %v1835_v59, %v1715_v6  ;;  %v1800_v62 = vmul.f32 %v6054_v39, %v1794_v45  ;;  %v1716_v39 = vsel %vm1710_vm10, 1.0, %v5103_v32 }
 0xa8e   :  { %v1846_v16 = vadd.f32 1.0, %v1840_v49  ;;  %v1795_v35 = vadd.f32 0.2548296, %v1789_v21 }
 0xa8f   :  { %v1847_v4 = vadd.f32 1.0, %v1841_v25  ;;  %v1830_v51 = vmul.f32 %v4908_v8, %v1800_v62 }
 0xa90   :  { %v1852_v46 = vmul.f32 %v1846_v16, %v1696_v17  ;;  %v1801_v58 = vmul.f32 %v4902_v9, %v1795_v35  ;;  %v1699_v9 = vmul.f32 0.5, %v6039_v42 }
 0xa91   :  { %v1853_v53 = vmul.f32 %v1847_v4, %v1697_v0  ;;  %v1836_v5 = vsub.f32 1.0, %v1830_v51 }
 0xa92   :  { %v1831_v52 = vmul.f32 %v4910_v41, %v1801_v58 }
 0xa93   :  { %v1874_v15 = vpack.c.bf16 %v1853_v53, %v1852_v46  ;;  %v1842_v26 = vmul.f32 %v1836_v5, %v1716_v39 }
 0xa94   :  { %v1837_v60 = vsub.f32 1.0, %v1831_v52 }
 0xa95   :  { %4392 = vmatmul.mubr.bf16.gmra.mrb[84].mxu1 %v1874_v15  ;;  %v1848_v48 = vadd.f32 1.0, %v1842_v26 }
 0xa96   :  { %4395 = vmatprep.mubr.msk.bf16.mxu1 %vm5088_vm0, %v5087_v1  ;;  %v1843_v54 = vmul.f32 %v1837_v60, %v1717_v18 }
 0xa97   :  { %v1854_v43 = vmul.f32 %v1848_v48, %v1698_v2 }
 0xa98   :  { %v1849_v11 = vadd.f32 1.0, %v1843_v54 }
 0xa9a   :  { %v1855_v28 = vmul.f32 %v1849_v11, %v1699_v9 }
 0xa9c   :  { %v1875_v19 = vpack.c.bf16 %v1855_v28, %v1854_v43 }
 0xa9e   :  { %4396 = vmatmul.mubr.bf16.gmra.mrb[88].mxu1 %v1875_v19  ;;  %v4753_v19 = vld [vmem:[%s6925_s6 + $0x10] sm:$0xff]  }
 0xa9f   :  { %4439 = vmatprep.mubr.msk.bf16.mxu1 %vm5088_vm0, %v5087_v1  ;;  %4400 = vmatpush3.bf16.msra.mxu0 %v4753_v19 }
 0xaa0   :  { %4401 = vmatprep.subr.bf16.mxu0 %v5087_v1 }
 0xb5e   :  { %v1964_v27 = vpop.f32.mrb[80].mxu1 }
 0xb5f   :  { %v1965_v34 = vadd.f32 %v3905_v61, %v1964_v27  ;;  %v4389_v30 = vpop.f32.mrb[81].mxu1 }
 0xb60   :  { %v1967_v56 = vpop.f32.mrb[82].mxu1 }
 0xb61   :  { %v6097_v12 = vadd.f32 %v1965_v34, %v5896_v31  ;;  %v1968_v42 = vadd.f32 %v3905_v61, %v1967_v56  ;;  %v4390_v47 = vpop.f32.mrb[83].mxu1 }
 0xb63   :  { %v6100_v22 = vadd.f32 %v1968_v42, %v5899_v36  ;;  %v1997_v33 = vsel %vm187_vm2, %v6097_v12, 0.0 }
 0xb64   :  { %1998 = vadd.xlane.f32.xlu1 %v1997_v33 }
 0xb65   :  { %v2000_v40 = vsel %vm187_vm2, %v6100_v22, 0.0 }
 0xb66   :  { %2001 = vadd.xlane.f32.xlu0 %v2000_v40 }
 0xb68   :  { %v1972_v38 = vpop.f32.mrb[84].mxu1 }
 0xb69   :  { %v1973_v57 = vadd.f32 %v3905_v61, %v1972_v38  ;;  %v4393_v55 = vpop.f32.mrb[85].mxu1 }
 0xb6a   :  { %v1975_v37 = vpop.f32.mrb[86].mxu1 }
 0xb6b   :  { %v6107_v31 = vadd.f32 %v1973_v57, %v5906_v10  ;;  %v1976_v24 = vadd.f32 %v3905_v61, %v1975_v37  ;;  %v4394_v14 = vpop.f32.mrb[87].mxu1 }
 0xb6c   :  { %v3916_v14 = vld [vmem:[%s6923_s4 + $0x1] ss:$0 sm:$0xff] }
 0xb6d   :  { %v6110_v36 = vadd.f32 %v1976_v24, %v5909_v13  ;;  %v2003_v7 = vsel %vm187_vm2, %v6107_v31, 0.0 }
 0xb6e   :  { %2004 = vadd.xlane.f32.xlu1 %v2003_v7 }
 0xb6f   :  { %v2006_v29 = vsel %vm187_vm2, %v6110_v36, 0.0 }
 0xb70   :  { %2007 = vadd.xlane.f32.xlu0 %v2006_v29 }
 0xb71   :  { %v1980_v50 = vpop.f32.mrb[88].mxu1 }
 0xb72   :  { %v1981_v3 = vadd.f32 %v3905_v61, %v1980_v50  ;;  %v4397_v44 = vpop.f32.mrb[89].mxu1 }
 0xb73   :  { %v1983_v59 = vpop.f32.mrb[90].mxu1  ;;  %v3917_v44 = vld [vmem:[%s6924_s5 + $0x1] ss:$0 sm:$0xff] }
 0xb74   :  { %v6117_v10 = vadd.f32 %v1981_v3, %v5916_v20  ;;  %v1984_v45 = vadd.f32 %v3905_v61, %v1983_v59  ;;  %v4398_v49 = vpop.f32.mrb[91].mxu1  ;;  %v4754_v61 = vld [vmem:[%s6925_s6 + $0x18] sm:$0xff]   ;;  %s6961_s6 = smov 40  }
 0xb75   :  { %4402 = vmatpush3.bf16.msra.mxu0 %v4754_v61 }
 0xb76   :  { %v6120_v13 = vadd.f32 %v1984_v45, %v5919_v23  ;;  %v2009_v6 = vsel %vm187_vm2, %v6117_v10, 0.0  ;;  %4415 = vmatprep.subr.bf16.mxu0 %v5087_v1 }
 0xb77   :  { %2010 = vadd.xlane.f32.xlu1 %v2009_v6 }
 0xb78   :  { %v2012_v63 = vsel %vm187_vm2, %v6120_v13, 0.0 }
 0xb79   :  { %2013 = vadd.xlane.f32.xlu0 %v2012_v63 }
 0xbf1   :  { %v1999_v8 = vpop.xlane.xlu1 %1998 }
 0xbf2   :  { %v2015_v25 = vmul.f32 0.03125, %v1999_v8 }
 0xbf3   :  { %v2002_v62 = vpop.xlane.xlu0 %2001 }
 0xbf4   :  { %v2021_v16 = vsub.f32 %v6097_v12, %v2015_v25  ;;  %v2016_v20 = vmul.f32 0.03125, %v2002_v62 }
 0xbf6   :  { %v2022_v21 = vsub.f32 %v6100_v22, %v2016_v20  ;;  %v2027_v17 = vmul.f32 %v2021_v16, %v2021_v16 }
 0xbf8   :  { %v2033_v23 = vsel %vm187_vm2, %v2027_v17, 0.0  ;;  %v2028_v0 = vmul.f32 %v2022_v21, %v2022_v21 }
 0xbf9   :  { %2034 = vadd.xlane.f32.xlu1 %v2033_v23 }
 0xbfa   :  { %v2036_v51 = vsel %vm187_vm2, %v2028_v0, 0.0 }
 0xbfb   :  { %v2005_v4 = vpop.xlane.xlu1 %2004  ;;  %2037 = vadd.xlane.f32.xlu0 %v2036_v51 }
 0xbfc   :  { %v2017_v35 = vmul.f32 0.03125, %v2005_v4 }
 0xbfd   :  { %v2008_v46 = vpop.xlane.xlu0 %2007 }
 0xbfe   :  { %v2023_v53 = vsub.f32 %v6107_v31, %v2017_v35  ;;  %v2018_v5 = vmul.f32 0.03125, %v2008_v46 }
 0xc00   :  { %v6132_v58 = vsub.f32 %v6110_v36, %v2018_v5  ;;  %v2029_v41 = vmul.f32 %v2023_v53, %v2023_v53 }
 0xc02   :  { %v2039_v39 = vsel %vm187_vm2, %v2029_v41, 0.0  ;;  %v2030_v15 = vmul.f32 %v6132_v58, %v6132_v58 }
 0xc03   :  { %2040 = vadd.xlane.f32.xlu1 %v2039_v39 }
 0xc04   :  { %v2042_v26 = vsel %vm187_vm2, %v2030_v15, 0.0  ;;  %v2011_v52 = vpop.xlane.xlu1 %2010 }
 0xc05   :  { %2043 = vadd.xlane.f32.xlu0 %v2042_v26  ;;  %v2019_v60 = vmul.f32 0.03125, %v2011_v52 }
 0xc06   :  { %v2014_v18 = vpop.xlane.xlu0 %2013 }
 0xc07   :  { %v6139_v48 = vsub.f32 %v6117_v10, %v2019_v60  ;;  %v2020_v54 = vmul.f32 0.03125, %v2014_v18 }
 0xc09   :  { %v6142_v2 = vsub.f32 %v6120_v13, %v2020_v54  ;;  %v2031_v9 = vmul.f32 %v6139_v48, %v6139_v48  ;;  %v3923_v54 = vld [vmem:[%s6926_s7 + $0x1] ss:$0 sm:$0xff]  ;;  %s6959_s7 = smov 56  }
 0xc0b   :  { %v2045_v11 = vsel %vm187_vm2, %v2031_v9, 0.0  ;;  %v2032_v43 = vmul.f32 %v6142_v2, %v6142_v2 }
 0xc0c   :  { %2046 = vadd.xlane.f32.xlu1 %v2045_v11 }
 0xc0d   :  { %v2048_v28 = vsel %vm187_vm2, %v2032_v43, 0.0 }
 0xc0e   :  { %2049 = vadd.xlane.f32.xlu0 %v2048_v28 }
 0xc86   :  { %v2035_v27 = vpop.xlane.xlu1 %2034 }
 0xc87   :  { %v2051_v34 = vmul.f32 0.03125, %v2035_v27 }
 0xc88   :  { %v2038_v30 = vpop.xlane.xlu0 %2037 }
 0xc89   :  { %v2057_v56 = vadd.f32 1e-06, %v2051_v34  ;;  %v2052_v42 = vmul.f32 0.03125, %v2038_v30 }
 0xc8b   :  { %4911 = vrsqrt.f32 %v2057_v56  ;;  %v2058_v47 = vadd.f32 1e-06, %v2052_v42 }
 0xc8d   :  { %4913 = vrsqrt.f32 %v2058_v47 }
 0xc90   :  { %v2041_v33 = vpop.xlane.xlu1 %2040 }
 0xc91   :  { %v2053_v40 = vmul.f32 0.03125, %v2041_v33 }
 0xc92   :  { %v2044_v38 = vpop.xlane.xlu0 %2043 }
 0xc93   :  { %v2059_v57 = vadd.f32 1e-06, %v2053_v40  ;;  %v2054_v55 = vmul.f32 0.03125, %v2044_v38 }
 0xc95   :  { %4915 = vrsqrt.f32 %v2059_v57  ;;  %v2060_v37 = vadd.f32 1e-06, %v2054_v55  ;;  %v4912_v24 = vpop.eup %4911 }
 0xc96   :  { %v2069_v7 = vmul.f32 %v4912_v24, %v2021_v16 }
 0xc97   :  { %4917 = vrsqrt.f32 %v2060_v37  ;;  %v4914_v29 = vpop.eup %4913 }
 0xc98   :  { %v2081_v50 = vmul.f32 %v3916_v14, %v2069_v7  ;;  %v2070_v3 = vmul.f32 %v4914_v29, %v2022_v21 }
 0xc99   :  { %v2047_v45 = vpop.xlane.xlu1 %2046 }
 0xc9a   :  { %v2082_v59 = vmul.f32 %v3916_v14, %v2070_v3  ;;  %v2055_v49 = vmul.f32 0.03125, %v2047_v45  ;;  %v2093_v6 = vadd.f32 %v3917_v44, %v2081_v50 }
 0xc9b   :  { %v2050_v8 = vpop.xlane.xlu0 %2049 }
 0xc9c   :  { %v2094_v63 = vadd.f32 %v3917_v44, %v2082_v59  ;;  %v2061_v25 = vadd.f32 1e-06, %v2055_v49  ;;  %v2056_v62 = vmul.f32 0.03125, %v2050_v8 }
 0xc9e   :  { %v2106_v17 = vpack.c.bf16 %v2094_v63, %v2093_v6  ;;  %4919 = vrsqrt.f32 %v2061_v25  ;;  %v2062_v16 = vadd.f32 1e-06, %v2056_v62 }
 0xc9f   :  { %v4916_v20 = vpop.eup %4915 }
 0xca0   :  { %v2071_v23 = vmul.f32 %v4916_v20, %v2023_v53  ;;  %4404 = vmatmul.mubr.msk.bf16.vlgmr.msra.gmra.mrb[64].mxu0 %vm187_vm2, %v2106_v17  ;;  %4921 = vrsqrt.f32 %v2062_v16 }
 0xca1   :  { %v4918_v0 = vpop.eup %4917  ;;  %4407 = vmatprep.mubr.msk.bf16.mxu0 %vm5088_vm0, %v5087_v1 }
 0xca2   :  { %v2072_v21 = vmul.f32 %v4918_v0, %v6132_v58  ;;  %v2083_v4 = vmul.f32 %v3916_v14, %v2071_v23 }
 0xca4   :  { %v2084_v51 = vmul.f32 %v3916_v14, %v2072_v21  ;;  %v2095_v35 = vadd.f32 %v3917_v44, %v2083_v4 }
 0xca6   :  { %v2096_v46 = vadd.f32 %v3917_v44, %v2084_v51 }
 0xca8   :  { %v2107_v5 = vpack.c.bf16 %v2096_v46, %v2095_v35  ;;  %v4920_v41 = vpop.eup %4919 }
 0xca9   :  { %v2073_v53 = vmul.f32 %v4920_v41, %v6139_v48 }
 0xcaa   :  { %4408 = vmatmul.mubr.msk.bf16.gmra.mrb[68].mxu0 %vm187_vm2, %v2107_v5  ;;  %v4922_v39 = vpop.eup %4921 }
 0xcab   :  { %4411 = vmatprep.mubr.msk.bf16.mxu0 %vm5088_vm0, %v5087_v1  ;;  %v2074_v15 = vmul.f32 %v4922_v39, %v6142_v2  ;;  %v2085_v26 = vmul.f32 %v3916_v14, %v2073_v53 }
 0xcad   :  { %v2086_v52 = vmul.f32 %v3916_v14, %v2074_v15  ;;  %v2097_v60 = vadd.f32 %v3917_v44, %v2085_v26 }
 0xcaf   :  { %v2098_v58 = vadd.f32 %v3917_v44, %v2086_v52 }
 0xcb1   :  { %v2108_v18 = vpack.c.bf16 %v2098_v58, %v2097_v60 }
 0xcb3   :  { %4412 = vmatmul.mubr.msk.bf16.gmra.mrb[72].mxu0 %vm187_vm2, %v2108_v18 }
 0xcb4   :  { %4421 = vmatprep.mubr.msk.bf16.mxu0 %vm5088_vm0, %v5087_v1 }
 0xd73   :  { %v2170_v9 = vpop.f32.mrb[64].mxu0 }
 0xd74   :  { %v4405_v11 = vpop.f32.mrb[65].mxu0  ;;  %v2171_v43 = vadd.f32 %v3923_v54, %v2170_v9 }
 0xd75   :  { %v2173_v48 = vpop.f32.mrb[66].mxu0 }
 0xd76   :  { %v2174_v28 = vadd.f32 %v3923_v54, %v2173_v48  ;;  %v4406_v2 = vpop.f32.mrb[67].mxu0 }
 0xd78   :  { %v6179_v19 = vpack.c.bf16 %v2174_v28, %v2171_v43  ;;  %v6308_v43 = vld [vmem:[%s6922_s3] sm:$0xff] }
 0xd7a   :  { %2199 = vrot.lane.b32.xlu1 %v6179_v19, %s5089_s20 }
 0xd7d   :  { %v2178_v61 = vpop.f32.mrb[68].mxu0 }
 0xd7e   :  { %v4409_v27 = vpop.f32.mrb[69].mxu0  ;;  %v2179_v30 = vadd.f32 %v3923_v54, %v2178_v61 }
 0xd7f   :  { %v2181_v34 = vpop.f32.mrb[70].mxu0  ;;  %v6316_v27 = vld [vmem:[%s6922_s3 + $0x8] sm:$0xff] }
 0xd80   :  { %v2182_v56 = vadd.f32 %v3923_v54, %v2181_v34  ;;  %v4410_v42 = vpop.f32.mrb[71].mxu0 }
 0xd82   :  { %v6183_v47 = vpack.c.bf16 %v2182_v56, %v2179_v30 }
 0xd84   :  { %2201 = vrot.lane.b32.xlu0 %v6183_v47, %s5089_s20 }
 0xd86   :  { %v2186_v33 = vpop.f32.mrb[72].mxu0 }
 0xd87   :  { %v4413_v40 = vpop.f32.mrb[73].mxu0  ;;  %v2187_v57 = vadd.f32 %v3923_v54, %v2186_v33 }
 0xd88   :  { %2432 = vrot.lane.b32.xlu0 %v6183_v47, %s5090_s21  ;;  %v2189_v38 = vpop.f32.mrb[74].mxu0  ;;  %v6328_v40 = vld [vmem:[%s6922_s3 + $0x10] sm:$0xff] }
 0xd89   :  { %v2190_v55 = vadd.f32 %v3923_v54, %v2189_v38  ;;  %v4414_v37 = vpop.f32.mrb[75].mxu0 }
 0xd8a   :  { %v6336_v37 = vld [vmem:[%s6922_s3 + $0x18] sm:$0xff] }
 0xd8b   :  { %v6191_v24 = vpack.c.bf16 %v2190_v55, %v2187_v57 }
 0xd8c   :  { %2424 = vrot.lane.b32.xlu0 %v6179_v19, %s5091_s22 }
 0xd8d   :  { %2203 = vrot.lane.b32.xlu1 %v6191_v24, %s5089_s20 }
 0xd90   :  { %2426 = vrot.lane.b32.xlu0 %v6183_v47, %s5091_s22 }
 0xd91   :  { %2430 = vrot.lane.b32.xlu1 %v6179_v19, %s5090_s21 }
 0xd94   :  { %2428 = vrot.lane.b32.xlu0 %v6191_v24, %s5091_s22 }
 0xd95   :  { %2434 = vrot.lane.b32.xlu1 %v6191_v24, %s5090_s21 }
 0xd98   :  { %2655 = vrot.lane.b32.xlu0 %v6179_v19, %s5092_s2 }
 0xd99   :  { %2661 = vrot.lane.b32.xlu1 %v6179_v19, %s5093_s23 }
 0xd9c   :  { %2657 = vrot.lane.b32.xlu0 %v6183_v47, %s5092_s2 }
 0xd9d   :  { %2663 = vrot.lane.b32.xlu1 %v6183_v47, %s5093_s23 }
 0xda0   :  { %2659 = vrot.lane.b32.xlu0 %v6191_v24, %s5092_s2 }
 0xda1   :  { %2665 = vrot.lane.b32.xlu1 %v6191_v24, %s5093_s23 }
 0xda4   :  { %2886 = vrot.lane.b32.xlu0 %v6179_v19, %s5094_s24 }
 0xda5   :  { %2892 = vrot.lane.b32.xlu1 %v6179_v19, %s5095_s25 }
 0xda8   :  { %2349 = vrot.lane.b32.xlu0 %v6179_v19, %s5096_s26 }
 0xda9   :  { %2894 = vrot.lane.b32.xlu1 %v6183_v47, %s5095_s25 }
 0xdac   :  { %2582 = vrot.lane.b32.xlu0 %v6183_v47, %s6959_s7 }
 0xdad   :  { %2896 = vrot.lane.b32.xlu1 %v6191_v24, %s5095_s25 }
 0xdb0   :  { %2890 = vrot.lane.b32.xlu0 %v6191_v24, %s5094_s24 }
 0xdb1   :  { %2888 = vrot.lane.b32.xlu1 %v6183_v47, %s5094_s24 }
 0xdb4   :  { %2353 = vrot.lane.b32.xlu0 %v6191_v24, %s5096_s26 }
 0xdb5   :  { %2351 = vrot.lane.b32.xlu1 %v6183_v47, %s5096_s26 }
 0xdb9   :  { %2580 = vrot.lane.b32.xlu1 %v6179_v19, %s6959_s7 }
 0xdec   :  { %v2200_v14 = vpop.permute.xlu1 %2199 }
 0xded   :  { %v2215_v7 = vsel %vm395_vm3, %v2200_v14, 0 }
 0xdee   :  { %4416 = vmatpush3.bf16.xpose.msra.mxu0 %v2215_v7 }
 0xdef   :  { %4417 = vmatprep.subr.bf16.mxu0 %v5087_v1 }
 0xdf6   :  { %v2202_v29 = vpop.permute.xlu0 %2201 }
 0xdf7   :  { %v2218_v50 = vsel %vm395_vm3, %v2202_v29, 0 }
 0xdf8   :  { %4418 = vmatpush3.bf16.xpose.msra.mxu0 %v2218_v50 }
 0xdf9   :  { %4419 = vmatprep.subr.bf16.mxu0 %v5087_v1 }
 0xdfa   :  { %v2433_v3 = vpop.permute.xlu0 %2432 }
 0xdfb   :  { %v2449_v23 = vsel %vm395_vm3, %v2433_v3, 0 }
 0xdfe   :  { %v2425_v44 = vpop.permute.xlu0 %2424 }
 0xdff   :  { %v2204_v59 = vpop.permute.xlu1 %2203 }
 0xe00   :  { %v2221_v45 = vsel %vm395_vm3, %v2204_v59, 0 }
 0xe01   :  { %4420 = vmatpush3.bf16.xpose.msra.mxu0 %v2221_v45 }
 0xe02   :  { %v2427_v49 = vpop.permute.xlu0 %2426  ;;  %4451 = vmatprep.subr.bf16.mxu0 %v5087_v1 }
 0xe03   :  { %v2431_v6 = vpop.permute.xlu1 %2430 }
 0xe04   :  { %v2446_v25 = vsel %vm395_vm3, %v2431_v6, 0  ;;  %v6356_v6 = vld [vmem:[%s6922_s3 + $0x28] sm:$0xff] }
 0xe06   :  { %v2429_v63 = vpop.permute.xlu0 %2428 }
 0xe07   :  { %v2435_v8 = vpop.permute.xlu1 %2434 }
 0xe08   :  { %4422 = vmatmul.mubr.msk.bf16.vlgmr.msra.gmra.mrb[76].mxu0 %vm395_vm3, %v6179_v19  ;;  %v2452_v35 = vsel %vm395_vm3, %v2435_v8, 0 }
 0xe09   :  { %4452 = vmatpush3.bf16.xpose.msra.mxu0 %v2446_v25  ;;  %4425 = vmatprep.mubr.msk.bf16.mxu0 %vm5088_vm0, %v5087_v1 }
 0xe0a   :  { %v2656_v62 = vpop.permute.xlu0 %2655  ;;  %4453 = vmatprep.subr.bf16.mxu0 %v5087_v1 }
 0xe0b   :  { %v2662_v20 = vpop.permute.xlu1 %2661 }
 0xe0c   :  { %v2677_v39 = vsel %vm395_vm3, %v2662_v20, 0 }
 0xe0e   :  { %v2658_v17 = vpop.permute.xlu0 %2657 }
 0xe0f   :  { %v2664_v16 = vpop.permute.xlu1 %2663 }
 0xe10   :  { %4426 = vmatmul.mubr.msk.bf16.gmra.mrb[80].mxu0 %vm395_vm3, %v6183_v47  ;;  %v2680_v60 = vsel %vm395_vm3, %v2664_v16, 0 }
 0xe11   :  { %4454 = vmatpush3.bf16.xpose.msra.mxu0 %v2449_v23  ;;  %4429 = vmatprep.mubr.msk.bf16.mxu0 %vm5088_vm0, %v5087_v1 }
 0xe12   :  { %v2660_v0 = vpop.permute.xlu0 %2659  ;;  %4455 = vmatprep.subr.bf16.mxu0 %v5087_v1 }
 0xe13   :  { %v2666_v21 = vpop.permute.xlu1 %2665 }
 0xe14   :  { %v2683_v18 = vsel %vm395_vm3, %v2666_v21, 0 }
 0xe16   :  { %v2887_v4 = vpop.permute.xlu0 %2886 }
 0xe17   :  { %v2893_v51 = vpop.permute.xlu1 %2892 }
 0xe18   :  { %4430 = vmatmul.mubr.msk.bf16.gmra.mrb[84].mxu0 %vm395_vm3, %v6191_v24  ;;  %v2908_v54 = vsel %vm395_vm3, %v2893_v51, 0 }
 0xe19   :  { %4456 = vmatpush3.bf16.xpose.msra.mxu0 %v2452_v35  ;;  %4457 = vmatprep.mubr.msk.bf16.mxu0 %vm5088_vm0, %v5087_v1 }
 0xe1a   :  { %v2350_v46 = vpop.permute.xlu0 %2349  ;;  %4487 = vmatprep.subr.bf16.mxu0 %v5087_v1 }
 0xe1b   :  { %4434 = vmatpush3.bf16.msra.mxu1 %v2350_v46  ;;  %v2895_v5 = vpop.permute.xlu1 %2894 }
 0xe1c   :  { %4435 = vmatprep.subr.bf16.mxu1 %v5087_v1  ;;  %v2911_v9 = vsel %vm395_vm3, %v2895_v5, 0 }
 0xe1e   :  { %v6262_v41 = vpop.permute.xlu0 %2582 }
 0xe1f   :  { %v2897_v53 = vpop.permute.xlu1 %2896 }
 0xe20   :  { %4458 = vmatmul.mubr.msk.bf16.vlgmr.msra.gmra.mrb[88].mxu0 %vm395_vm3, %v2425_v44  ;;  %v2914_v11 = vsel %vm395_vm3, %v2897_v53, 0  ;;  %v6348_v44 = vld [vmem:[%s6922_s3 + $0x20] sm:$0xff]  ;;  %s6960_s3 = smov 48  }
 0xe21   :  { %4488 = vmatpush3.bf16.xpose.msra.mxu0 %v2677_v39  ;;  %4461 = vmatprep.mubr.msk.bf16.mxu0 %vm5088_vm0, %v5087_v1 }
 0xe22   :  { %4489 = vmatprep.subr.bf16.mxu0 %v5087_v1  ;;  %v2891_v26 = vpop.permute.xlu0 %2890 }
 0xe23   :  { %v2889_v15 = vpop.permute.xlu1 %2888 }
 0xe26   :  { %v2354_v58 = vpop.permute.xlu0 %2353 }
 0xe27   :  { %v2352_v52 = vpop.permute.xlu1 %2351 }
 0xe28   :  { %4436 = vmatpush3.bf16.msra.mxu1 %v2352_v52  ;;  %4462 = vmatmul.mubr.msk.bf16.gmra.mrb[92].mxu0 %vm395_vm3, %v2427_v49 }
 0xe29   :  { %4490 = vmatpush3.bf16.xpose.msra.mxu0 %v2680_v60  ;;  %4437 = vmatprep.subr.bf16.mxu1 %v5087_v1 }
 0xe2a   :  { %4465 = vmatprep.mubr.msk.bf16.mxu0 %vm5088_vm0, %v5087_v1  ;;  %4491 = vmatprep.subr.bf16.mxu0 %v5087_v1 }
 0xe2c   :  { %4438 = vmatpush3.bf16.msra.mxu1 %v2354_v58 }
 0xe2d   :  { %4469 = vmatprep.subr.bf16.mxu1 %v5087_v1 }
 0xe30   :  { %4466 = vmatmul.mubr.msk.bf16.gmra.mrb[96].mxu0 %vm395_vm3, %v2429_v63 }
 0xe31   :  { %4492 = vmatpush3.bf16.xpose.msra.mxu0 %v2683_v18  ;;  %4493 = vmatprep.mubr.msk.bf16.mxu0 %vm5088_vm0, %v5087_v1 }
 0xe32   :  { %4523 = vmatprep.subr.bf16.mxu0 %v5087_v1 }
 0xe38   :  { %4494 = vmatmul.mubr.msk.bf16.vlgmr.msra.gmra.mrb[100].mxu0 %vm395_vm3, %v2656_v62 }
 0xe39   :  { %4524 = vmatpush3.bf16.xpose.msra.mxu0 %v2908_v54  ;;  %4497 = vmatprep.mubr.msk.bf16.mxu0 %vm5088_vm0, %v5087_v1 }
 0xe3a   :  { %4525 = vmatprep.subr.bf16.mxu0 %v5087_v1 }
 0xe40   :  { %4498 = vmatmul.mubr.msk.bf16.gmra.mrb[104].mxu0 %vm395_vm3, %v2658_v17 }
 0xe41   :  { %4526 = vmatpush3.bf16.xpose.msra.mxu0 %v2911_v9  ;;  %4501 = vmatprep.mubr.msk.bf16.mxu0 %vm5088_vm0, %v5087_v1 }
 0xe42   :  { %4527 = vmatprep.subr.bf16.mxu0 %v5087_v1 }
 0xe48   :  { %4502 = vmatmul.mubr.msk.bf16.gmra.mrb[108].mxu0 %vm395_vm3, %v2660_v0 }
 0xe49   :  { %4528 = vmatpush3.bf16.xpose.msra.mxu0 %v2914_v11  ;;  %4529 = vmatprep.mubr.msk.bf16.mxu0 %vm5088_vm0, %v5087_v1 }
 0xe4a   :  { %4559 = vmatprep.subr.bf16.mxu0 %v5087_v1 }
 0xe50   :  { %4530 = vmatmul.mubr.msk.bf16.vlgmr.msra.gmra.mrb[112].mxu0 %vm395_vm3, %v2887_v4 }
 0xe51   :  { %4533 = vmatprep.mubr.msk.bf16.mxu0 %vm5088_vm0, %v5087_v1 }
 0xe58   :  { %4534 = vmatmul.mubr.msk.bf16.gmra.mrb[116].mxu0 %vm395_vm3, %v2889_v15 }
 0xe59   :  { %4537 = vmatprep.mubr.msk.bf16.mxu0 %vm5088_vm0, %v5087_v1 }
 0xe60   :  { %4538 = vmatmul.mubr.msk.bf16.gmra.mrb[120].mxu0 %vm395_vm3, %v2891_v26 }
 0xe61   :  { %4563 = vmatprep.mubr.msk.bf16.mxu0 %vm5088_vm0, %v5087_v1 }
 0xedb   :  { %v2257_v48 = vpop.f32.mrb[76].mxu0 }
 0xedc   :  { %v6311_v28 = vadd.f32 %v6308_v43, %v2257_v48  ;;  %v4423_v2 = vpop.f32.mrb[77].mxu0 }
 0xedd   :  { %v2260_v61 = vpop.f32.mrb[78].mxu0 }
 0xede   :  { %v6319_v34 = vadd.f32 %v6316_v27, %v2260_v61  ;;  %v4424_v30 = vpop.f32.mrb[79].mxu0  ;;  %v2280_v56 = vsel %vm112_vm1, %v6311_v28, -inf }
 0xedf   :  { %2281 = vmax.xlane.f32.xlu1 %v2280_v56 }
 0xee0   :  { %v2283_v42 = vsel %vm112_vm1, %v6319_v34, -inf }
 0xee1   :  { %2284 = vmax.xlane.f32.xlu0 %v2283_v42 }
 0xee3   :  { %v2265_v33 = vpop.f32.mrb[80].mxu0 }
 0xee4   :  { %v6331_v38 = vadd.f32 %v6328_v40, %v2265_v33  ;;  %v4427_v57 = vpop.f32.mrb[81].mxu0 }
 0xee5   :  { %v2268_v55 = vpop.f32.mrb[82].mxu0 }
 0xee6   :  { %v6339_v14 = vadd.f32 %v6336_v37, %v2268_v55  ;;  %v4428_v7 = vpop.f32.mrb[83].mxu0  ;;  %v2286_v29 = vsel %vm112_vm1, %v6331_v38, -inf }
 0xee7   :  { %2287 = vmax.xlane.f32.xlu0 %v2286_v29 }
 0xee8   :  { %v2289_v50 = vsel %vm112_vm1, %v6339_v14, -inf }
 0xee9   :  { %2290 = vmax.xlane.f32.xlu1 %v2289_v50 }
 0xeeb   :  { %v2273_v3 = vpop.f32.mrb[84].mxu0 }
 0xeec   :  { %v6351_v59 = vadd.f32 %v6348_v44, %v2273_v3  ;;  %v4431_v45 = vpop.f32.mrb[85].mxu0 }
 0xeed   :  { %v2276_v49 = vpop.f32.mrb[86].mxu0 }
 0xeee   :  { %v6359_v63 = vadd.f32 %v6356_v6, %v2276_v49  ;;  %v4432_v8 = vpop.f32.mrb[87].mxu0  ;;  %v2292_v25 = vsel %vm112_vm1, %v6351_v59, -inf }
 0xeef   :  { %2293 = vmax.xlane.f32.xlu0 %v2292_v25 }
 0xef0   :  { %v2295_v62 = vsel %vm112_vm1, %v6359_v63, -inf }
 0xef1   :  { %2296 = vmax.xlane.f32.xlu1 %v2295_v62 }
 0xef3   :  { %v2488_v20 = vpop.f32.mrb[88].mxu0 }
 0xef4   :  { %v6366_v17 = vadd.f32 %v6308_v43, %v2488_v20  ;;  %v4459_v16 = vpop.f32.mrb[89].mxu0 }
 0xef5   :  { %v2491_v23 = vpop.f32.mrb[90].mxu0 }
 0xef6   :  { %v6369_v0 = vadd.f32 %v6316_v27, %v2491_v23  ;;  %v4460_v21 = vpop.f32.mrb[91].mxu0  ;;  %v2511_v4 = vsel %vm112_vm1, %v6366_v17, -inf }
 0xef7   :  { %2512 = vmax.xlane.f32.xlu0 %v2511_v4 }
 0xef8   :  { %v2514_v51 = vsel %vm112_vm1, %v6369_v0, -inf }
 0xef9   :  { %2515 = vmax.xlane.f32.xlu1 %v2514_v51 }
 0xefb   :  { %v2496_v35 = vpop.f32.mrb[92].mxu0 }
 0xefc   :  { %v6376_v46 = vadd.f32 %v6328_v40, %v2496_v35  ;;  %v4463_v5 = vpop.f32.mrb[93].mxu0 }
 0xefd   :  { %v2499_v53 = vpop.f32.mrb[94].mxu0 }
 0xefe   :  { %v6379_v39 = vadd.f32 %v6336_v37, %v2499_v53  ;;  %v4464_v15 = vpop.f32.mrb[95].mxu0  ;;  %v2517_v26 = vsel %vm112_vm1, %v6376_v46, -inf }
 0xeff   :  { %2518 = vmax.xlane.f32.xlu0 %v2517_v26 }
 0xf00   :  { %v2520_v52 = vsel %vm112_vm1, %v6379_v39, -inf }
 0xf01   :  { %2521 = vmax.xlane.f32.xlu1 %v2520_v52 }
 0xf03   :  { %v2504_v60 = vpop.f32.mrb[96].mxu0 }
 0xf04   :  { %v6386_v58 = vadd.f32 %v6348_v44, %v2504_v60  ;;  %v4467_v18 = vpop.f32.mrb[97].mxu0 }
 0xf05   :  { %v2507_v54 = vpop.f32.mrb[98].mxu0 }
 0xf06   :  { %v6389_v9 = vadd.f32 %v6356_v6, %v2507_v54  ;;  %v4468_v11 = vpop.f32.mrb[99].mxu0  ;;  %v2523_v48 = vsel %vm112_vm1, %v6386_v58, -inf }
 0xf07   :  { %2524 = vmax.xlane.f32.xlu0 %v2523_v48 }
 0xf08   :  { %v2526_v2 = vsel %vm112_vm1, %v6389_v9, -inf }
 0xf09   :  { %2527 = vmax.xlane.f32.xlu1 %v2526_v2 }
 0xf0b   :  { %v2719_v61 = vpop.f32.mrb[100].mxu0 }
 0xf0c   :  { %v6396_v30 = vadd.f32 %v6308_v43, %v2719_v61  ;;  %v4495_v56 = vpop.f32.mrb[101].mxu0 }
 0xf0d   :  { %v2722_v42 = vpop.f32.mrb[102].mxu0 }
 0xf0e   :  { %v6399_v33 = vadd.f32 %v6316_v27, %v2722_v42  ;;  %v4496_v57 = vpop.f32.mrb[103].mxu0  ;;  %v2742_v55 = vsel %vm112_vm1, %v6396_v30, -inf }
 0xf0f   :  { %2743 = vmax.xlane.f32.xlu0 %v2742_v55 }
 0xf10   :  { %v2745_v7 = vsel %vm112_vm1, %v6399_v33, -inf }
 0xf11   :  { %2746 = vmax.xlane.f32.xlu1 %v2745_v7 }
 0xf13   :  { %v2727_v29 = vpop.f32.mrb[104].mxu0 }
 0xf14   :  { %v6406_v50 = vadd.f32 %v6328_v40, %v2727_v29  ;;  %v4499_v3 = vpop.f32.mrb[105].mxu0 }
 0xf15   :  { %v2730_v45 = vpop.f32.mrb[106].mxu0 }
 0xf16   :  { %v6409_v49 = vadd.f32 %v6336_v37, %v2730_v45  ;;  %v4500_v8 = vpop.f32.mrb[107].mxu0  ;;  %v2748_v25 = vsel %vm112_vm1, %v6406_v50, -inf }
 0xf17   :  { %2749 = vmax.xlane.f32.xlu0 %v2748_v25 }
 0xf18   :  { %v2751_v62 = vsel %vm112_vm1, %v6409_v49, -inf }
 0xf19   :  { %2752 = vmax.xlane.f32.xlu1 %v2751_v62 }
 0xf1b   :  { %v2735_v20 = vpop.f32.mrb[108].mxu0 }
 0xf1c   :  { %v6416_v16 = vadd.f32 %v6348_v44, %v2735_v20  ;;  %v4503_v23 = vpop.f32.mrb[109].mxu0 }
 0xf1d   :  { %v2738_v21 = vpop.f32.mrb[110].mxu0 }
 0xf1e   :  { %v6419_v4 = vadd.f32 %v6356_v6, %v2738_v21  ;;  %v4504_v51 = vpop.f32.mrb[111].mxu0  ;;  %v2754_v35 = vsel %vm112_vm1, %v6416_v16, -inf }
 0xf1f   :  { %2755 = vmax.xlane.f32.xlu0 %v2754_v35 }
 0xf20   :  { %v2757_v5 = vsel %vm112_vm1, %v6419_v4, -inf }
 0xf21   :  { %2758 = vmax.xlane.f32.xlu1 %v2757_v5 }
 0xf23   :  { %v2950_v53 = vpop.f32.mrb[112].mxu0 }
 0xf24   :  { %v6426_v15 = vadd.f32 %v6308_v43, %v2950_v53  ;;  %v4531_v26 = vpop.f32.mrb[113].mxu0 }
 0xf25   :  { %v2953_v52 = vpop.f32.mrb[114].mxu0 }
 0xf26   :  { %v6429_v60 = vadd.f32 %v6316_v27, %v2953_v52  ;;  %v4532_v18 = vpop.f32.mrb[115].mxu0  ;;  %v2973_v54 = vsel %vm112_vm1, %v6426_v15, -inf }
 0xf27   :  { %2974 = vmax.xlane.f32.xlu0 %v2973_v54 }
 0xf28   :  { %v2976_v11 = vsel %vm112_vm1, %v6429_v60, -inf }
 0xf29   :  { %2977 = vmax.xlane.f32.xlu1 %v2976_v11 }
 0xf2b   :  { %v2958_v48 = vpop.f32.mrb[116].mxu0 }
 0xf2c   :  { %v6436_v2 = vadd.f32 %v6328_v40, %v2958_v48  ;;  %v4535_v43 = vpop.f32.mrb[117].mxu0 }
 0xf2d   :  { %v2961_v61 = vpop.f32.mrb[118].mxu0 }
 0xf2e   :  { %v6439_v56 = vadd.f32 %v6336_v37, %v2961_v61  ;;  %v4536_v27 = vpop.f32.mrb[119].mxu0  ;;  %v2979_v42 = vsel %vm112_vm1, %v6436_v2, -inf  ;;  %v6453_v37 = vpop.permute.xlu1 %2580 }
 0xf2f   :  { %2980 = vmax.xlane.f32.xlu0 %v2979_v42 }
 0xf30   :  { %v2982_v57 = vsel %vm112_vm1, %v6439_v56, -inf }
 0xf31   :  { %2983 = vmax.xlane.f32.xlu1 %v2982_v57 }
 0xf33   :  { %v6445_v55 = vpop.f32.mrb[120].mxu0 }
 0xf34   :  { %v4539_v7 = vpop.f32.mrb[121].mxu0 }
 0xf35   :  { %v6447_v29 = vpop.f32.mrb[122].mxu0 }
 0xf36   :  { %v4540_v40 = vpop.f32.mrb[123].mxu0 }
 0xf42   :  { %2811 = vrot.lane.b32.xlu1 %v6179_v19, %s6960_s3 }
 0xf46   :  { %2813 = vrot.lane.b32.xlu1 %v6183_v47, %s6960_s3 }
 0xf6c   :  { %v2282_v3 = vpop.xlane.xlu1 %2281 }
 0xf6d   :  { %v2298_v45 = vsub.f32 %v6311_v28, %v2282_v3 }
 0xf6e   :  { %v2285_v8 = vpop.xlane.xlu0 %2284 }
 0xf6f   :  { %v2304_v25 = vmul.f32 1.442695, %v2298_v45  ;;  %v2299_v62 = vsub.f32 %v6319_v34, %v2285_v8 }
 0xf71   :  { %4923 = vpow2.f32 %v2304_v25  ;;  %v2306_v20 = vmul.f32 1.442695, %v2299_v62 }
 0xf73   :  { %4925 = vpow2.f32 %v2306_v20 }
 0xf74   :  { %v2288_v5 = vpop.xlane.xlu0 %2287 }
 0xf76   :  { %v2291_v23 = vpop.xlane.xlu1 %2290 }
 0xf77   :  { %v2301_v21 = vsub.f32 %v6339_v14, %v2291_v23 }
 0xf79   :  { %v2310_v51 = vmul.f32 1.442695, %v2301_v21 }
 0xf7b   :  { %v6458_v35 = vpop.eup %4923  ;;  %4927 = vpow2.f32 %v2310_v51 }
 0xf7c   :  { %v2316_v53 = vsel %vm112_vm1, %v6458_v35, 0.0  ;;  %v2294_v18 = vpop.xlane.xlu0 %2293 }
 0xf7d   :  { %v6462_v26 = vpop.eup %4925  ;;  %2317 = vadd.xlane.f32.xlu0 %v2316_v53  ;;  %v2300_v53 = vsub.f32 %v6331_v38, %v2288_v5 }
 0xf7e   :  { %v2297_v28 = vpop.xlane.xlu1 %2296  ;;  %v2319_v34 = vsel %vm112_vm1, %v6462_v26, 0.0 }
 0xf7f   :  { %v2303_v52 = vsub.f32 %v6359_v63, %v2297_v28  ;;  %2320 = vadd.xlane.f32.xlu1 %v2319_v34 }
 0xf81   :  { %v2314_v14 = vmul.f32 1.442695, %v2303_v52 }
 0xf83   :  { %4929 = vpow2.f32 %v2314_v14  ;;  %v2308_v14 = vmul.f32 1.442695, %v2300_v53 }
 0xf84   :  { %v2513_v54 = vpop.xlane.xlu0 %2512 }
 0xf85   :  { %v6467_v11 = vpop.eup %4927  ;;  %v2529_v48 = vsub.f32 %v6366_v17, %v2513_v54  ;;  %v2302_v54 = vsub.f32 %v6351_v59, %v2294_v18 }
 0xf86   :  { %v2325_v43 = vsel %vm112_vm1, %v6467_v11, 0.0  ;;  %v2516_v27 = vpop.xlane.xlu1 %2515 }
 0xf87   :  { %v2535_v61 = vmul.f32 1.442695, %v2529_v48  ;;  %2326 = vadd.xlane.f32.xlu1 %v2325_v43  ;;  %v2312_v38 = vmul.f32 1.442695, %v2302_v54  ;;  %v2530_v5 = vsub.f32 %v6369_v0, %v2516_v27 }
 0xf89   :  { %4931 = vpow2.f32 %v2535_v61 }
 0xf8c   :  { %v2519_v42 = vpop.xlane.xlu0 %2518 }
 0xf8d   :  { %v6472_v57 = vpop.eup %4929  ;;  %v2531_v63 = vsub.f32 %v6376_v46, %v2519_v42 }
 0xf8e   :  { %v2522_v7 = vpop.xlane.xlu1 %2521  ;;  %v2331_v40 = vsel %vm112_vm1, %v6472_v57, 0.0 }
 0xf8f   :  { %v2539_v3 = vmul.f32 1.442695, %v2531_v63  ;;  %v2532_v45 = vsub.f32 %v6379_v39, %v2522_v7  ;;  %2332 = vadd.xlane.f32.xlu1 %v2331_v40 }
 0xf91   :  { %4933 = vpow2.f32 %v2539_v3  ;;  %v2541_v17 = vmul.f32 1.442695, %v2532_v45  ;;  %v2537_v3 = vmul.f32 1.442695, %v2530_v5 }
 0xf93   :  { %v6478_v8 = vpop.eup %4931  ;;  %4935 = vpow2.f32 %v2541_v17  ;;  %2584 = vrot.lane.b32.xlu0 %v6191_v24, %s6959_s7  ;;  %s6963_s7 = smov 16  }
 0xf94   :  { %v2525_v25 = vpop.xlane.xlu0 %2524  ;;  %v2547_v46 = vsel %vm112_vm1, %v6478_v8, 0.0 }
 0xf95   :  { %v2533_v62 = vsub.f32 %v6386_v58, %v2525_v25  ;;  %2548 = vadd.xlane.f32.xlu1 %v2547_v46 }
 0xf96   :  { %v2528_v20 = vpop.xlane.xlu1 %2527 }
 0xf97   :  { %v2543_v23 = vmul.f32 1.442695, %v2533_v62  ;;  %v2534_v39 = vsub.f32 %v6389_v9, %v2528_v20 }
 0xf99   :  { %4937 = vpow2.f32 %v2543_v23  ;;  %v2545_v21 = vmul.f32 1.442695, %v2534_v39 }
 0xf9b   :  { %v6486_v51 = vpop.eup %4933  ;;  %4939 = vpow2.f32 %v2545_v21 }
 0xf9c   :  { %v2553_v28 = vsel %vm112_vm1, %v6486_v51, 0.0  ;;  %v2744_v9 = vpop.xlane.xlu0 %2743 }
 0xf9d   :  { %v6491_v34 = vpop.eup %4935  ;;  %2554 = vadd.xlane.f32.xlu1 %v2553_v28  ;;  %v2760_v45 = vsub.f32 %v6396_v30, %v2744_v9 }
 0xf9e   :  { %v2747_v52 = vpop.xlane.xlu1 %2746  ;;  %v2556_v48 = vsel %vm112_vm1, %v6491_v34, 0.0 }
 0xf9f   :  { %v2761_v58 = vsub.f32 %v6399_v33, %v2747_v52  ;;  %v2766_v17 = vmul.f32 1.442695, %v2760_v45 }
 0xfa1   :  { %v2768_v43 = vmul.f32 1.442695, %v2761_v58  ;;  %2557 = vadd.xlane.f32.xlu1 %v2556_v48 }
 0xfa3   :  { %v6497_v61 = vpop.eup %4937  ;;  %4941 = vpow2.f32 %v2768_v43 }
 0xfa4   :  { %4943 = vpow2.f32 %v2308_v14  ;;  %v2750_v42 = vpop.xlane.xlu0 %2749  ;;  %v2559_v33 = vsel %vm112_vm1, %v6497_v61, 0.0 }
 0xfa5   :  { %v6502_v63 = vpop.eup %4939  ;;  %v2762_v59 = vsub.f32 %v6406_v50, %v2750_v42  ;;  %2560 = vadd.xlane.f32.xlu1 %v2559_v33  ;;  %4945 = vpow2.f32 %v2312_v38 }
 0xfa6   :  { %v2753_v18 = vpop.xlane.xlu1 %2752  ;;  %v2562_v0 = vsel %vm112_vm1, %v6502_v63, 0.0 }
 0xfa7   :  { %v2770_v7 = vmul.f32 1.442695, %v2762_v59  ;;  %v2763_v40 = vsub.f32 %v6409_v49, %v2753_v18 }
 0xfa9   :  { %4947 = vpow2.f32 %v2770_v7  ;;  %v2772_v27 = vmul.f32 1.442695, %v2763_v40  ;;  %2563 = vadd.xlane.f32.xlu1 %v2562_v0 }
 0xfab   :  { %4949 = vpow2.f32 %v2772_v27 }
 0xfac   :  { %4951 = vpow2.f32 %v2537_v3  ;;  %v2756_v25 = vpop.xlane.xlu0 %2755 }
 0xfad   :  { %v6509_v50 = vpop.eup %4941  ;;  %v2764_v46 = vsub.f32 %v6416_v16, %v2756_v25  ;;  %4953 = vpow2.f32 %v2766_v17 }
 0xfae   :  { %v6512_v62 = vpop.eup %4943  ;;  %v2759_v49 = vpop.xlane.xlu1 %2758  ;;  %v2781_v30 = vsel %vm112_vm1, %v6509_v50, 0.0 }
 0xfaf   :  { %v2774_v20 = vmul.f32 1.442695, %v2764_v46  ;;  %v2765_v23 = vsub.f32 %v6419_v4, %v2759_v49  ;;  %2782 = vadd.xlane.f32.xlu1 %v2781_v30  ;;  %v2322_v21 = vsel %vm112_vm1, %v6512_v62, 0.0  ;;  %v6519_v53 = vpop.eup %4945 }
 0xfb0   :  { %v2328_v14 = vsel %vm112_vm1, %v6519_v53, 0.0 }
 0xfb1   :  { %4955 = vpow2.f32 %v2774_v20  ;;  %v2776_v39 = vmul.f32 1.442695, %v2765_v23 }
 0xfb2   :  { %2323 = vadd.xlane.f32.xlu0 %v2322_v21 }
 0xfb3   :  { %v6521_v16 = vpop.eup %4947  ;;  %4957 = vpow2.f32 %v2776_v39 }
 0xfb4   :  { %v2975_v28 = vpop.xlane.xlu0 %2974  ;;  %v2784_v52 = vsel %vm112_vm1, %v6521_v16, 0.0 }
 0xfb5   :  { %v6525_v58 = vpop.eup %4949  ;;  %v2991_v4 = vsub.f32 %v6426_v15, %v2975_v28  ;;  %2785 = vadd.xlane.f32.xlu1 %v2784_v52 }
 0xfb6   :  { %v6530_v54 = vpop.eup %4951  ;;  %v2978_v9 = vpop.xlane.xlu1 %2977  ;;  %2329 = vadd.xlane.f32.xlu0 %v2328_v14  ;;  %v2787_v38 = vsel %vm112_vm1, %v6525_v58, 0.0 }
 0xfb7   :  { %v2997_v48 = vmul.f32 1.442695, %v2991_v4  ;;  %v2992_v43 = vsub.f32 %v6429_v60, %v2978_v9  ;;  %v2550_v15 = vsel %vm112_vm1, %v6530_v54, 0.0  ;;  %v6537_v42 = vpop.eup %4953 }
 0xfb8   :  { %v2778_v60 = vsel %vm112_vm1, %v6537_v42, 0.0 }
 0xfb9   :  { %4959 = vpow2.f32 %v2997_v48  ;;  %v2999_v5 = vmul.f32 1.442695, %v2992_v43  ;;  %2788 = vadd.xlane.f32.xlu1 %v2787_v38 }
 0xfba   :  { %2551 = vadd.xlane.f32.xlu0 %v2550_v15 }
 0xfbb   :  { %v6539_v33 = vpop.eup %4955  ;;  %4961 = vpow2.f32 %v2999_v5 }
 0xfbc   :  { %v2790_v59 = vsel %vm112_vm1, %v6539_v33, 0.0  ;;  %v2981_v27 = vpop.xlane.xlu0 %2980 }
 0xfbd   :  { %2791 = vadd.xlane.f32.xlu1 %v2790_v59  ;;  %v6545_v18 = vpop.eup %4957  ;;  %v2993_v25 = vsub.f32 %v6436_v2, %v2981_v27 }
 0xfbe   :  { %2779 = vadd.xlane.f32.xlu0 %v2778_v60  ;;  %v2793_v7 = vsel %vm112_vm1, %v6545_v18, 0.0  ;;  %v2984_v17 = vpop.xlane.xlu1 %2983 }
 0xfbf   :  { %v2994_v46 = vsub.f32 %v6439_v56, %v2984_v17  ;;  %v3001_v49 = vmul.f32 1.442695, %v2993_v25 }
 0xfc1   :  { %v3003_v30 = vmul.f32 1.442695, %v2994_v46  ;;  %4963 = vpow2.f32 %v3001_v49 }
 0xfc2   :  { %2794 = vadd.xlane.f32.xlu0 %v2793_v7  ;;  %v6579_v39 = vpop.permute.xlu1 %2811 }
 0xfc3   :  { %v6549_v40 = vpop.eup %4959  ;;  %4965 = vpow2.f32 %v3003_v30 }
 0xfc4   :  { %v3009_v3 = vsel %vm112_vm1, %v6549_v40, 0.0 }
 0xfc5   :  { %v6553_v45 = vpop.eup %4961  ;;  %3010 = vadd.xlane.f32.xlu1 %v3009_v3 }
 0xfc6   :  { %v3012_v0 = vsel %vm112_vm1, %v6553_v45, 0.0  ;;  %v6581_v21 = vpop.permute.xlu1 %2813 }
 0xfc7   :  { %3013 = vadd.xlane.f32.xlu0 %v3012_v0 }
 0xfcb   :  { %v6565_v20 = vpop.eup %4963 }
 0xfcd   :  { %v6567_v23 = vpop.eup %4965 }
 0xfce   :  { %v3018_v2 = vsel %vm112_vm1, %v6567_v23, 0.0 }
 0xfd6   :  { %3042 = vrot.lane.b32.xlu1 %v6179_v19, %s6961_s6  ;;  %v6571_v19 = vadd.f32 %v6348_v44, %v6445_v55 }
 0xfd8   :  { %v2985_v56 = vsel %vm112_vm1, %v6571_v19, -inf }
 0xfda   :  { %3044 = vrot.lane.b32.xlu1 %v6183_v47, %s6961_s6  ;;  %v3015_v47 = vsel %vm112_vm1, %v6565_v20, 0.0 }
 0xfdd   :  { %2815 = vrot.lane.b32.xlu0 %v6191_v24, %s6960_s3 }
 0xffc   :  { %3016 = vadd.xlane.f32.xlu0 %v3015_v47 }
 0xffe   :  { %3019 = vadd.xlane.f32.xlu1 %v3018_v2 }
0x1000   :  { %2986 = vmax.xlane.f32.xlu0 %v2985_v56 }
0x100a   :  { %v2318_v28 = vpop.xlane.xlu0 %2317 }
0x100b   :  { %4967 = vrcp.f32 %v2318_v28 }
0x100c   :  { %v2321_v44 = vpop.xlane.xlu1 %2320 }
0x100d   :  { %4969 = vrcp.f32 %v2321_v44 }
0x100f   :  { %3046 = vrot.lane.b32.xlu1 %v6191_v24, %s6961_s6  ;;  %v2585_v24 = vpop.permute.xlu0 %2584 }
0x1015   :  { %v4968_v55 = vpop.eup %4967 }
0x1016   :  { %v2340_v4 = vmul.f32 %v4968_v55, %v6458_v35  ;;  %v6597_v35 = vadd.f32 %v6356_v6, %v6447_v29 }
0x1017   :  { %v4970_v52 = vpop.eup %4969 }
0x1018   :  { %v2341_v14 = vmul.f32 %v4970_v52, %v6462_v26  ;;  %v2327_v26 = vpop.xlane.xlu1 %2326 }
0x1019   :  { %4971 = vrcp.f32 %v2327_v26 }
0x101a   :  { %v2346_v9 = vpack.c.bf16 %v2341_v14, %v2340_v4 }
0x101c   :  { %4440 = vmatmul.mubr.msk.bf16.vlgmr.msra.gmra.mrb[92].mxu1 %vm112_vm1, %v2346_v9  ;;  %v2333_v48 = vpop.xlane.xlu1 %2332 }
0x101d   :  { %4470 = vmatpush3.bf16.msra.mxu1 %v6453_v37  ;;  %4443 = vmatprep.mubr.msk.bf16.mxu1 %vm5088_vm0, %v5087_v1  ;;  %v2988_v37 = vsel %vm112_vm1, %v6597_v35, -inf }
0x101e   :  { %4471 = vmatprep.subr.bf16.mxu1 %v5087_v1 }
0x1021   :  { %4472 = vmatpush3.bf16.msra.mxu1 %v6262_v41 }
0x1022   :  { %4473 = vmatprep.subr.bf16.mxu1 %v5087_v1  ;;  %v2549_v41 = vpop.xlane.xlu1 %2548 }
0x1023   :  { %v4972_v15 = vpop.eup %4971 }
0x1024   :  { %v2343_v29 = vmul.f32 %v4972_v15, %v6467_v11 }
0x1025   :  { %4474 = vmatpush3.bf16.msra.mxu1 %v2585_v24 }
0x1026   :  { %4505 = vmatprep.subr.bf16.mxu1 %v5087_v1 }
0x102a   :  { %v2555_v5 = vpop.xlane.xlu1 %2554 }
0x102e   :  { %v2558_v7 = vpop.xlane.xlu1 %2557 }
0x1032   :  { %v2561_v17 = vpop.xlane.xlu1 %2560 }
0x1033   :  { %2989 = vmax.xlane.f32.xlu1 %v2988_v37 }
0x1036   :  { %v2564_v11 = vpop.xlane.xlu1 %2563 }
0x103c   :  { %v2783_v28 = vpop.xlane.xlu1 %2782 }
0x103f   :  { %v2324_v43 = vpop.xlane.xlu0 %2323 }
0x1040   :  { %4973 = vrcp.f32 %v2324_v43 }
0x1042   :  { %v2786_v55 = vpop.xlane.xlu1 %2785 }
0x1043   :  { %v2330_v38 = vpop.xlane.xlu0 %2329 }
0x1044   :  { %4975 = vrcp.f32 %v2330_v38 }
0x1045   :  { %4977 = vrcp.f32 %v2333_v48 }
0x1046   :  { %v2789_v14 = vpop.xlane.xlu1 %2788 }
0x1047   :  { %v2552_v59 = vpop.xlane.xlu0 %2551 }
0x1048   :  { %4979 = vrcp.f32 %v2552_v59 }
0x1049   :  { %4981 = vrcp.f32 %v2549_v41 }
0x104a   :  { %v4974_v60 = vpop.eup %4973  ;;  %4983 = vrcp.f32 %v2558_v7 }
0x104b   :  { %v2342_v6 = vmul.f32 %v4974_v60, %v6512_v62  ;;  %v2780_v49 = vpop.xlane.xlu0 %2779  ;;  %4985 = vrcp.f32 %v2555_v5 }
0x104c   :  { %4987 = vrcp.f32 %v2564_v11 }
0x104d   :  { %v2347_v3 = vpack.c.bf16 %v2343_v29, %v2342_v6  ;;  %4989 = vrcp.f32 %v2561_v17 }
0x104e   :  { %v4976_v0 = vpop.eup %4975  ;;  %4991 = vrcp.f32 %v2780_v49 }
0x104f   :  { %4444 = vmatmul.mubr.msk.bf16.gmra.mrb[96].mxu1 %vm112_vm1, %v2347_v3  ;;  %v4978_v27 = vpop.eup %4977  ;;  %v2344_v25 = vmul.f32 %v4976_v0, %v6519_v53  ;;  %v2795_v53 = vpop.xlane.xlu0 %2794  ;;  %4993 = vrcp.f32 %v2783_v28 }
0x1050   :  { %4447 = vmatprep.mubr.msk.bf16.mxu1 %vm5088_vm0, %v5087_v1  ;;  %v2345_v46 = vmul.f32 %v4978_v27, %v6472_v57  ;;  %4995 = vrcp.f32 %v2789_v14 }
0x1051   :  { %4997 = vrcp.f32 %v2786_v55 }
0x1052   :  { %v2348_v62 = vpack.c.bf16 %v2345_v46, %v2344_v25  ;;  %v4980_v30 = vpop.eup %4979  ;;  %4999 = vrcp.f32 %v2795_v53 }
0x1053   :  { %v4982_v47 = vpop.eup %4981  ;;  %v2572_v2 = vmul.f32 %v4980_v30, %v6530_v54 }
0x1054   :  { %v2571_v56 = vmul.f32 %v4982_v47, %v6478_v8  ;;  %v4984_v44 = vpop.eup %4983  ;;  %v3014_v4 = vpop.xlane.xlu0 %3013 }
0x1055   :  { %v4986_v52 = vpop.eup %4985  ;;  %v2574_v8 = vmul.f32 %v4984_v44, %v6491_v34 }
0x1056   :  { %v2577_v57 = vpack.c.bf16 %v2572_v2, %v2571_v56  ;;  %v2573_v54 = vmul.f32 %v4986_v52, %v6486_v51  ;;  %v4988_v24 = vpop.eup %4987  ;;  %v2792_v51 = vpop.xlane.xlu1 %2791 }
0x1057   :  { %4448 = vmatmul.mubr.msk.bf16.gmra.mrb[100].mxu1 %vm112_vm1, %v2348_v62  ;;  %v4990_v37 = vpop.eup %4989  ;;  %v2576_v34 = vmul.f32 %v4988_v24, %v6502_v63  ;;  %5001 = vrcp.f32 %v2792_v51 }
0x1058   :  { %4475 = vmatprep.mubr.msk.bf16.mxu1 %vm5088_vm0, %v5087_v1  ;;  %v2578_v9 = vpack.c.bf16 %v2574_v8, %v2573_v54  ;;  %v4992_v48 = vpop.eup %4991  ;;  %5003 = vrcp.f32 %v3014_v4 }
0x1059   :  { %v4994_v41 = vpop.eup %4993  ;;  %v2802_v38 = vmul.f32 %v4992_v48, %v6537_v42 }
0x105a   :  { %v3011_v43 = vpop.xlane.xlu1 %3010  ;;  %v2803_v63 = vmul.f32 %v4994_v41, %v6509_v50  ;;  %v4996_v59 = vpop.eup %4995 }
0x105b   :  { %v2805_v60 = vmul.f32 %v4996_v59, %v6525_v58  ;;  %5005 = vrcp.f32 %v3011_v43 }
0x105c   :  { %v2808_v5 = vpack.c.bf16 %v2803_v63, %v2802_v38 }
0x105e   :  { %v3043_v15 = vpop.permute.xlu1 %3042 }
0x105f   :  { %4476 = vmatmul.mubr.msk.bf16.vlgmr.msra.gmra.mrb[104].mxu1 %vm112_vm1, %v2577_v57 }
0x1060   :  { %4506 = vmatpush3.bf16.msra.mxu1 %v6579_v39  ;;  %4479 = vmatprep.mubr.msk.bf16.mxu1 %vm5088_vm0, %v5087_v1  ;;  %v2816_v39 = vpop.permute.xlu0 %2815 }
0x1061   :  { %4507 = vmatprep.subr.bf16.mxu1 %v5087_v1 }
0x1062   :  { %v3045_v7 = vpop.permute.xlu1 %3044 }
0x1064   :  { %4508 = vmatpush3.bf16.msra.mxu1 %v6581_v21  ;;  %v2575_v21 = vmul.f32 %v4990_v37, %v6497_v61  ;;  %v4998_v61 = vpop.eup %4997 }
0x1065   :  { %4509 = vmatprep.subr.bf16.mxu1 %v5087_v1  ;;  %v2804_v42 = vmul.f32 %v4998_v61, %v6521_v16  ;;  %v5000_v6 = vpop.eup %4999 }
0x1066   :  { %v2579_v26 = vpack.c.bf16 %v2576_v34, %v2575_v21  ;;  %v5002_v29 = vpop.eup %5001  ;;  %v2807_v3 = vmul.f32 %v5000_v6, %v6545_v18 }
0x1067   :  { %4480 = vmatmul.mubr.msk.bf16.gmra.mrb[108].mxu1 %vm112_vm1, %v2578_v9  ;;  %v2809_v50 = vpack.c.bf16 %v2805_v60, %v2804_v42  ;;  %v2806_v58 = vmul.f32 %v5002_v29, %v6539_v33  ;;  %v5004_v27 = vpop.eup %5003 }
0x1068   :  { %4510 = vmatpush3.bf16.msra.mxu1 %v2816_v39  ;;  %4483 = vmatprep.mubr.msk.bf16.mxu1 %vm5088_vm0, %v5087_v1  ;;  %v5006_v25 = vpop.eup %5005  ;;  %v3034_v46 = vmul.f32 %v5004_v27, %v6553_v45 }
0x1069   :  { %4541 = vmatprep.subr.bf16.mxu1 %v5087_v1  ;;  %v2810_v0 = vpack.c.bf16 %v2807_v3, %v2806_v58  ;;  %v3033_v62 = vmul.f32 %v5006_v25, %v6549_v40  ;;  %v4755_v3 = vld [vmem:[%s6927_s8 + $0x10] sm:$0xff]  }
0x106a   :  { %4560 = vmatpush3.bf16.msra.mxu0 %v4755_v3 }
0x106b   :  { %v3039_v11 = vpack.c.bf16 %v3034_v46, %v3033_v62  ;;  %4561 = vmatprep.subr.bf16.mxu0 %v5087_v1 }
0x106f   :  { %4484 = vmatmul.mubr.msk.bf16.gmra.mrb[112].mxu1 %vm112_vm1, %v2579_v26 }
0x1070   :  { %4511 = vmatprep.mubr.msk.bf16.mxu1 %vm5088_vm0, %v5087_v1 }
0x1077   :  { %4512 = vmatmul.mubr.msk.bf16.vlgmr.msra.gmra.mrb[116].mxu1 %vm112_vm1, %v2808_v5 }
0x1078   :  { %4542 = vmatpush3.bf16.msra.mxu1 %v3043_v15  ;;  %4515 = vmatprep.mubr.msk.bf16.mxu1 %vm5088_vm0, %v5087_v1 }
0x1079   :  { %4543 = vmatprep.subr.bf16.mxu1 %v5087_v1 }
0x107c   :  { %4544 = vmatpush3.bf16.msra.mxu1 %v3045_v7 }
0x107d   :  { %4545 = vmatprep.subr.bf16.mxu1 %v5087_v1 }
0x107f   :  { %4516 = vmatmul.mubr.msk.bf16.gmra.mrb[120].mxu1 %vm112_vm1, %v2809_v50 }
0x1080   :  { %4519 = vmatprep.mubr.msk.bf16.mxu1 %vm5088_vm0, %v5087_v1 }
0x1087   :  { %4520 = vmatmul.mubr.msk.bf16.gmra.mrb[124].mxu1 %vm112_vm1, %v2810_v0 }
0x1088   :  { %4547 = vmatprep.mubr.msk.bf16.mxu1 %vm5088_vm0, %v5087_v1 }
0x1089   :  { %v3017_v16 = vpop.xlane.xlu0 %3016 }
0x108a   :  { %5007 = vrcp.f32 %v3017_v16  ;;  %v4756_v16 = vld [vmem:[%s6927_s8 + $0x18] sm:$0xff]   ;;  %s6964_s8 = smov 24  }
0x108b   :  { %v3020_v17 = vpop.xlane.xlu1 %3019  ;;  %4562 = vmatpush3.bf16.msra.mxu0 %v4756_v16 }
0x108c   :  { %5009 = vrcp.f32 %v3020_v17  ;;  %4591 = vmatprep.subr.bf16.mxu0 %v5087_v1 }
0x108d   :  { %v2987_v49 = vpop.xlane.xlu0 %2986 }
0x108e   :  { %v2995_v18 = vsub.f32 %v6571_v19, %v2987_v49 }
0x108f   :  { %v3047_v33 = vpop.permute.xlu1 %3046 }
0x1090   :  { %v3005_v30 = vmul.f32 1.442695, %v2995_v18  ;;  %4546 = vmatpush3.bf16.msra.mxu1 %v3047_v33 }
0x1091   :  { %4575 = vmatprep.subr.bf16.mxu1 %v5087_v1 }
0x1092   :  { %5011 = vpow2.f32 %v3005_v30 }
0x1093   :  { %4548 = vmatmul.mubr.msk.bf16.vlgmr.msra.gmra.mrb[128].mxu1 %vm112_vm1, %v3039_v11 }
0x1094   :  { %v5008_v47 = vpop.eup %5007  ;;  %4551 = vmatprep.mubr.msk.bf16.mxu1 %vm5088_vm0, %v5087_v1 }
0x1095   :  { %v3035_v45 = vmul.f32 %v5008_v47, %v6565_v20 }
0x1096   :  { %v5010_v2 = vpop.eup %5009 }
0x1097   :  { %v3036_v19 = vmul.f32 %v5010_v2, %v6567_v23 }
0x1099   :  { %v3040_v56 = vpack.c.bf16 %v3036_v19, %v3035_v45 }
0x109b   :  { %4552 = vmatmul.mubr.msk.bf16.gmra.mrb[132].mxu1 %vm112_vm1, %v3040_v56 }
0x109c   :  { %v6658_v40 = vpop.eup %5011  ;;  %4555 = vmatprep.mubr.msk.bf16.mxu1 %vm5088_vm0, %v5087_v1 }
0x109d   :  { %v3021_v28 = vsel %vm112_vm1, %v6658_v40, 0.0 }
0x109e   :  { %3022 = vadd.xlane.f32.xlu0 %v3021_v28 }
0x10c0   :  { %v2990_v53 = vpop.xlane.xlu1 %2989 }
0x10c1   :  { %v2996_v57 = vsub.f32 %v6597_v35, %v2990_v53 }
0x10c3   :  { %v3007_v44 = vmul.f32 1.442695, %v2996_v57 }
0x10c5   :  { %5013 = vpow2.f32 %v3007_v44 }
0x10cf   :  { %v6665_v20 = vpop.eup %5013 }
0x10d0   :  { %v3024_v23 = vsel %vm112_vm1, %v6665_v20, 0.0 }
0x10d1   :  { %3025 = vadd.xlane.f32.xlu0 %v3024_v23 }
0x10ef   :  { %v6669_v55 = vpop.f32.mrb[92].mxu1 }
0x10f0   :  { %v4441_v52 = vpop.f32.mrb[93].mxu1 }
0x10f1   :  { %v6671_v4 = vpop.f32.mrb[94].mxu1 }
0x10f2   :  { %v4442_v8 = vpop.f32.mrb[95].mxu1 }
0x1122   :  { %v6673_v54 = vpop.f32.mrb[96].mxu1 }
0x1123   :  { %v4445_v14 = vpop.f32.mrb[97].mxu1 }
0x1124   :  { %v6675_v9 = vpop.f32.mrb[98].mxu1 }
0x1125   :  { %v4446_v35 = vpop.f32.mrb[99].mxu1 }
0x112a   :  { %v6677_v24 = vpop.f32.mrb[100].mxu1 }
0x112b   :  { %v4449_v39 = vpop.f32.mrb[101].mxu1  ;;  %v3023_v18 = vpop.xlane.xlu0 %3022 }
0x112c   :  { %v6679_v37 = vpop.f32.mrb[102].mxu1  ;;  %5015 = vrcp.f32 %v3023_v18 }
0x112d   :  { %v4450_v34 = vpop.f32.mrb[103].mxu1 }
0x1132   :  { %v2632_v51 = vpop.f32.mrb[104].mxu1 }
0x1133   :  { %v4477_v21 = vpop.f32.mrb[105].mxu1 }
0x1134   :  { %v2635_v26 = vpop.f32.mrb[106].mxu1 }
0x1135   :  { %v4688_v48 = vpack.i.bf16 %v2635_v26, %v2632_v51  ;;  %v4478_v43 = vpop.f32.mrb[107].mxu1 }
0x1136   :  { %v5016_v19 = vpop.eup %5015 }
0x1137   :  { %4689 = vrot.lane.b32.xlu0 %v4688_v48, %s6962_s29  ;;  %v3037_v23 = vmul.f32 %v5016_v19, %v6658_v40 }
0x113a   :  { %v2640_v41 = vpop.f32.mrb[108].mxu1 }
0x113b   :  { %v4481_v38 = vpop.f32.mrb[109].mxu1 }
0x113c   :  { %v2643_v63 = vpop.f32.mrb[110].mxu1 }
0x113d   :  { %v4703_v5 = vpack.i.bf16 %v2643_v63, %v2640_v41  ;;  %v4482_v15 = vpop.f32.mrb[111].mxu1 }
0x1142   :  { %v2648_v59 = vpop.f32.mrb[112].mxu1 }
0x1143   :  { %v4485_v61 = vpop.f32.mrb[113].mxu1 }
0x1144   :  { %v2651_v60 = vpop.f32.mrb[114].mxu1 }
0x1145   :  { %v4718_v7 = vpack.i.bf16 %v2651_v60, %v2648_v59  ;;  %v4486_v42 = vpop.f32.mrb[115].mxu1 }
0x114a   :  { %v2863_v50 = vpop.f32.mrb[116].mxu1 }
0x114b   :  { %v4513_v6 = vpop.f32.mrb[117].mxu1 }
0x114c   :  { %v2866_v29 = vpop.f32.mrb[118].mxu1 }
0x114d   :  { %v4693_v58 = vpack.i.bf16 %v2866_v29, %v2863_v50  ;;  %v4514_v0 = vpop.f32.mrb[119].mxu1 }
0x114f   :  { %4694 = vrot.lane.b32.xlu0 %v4693_v58, %s6963_s7 }
0x1152   :  { %v2871_v27 = vpop.f32.mrb[120].mxu1 }
0x1153   :  { %v4517_v17 = vpop.f32.mrb[121].mxu1  ;;  %4704 = vrot.lane.b32.xlu0 %v4703_v5, %s6962_s29 }
0x1154   :  { %v2874_v25 = vpop.f32.mrb[122].mxu1 }
0x1155   :  { %v4708_v46 = vpack.i.bf16 %v2874_v25, %v2871_v27  ;;  %v4518_v49 = vpop.f32.mrb[123].mxu1 }
0x1157   :  { %4709 = vrot.lane.b32.xlu0 %v4708_v46, %s6963_s7 }
0x115a   :  { %v2879_v62 = vpop.f32.mrb[124].mxu1 }
0x115b   :  { %v4521_v33 = vpop.f32.mrb[125].mxu1 }
0x115c   :  { %v2882_v30 = vpop.f32.mrb[126].mxu1 }
0x115d   :  { %v4723_v11 = vpack.i.bf16 %v2882_v30, %v2879_v62  ;;  %v4522_v47 = vpop.f32.mrb[127].mxu1 }
0x115e   :  { %v3026_v2 = vpop.xlane.xlu0 %3025 }
0x115f   :  { %5017 = vrcp.f32 %v3026_v2 }
0x1166   :  { %v3094_v45 = vpop.f32.mrb[128].mxu1 }
0x1167   :  { %v4549_v56 = vpop.f32.mrb[129].mxu1 }
0x1168   :  { %v3097_v28 = vpop.f32.mrb[130].mxu1  ;;  %v6728_v56 = vld [vmem:[%s6928_s9 + $0x1] ss:$0 sm:$0xff] }
0x1169   :  { %v5018_v53 = vpop.eup %5017  ;;  %v4698_v57 = vpack.i.bf16 %v3097_v28, %v3094_v45  ;;  %v4550_v44 = vpop.f32.mrb[131].mxu1 }
0x116a   :  { %v3038_v52 = vmul.f32 %v5018_v53, %v6665_v20 }
0x116b   :  { %4699 = vrot.lane.b32.xlu1 %v4698_v57, %s6964_s8 }
0x116c   :  { %v3041_v8 = vpack.c.bf16 %v3038_v52, %v3037_v23 }
0x116e   :  { %v3102_v14 = vpop.f32.mrb[132].mxu1  ;;  %4556 = vmatmul.mubr.msk.bf16.gmra.mrb[136].mxu1 %vm112_vm1, %v3041_v8 }
0x116f   :  { %v4553_v35 = vpop.f32.mrb[133].mxu1  ;;  %4579 = vmatprep.mubr.msk.bf16.mxu1 %vm5088_vm0, %v5087_v1 }
0x1170   :  { %v3105_v39 = vpop.f32.mrb[134].mxu1 }
0x1171   :  { %v4713_v34 = vpack.i.bf16 %v3105_v39, %v3102_v14  ;;  %v4554_v51 = vpop.f32.mrb[135].mxu1 }
0x1173   :  { %4714 = vrot.lane.b32.xlu0 %v4713_v34, %s6964_s8 }
0x1177   :  { %4719 = vrot.lane.b32.xlu0 %v4718_v7, %s6962_s29 }
0x117b   :  { %4724 = vrot.lane.b32.xlu0 %v4723_v11, %s6963_s7 }
0x11a9   :  { %v4690_v40 = vpop.permute.xlu0 %4689 }
0x11aa   :  { %v4692_v21 = vunpack.i.h.bf16 %v4690_v40  ;;  %v4691_v26 = vunpack.i.l.bf16 %v4690_v40 }
0x11ac   :  { %v3190_v63 = vsel %vm395_vm3, %v6671_v4, %v4692_v21  ;;  %v3189_v5 = vsel %vm395_vm3, %v6669_v55, %v4691_v26 }
0x11c1   :  { %v4695_v20 = vpop.permute.xlu0 %4694 }
0x11c2   :  { %v4697_v43 = vunpack.i.h.bf16 %v4695_v20  ;;  %v4696_v41 = vunpack.i.l.bf16 %v4695_v20 }
0x11c4   :  { %v3195_v61 = vsel %vm1386_vm4, %v3189_v5, %v4696_v41  ;;  %v3196_v60 = vsel %vm1386_vm4, %v3190_v63, %v4697_v43 }
0x11c5   :  { %v4705_v48 = vpop.permute.xlu0 %4704 }
0x11c6   :  { %v4707_v29 = vunpack.i.h.bf16 %v4705_v48  ;;  %v4706_v3 = vunpack.i.l.bf16 %v4705_v48 }
0x11c8   :  { %v3192_v4 = vsel %vm395_vm3, %v6675_v9, %v4707_v29  ;;  %v3191_v16 = vsel %vm395_vm3, %v6673_v54, %v4706_v3 }
0x11c9   :  { %v4710_v7 = vpop.permute.xlu0 %4709 }
0x11ca   :  { %v4712_v58 = vunpack.i.h.bf16 %v4710_v7  ;;  %v4711_v0 = vunpack.i.l.bf16 %v4710_v7 }
0x11cc   :  { %v3197_v25 = vsel %vm1386_vm4, %v3191_v16, %v4711_v0  ;;  %v3198_v46 = vsel %vm1386_vm4, %v3192_v4, %v4712_v58 }
0x11dd   :  { %v4700_v38 = vpop.permute.xlu1 %4699 }
0x11de   :  { %v4702_v15 = vunpack.i.h.bf16 %v4700_v38  ;;  %v4701_v59 = vunpack.i.l.bf16 %v4700_v38 }
0x11e0   :  { %v3202_v42 = vsel %vm1393_vm5, %v3196_v60, %v4702_v15  ;;  %v3201_v50 = vsel %vm1393_vm5, %v3195_v61, %v4701_v59 }
0x11e1   :  { %v3207_v6 = vpack.c.bf16 %v3202_v42, %v3201_v50 }
0x11e3   :  { %4564 = vmatmul.mubr.msk.bf16.vlgmr.msra.gmra.mrb[124].mxu0 %vm187_vm2, %v3207_v6 }
0x11e4   :  { %4567 = vmatprep.mubr.msk.bf16.mxu0 %vm5088_vm0, %v5087_v1 }
0x11e5   :  { %v4715_v55 = vpop.permute.xlu0 %4714 }
0x11e6   :  { %v4717_v27 = vunpack.i.h.bf16 %v4715_v55  ;;  %v4716_v17 = vunpack.i.l.bf16 %v4715_v55 }
0x11e8   :  { %v3203_v49 = vsel %vm1393_vm5, %v3197_v25, %v4716_v17  ;;  %v3204_v18 = vsel %vm1393_vm5, %v3198_v46, %v4717_v27 }
0x11e9   :  { %v3208_v62 = vpack.c.bf16 %v3204_v18, %v3203_v49  ;;  %v4720_v47 = vpop.permute.xlu0 %4719 }
0x11ea   :  { %v4722_v45 = vunpack.i.h.bf16 %v4720_v47  ;;  %v4721_v19 = vunpack.i.l.bf16 %v4720_v47 }
0x11eb   :  { %4568 = vmatmul.mubr.msk.bf16.gmra.mrb[128].mxu0 %vm187_vm2, %v3208_v62 }
0x11ec   :  { %4571 = vmatprep.mubr.msk.bf16.mxu0 %vm5088_vm0, %v5087_v1  ;;  %v3194_v52 = vsel %vm395_vm3, %v6679_v37, %v4722_v45  ;;  %v3193_v8 = vsel %vm395_vm3, %v6677_v24, %v4721_v19  ;;  %vm3807_vm3 = vcmask 254976  }
0x11ed   :  { %v4725_v2 = vpop.permute.xlu0 %4724 }
0x11ee   :  { %v4727_v28 = vunpack.i.h.bf16 %v4725_v2  ;;  %v4726_v53 = vunpack.i.l.bf16 %v4725_v2 }
0x11f0   :  { %v3199_v21 = vsel %vm1386_vm4, %v3193_v8, %v4726_v53  ;;  %v3200_v26 = vsel %vm1386_vm4, %v3194_v52, %v4727_v28 }
0x1241   :  { %v3110_v9 = vpop.f32.mrb[136].mxu1 }
0x1242   :  { %v4557_v33 = vpop.f32.mrb[137].mxu1 }
0x1243   :  { %v3113_v30 = vpop.f32.mrb[138].mxu1 }
0x1244   :  { %v4728_v54 = vpack.i.bf16 %v3113_v30, %v3110_v9  ;;  %v4558_v11 = vpop.f32.mrb[139].mxu1  ;;  %v4757_v30 = vld [vmem:[%s6931_s12 + $0x10] sm:$0xff]  }
0x1245   :  { %4576 = vmatpush3.bf16.msra.mxu1 %v4757_v30  ;;  %v4765_v30 = vld [vmem:[%s6933_s14 + $0x70] sm:$0xff]  }
0x1246   :  { %4729 = vrot.lane.b32.xlu1 %v4728_v54, %s6964_s8  ;;  %4577 = vmatprep.subr.bf16.mxu1 %v5087_v1  ;;  %v4758_v54 = vld [vmem:[%s6931_s12 + $0x18] sm:$0xff]   ;;  %s5104_s12 = smov [#allocation2]  }
0x1247   :  { %s3842_s24 = sshll.u32 %s5104_s12, 4  ;;  %s3843_s24 = int_to_ptr.vmem [resolvable:$true] %s3842_s24 }
0x1248   :  { %s5063_s25 = scalar_lea.vmem %s3843_s24, 32  ;;  %p5068_p1 = scmp.lt.s32.totalorder %s3843_s24, %s3843_s24 }
0x1249   :  { %4578 = vmatpush3.bf16.msra.mxu1 %v4758_v54  ;;  %v4766_v54 = vld [vmem:[%s6933_s14 + $0x78] sm:$0xff]   ;;  %p5064_p0 = scmp.ne.s32.totalorder %s3843_s24, %s5063_s25  ;;  %p5069_p2 = scmp.lt.s32.totalorder %s5063_s25, %s5063_s25 }
0x124b   :  { %p5070_p3 = por %p5069_p2, %p5068_p1 }
0x124d   :  { %p5071_p4 = pnand %p5070_p3, %p5064_p0 }
0x12b6   :  { %v3278_v57 = vpop.f32.mrb[124].mxu0 }
0x12b7   :  { %v3279_v44 = vadd.f32 %v6728_v56, %v3278_v57  ;;  %v4565_v23 = vpop.f32.mrb[125].mxu0 }
0x12b8   :  { %v4730_v14 = vpop.permute.xlu1 %4729  ;;  %v3281_v35 = vpop.f32.mrb[126].mxu0 }
0x12b9   :  { %v6736_v39 = vadd.f32 %v3279_v44, %v6097_v12  ;;  %v4732_v34 = vunpack.i.h.bf16 %v4730_v14  ;;  %v4731_v51 = vunpack.i.l.bf16 %v4730_v14  ;;  %v3282_v40 = vadd.f32 %v6728_v56, %v3281_v35  ;;  %v4566_v20 = vpop.f32.mrb[127].mxu0 }
0x12bb   :  { %v3206_v48 = vsel %vm1393_vm5, %v3200_v26, %v4732_v34  ;;  %v3205_v37 = vsel %vm1393_vm5, %v3199_v21, %v4731_v51  ;;  %v3302_v24 = vadd.f32 %v3282_v40, %v6100_v22  ;;  %v3311_v43 = vsel %vm187_vm2, %v6736_v39, 0.0  ;;  %v6781_v26 = vld [vmem:[%s6929_s10 + $0x1] ss:$0 sm:$0xff] }
0x12bc   :  { %v3209_v12 = vpack.c.bf16 %v3206_v48, %v3205_v37  ;;  %3312 = vadd.xlane.f32.xlu0 %v3311_v43 }
0x12bd   :  { %v3314_v41 = vsel %vm187_vm2, %v3302_v24, 0.0 }
0x12be   :  { %4572 = vmatmul.mubr.msk.bf16.gmra.mrb[132].mxu0 %vm187_vm2, %v3209_v12  ;;  %3315 = vadd.xlane.f32.xlu1 %v3314_v41  ;;  %v3286_v38 = vpop.f32.mrb[128].mxu0  ;;  %v6787_v41 = vld [vmem:[%s6930_s11 + $0x1] ss:$0 sm:$0xff] }
0x12bf   :  { %v3287_v63 = vadd.f32 %v6728_v56, %v3286_v38  ;;  %v4569_v5 = vpop.f32.mrb[129].mxu0  ;;  %4607 = vmatprep.mubr.msk.bf16.mxu0 %vm5088_vm0, %v5087_v1 }
0x12c0   :  { %v3289_v15 = vpop.f32.mrb[130].mxu0 }
0x12c1   :  { %v3303_v22 = vadd.f32 %v3287_v63, %v6107_v31  ;;  %v3290_v59 = vadd.f32 %v6728_v56, %v3289_v15  ;;  %v4570_v61 = vpop.f32.mrb[131].mxu0 }
0x12c3   :  { %v6754_v60 = vadd.f32 %v3290_v59, %v6110_v36  ;;  %v3317_v7 = vsel %vm187_vm2, %v3303_v22, 0.0 }
0x12c4   :  { %3318 = vadd.xlane.f32.xlu0 %v3317_v7 }
0x12c5   :  { %v3320_v42 = vsel %vm187_vm2, %v6754_v60, 0.0 }
0x12c8   :  { %3321 = vadd.xlane.f32.xlu0 %v3320_v42 }
0x1349   :  { %v3313_v50 = vpop.xlane.xlu0 %3312 }
0x134a   :  { %v3329_v6 = vmul.f32 0.03125, %v3313_v50 }
0x134b   :  { %v3316_v29 = vpop.xlane.xlu1 %3315 }
0x134c   :  { %v3335_v3 = vsub.f32 %v6736_v39, %v3329_v6  ;;  %v3330_v58 = vmul.f32 0.03125, %v3316_v29 }
0x134e   :  { %v3336_v31 = vsub.f32 %v3302_v24, %v3330_v58  ;;  %v3341_v0 = vmul.f32 %v3335_v3, %v3335_v3 }
0x1350   :  { %v3347_v55 = vsel %vm187_vm2, %v3341_v0, 0.0  ;;  %v3342_v4 = vmul.f32 %v3336_v31, %v3336_v31 }
0x1351   :  { %3348 = vadd.xlane.f32.xlu1 %v3347_v55  ;;  %v3319_v36 = vpop.xlane.xlu0 %3318 }
0x1352   :  { %v3331_v16 = vmul.f32 0.03125, %v3319_v36  ;;  %v3350_v27 = vsel %vm187_vm2, %v3342_v4, 0.0 }
0x1353   :  { %3351 = vadd.xlane.f32.xlu0 %v3350_v27 }
0x1354   :  { %v3337_v17 = vsub.f32 %v3303_v22, %v3331_v16 }
0x1355   :  { %v3322_v25 = vpop.xlane.xlu0 %3321 }
0x1356   :  { %v3332_v46 = vmul.f32 0.03125, %v3322_v25  ;;  %v3343_v49 = vmul.f32 %v3337_v17, %v3337_v17 }
0x1358   :  { %v3338_v18 = vsub.f32 %v6754_v60, %v3332_v46  ;;  %v3353_v62 = vsel %vm187_vm2, %v3343_v49, 0.0  ;;  %v4759_v46 = vld [vmem:[%s6933_s14 + $0x40] sm:$0xff]   ;;  %v4760_v49 = vld [vmem:[%s6933_s14 + $0x48] sm:$0xff]  }
0x1359   :  { %3354 = vadd.xlane.f32.xlu1 %v3353_v62  ;;  %4592 = vmatpush3.bf16.msra.mxu0 %v4759_v46  ;;  %v4762_v62 = vld [vmem:[%s6933_s14 + $0x58] sm:$0xff]  }
0x135a   :  { %v3344_v9 = vmul.f32 %v3338_v18, %v3338_v18  ;;  %4593 = vmatprep.subr.bf16.mxu0 %v5087_v1 }
0x135c   :  { %v3356_v33 = vsel %vm187_vm2, %v3344_v9, 0.0  ;;  %v4763_v9 = vld [vmem:[%s6933_s14 + $0x60] sm:$0xff]  }
0x135d   :  { %3357 = vadd.xlane.f32.xlu0 %v3356_v33  ;;  %4594 = vmatpush3.bf16.msra.mxu0 %v4760_v49  ;;  %v4764_v33 = vld [vmem:[%s6933_s14 + $0x68] sm:$0xff]  }
0x135e   :  { %4595 = vmatprep.subr.bf16.mxu0 %v5087_v1 }
0x1391   :  { %v3294_v11 = vpop.f32.mrb[132].mxu0 }
0x1392   :  { %v3295_v47 = vadd.f32 %v6728_v56, %v3294_v11  ;;  %v4573_v2 = vpop.f32.mrb[133].mxu0 }
0x1393   :  { %v3297_v45 = vpop.f32.mrb[134].mxu0 }
0x1394   :  { %v3305_v19 = vadd.f32 %v3295_v47, %v6117_v10  ;;  %v3298_v28 = vadd.f32 %v6728_v56, %v3297_v45  ;;  %v4574_v53 = vpop.f32.mrb[135].mxu0 }
0x1396   :  { %v3306_v57 = vadd.f32 %v3298_v28, %v6120_v13  ;;  %v3323_v44 = vsel %vm187_vm2, %v3305_v19, 0.0 }
0x1397   :  { %3324 = vadd.xlane.f32.xlu1 %v3323_v44  ;;  %v6838_v44 = vld [vmem:[%s6932_s13 + $0x1] ss:$0 sm:$0xff] }
0x1398   :  { %v3326_v23 = vsel %vm187_vm2, %v3306_v57, 0.0 }
0x1399   :  { %3327 = vadd.xlane.f32.xlu0 %v3326_v23 }
0x13de   :  { %v3349_v52 = vpop.xlane.xlu1 %3348 }
0x13df   :  { %v3365_v8 = vmul.f32 0.03125, %v3349_v52 }
0x13e0   :  { %v3352_v14 = vpop.xlane.xlu0 %3351 }
0x13e1   :  { %v3371_v35 = vadd.f32 1e-06, %v3365_v8  ;;  %v3366_v34 = vmul.f32 0.03125, %v3352_v14 }
0x13e3   :  { %5019 = vrsqrt.f32 %v3371_v35  ;;  %v3372_v51 = vadd.f32 1e-06, %v3366_v34 }
0x13e5   :  { %5021 = vrsqrt.f32 %v3372_v51 }
0x13e6   :  { %v3355_v10 = vpop.xlane.xlu1 %3354 }
0x13e7   :  { %v3367_v40 = vmul.f32 0.03125, %v3355_v10 }
0x13e9   :  { %v3373_v56 = vadd.f32 1e-06, %v3367_v40 }
0x13ea   :  { %v3358_v20 = vpop.xlane.xlu0 %3357 }
0x13eb   :  { %5023 = vrsqrt.f32 %v3373_v56  ;;  %v3368_v13 = vmul.f32 0.03125, %v3358_v20 }
0x13ed   :  { %v5020_v21 = vpop.eup %5019  ;;  %v3374_v48 = vadd.f32 1e-06, %v3368_v13 }
0x13ee   :  { %v3383_v37 = vmul.f32 %v5020_v21, %v3335_v3 }
0x13ef   :  { %v5022_v24 = vpop.eup %5021  ;;  %5025 = vrsqrt.f32 %v3374_v48 }
0x13f0   :  { %v3395_v43 = vmul.f32 %v6781_v26, %v3383_v37  ;;  %v3384_v12 = vmul.f32 %v5022_v24, %v3336_v31 }
0x13f2   :  { %v3396_v38 = vmul.f32 %v6781_v26, %v3384_v12  ;;  %v3407_v63 = vadd.f32 %v6787_v41, %v3395_v43 }
0x13f4   :  { %v3408_v5 = vadd.f32 %v6787_v41, %v3396_v38 }
0x13f5   :  { %v5024_v15 = vpop.eup %5023 }
0x13f6   :  { %v3385_v22 = vmul.f32 %v5024_v15, %v3337_v17  ;;  %v3420_v59 = vpack.c.bf16 %v3408_v5, %v3407_v63 }
0x13f8   :  { %4580 = vmatmul.mubr.msk.bf16.vlgmr.msra.gmra.mrb[140].mxu1 %vm187_vm2, %v3420_v59  ;;  %v3397_v42 = vmul.f32 %v6781_v26, %v3385_v22 }
0x13f9   :  { %v5026_v61 = vpop.eup %5025  ;;  %4583 = vmatprep.mubr.msk.bf16.mxu1 %vm5088_vm0, %v5087_v1 }
0x13fa   :  { %v3386_v7 = vmul.f32 %v5026_v61, %v3338_v18  ;;  %v3409_v6 = vadd.f32 %v6787_v41, %v3397_v42  ;;  %v4761_v18 = vld [vmem:[%s6933_s14 + $0x50] sm:$0xff]  }
0x13fb   :  { %4596 = vmatpush3.bf16.msra.mxu0 %v4761_v18 }
0x13fc   :  { %v3398_v50 = vmul.f32 %v6781_v26, %v3386_v7  ;;  %4597 = vmatprep.subr.bf16.mxu0 %v5087_v1 }
0x13fe   :  { %v3410_v29 = vadd.f32 %v6787_v41, %v3398_v50 }
0x13ff   :  { %4598 = vmatpush3.bf16.msra.mxu0 %v4762_v62 }
0x1400   :  { %v3421_v3 = vpack.c.bf16 %v3410_v29, %v3409_v6  ;;  %4599 = vmatprep.subr.bf16.mxu0 %v5087_v1 }
0x1402   :  { %4584 = vmatmul.mubr.msk.bf16.gmra.mrb[144].mxu1 %vm187_vm2, %v3421_v3 }
0x1403   :  { %4587 = vmatprep.mubr.msk.bf16.mxu1 %vm5088_vm0, %v5087_v1  ;;  %4600 = vmatpush3.bf16.msra.mxu0 %v4763_v9 }
0x1404   :  { %4601 = vmatprep.subr.bf16.mxu0 %v5087_v1 }
0x1407   :  { %4602 = vmatpush3.bf16.msra.mxu0 %v4764_v33 }
0x1408   :  { %4603 = vmatprep.subr.bf16.mxu0 %v5087_v1 }
0x140b   :  { %4604 = vmatpush3.bf16.msra.mxu0 %v4765_v30 }
0x140c   :  { %4605 = vmatprep.subr.bf16.mxu0 %v5087_v1 }
0x140f   :  { %4606 = vmatpush3.bf16.msra.mxu0 %v4766_v54 }
0x1424   :  { %v3325_v58 = vpop.xlane.xlu1 %3324 }
0x1425   :  { %v3333_v31 = vmul.f32 0.03125, %v3325_v58 }
0x1426   :  { %v3328_v0 = vpop.xlane.xlu0 %3327 }
0x1427   :  { %v3339_v55 = vsub.f32 %v3305_v19, %v3333_v31  ;;  %v3334_v4 = vmul.f32 0.03125, %v3328_v0 }
0x1429   :  { %v3340_v36 = vsub.f32 %v3306_v57, %v3334_v4  ;;  %v3345_v16 = vmul.f32 %v3339_v55, %v3339_v55 }
0x142b   :  { %v3359_v27 = vsel %vm187_vm2, %v3345_v16, 0.0  ;;  %v3346_v17 = vmul.f32 %v3340_v36, %v3340_v36 }
0x142c   :  { %3360 = vadd.xlane.f32.xlu1 %v3359_v27 }
0x142d   :  { %v3362_v25 = vsel %vm187_vm2, %v3346_v17, 0.0 }
0x142e   :  { %3363 = vadd.xlane.f32.xlu0 %v3362_v25 }
0x14b9   :  { %v3361_v11 = vpop.xlane.xlu1 %3360 }
0x14ba   :  { %v3369_v47 = vmul.f32 0.03125, %v3361_v11 }
0x14bb   :  { %v3364_v2 = vpop.xlane.xlu0 %3363 }
0x14bc   :  { %v3375_v45 = vadd.f32 1e-06, %v3369_v47  ;;  %v3370_v19 = vmul.f32 0.03125, %v3364_v2 }
0x14be   :  { %5027 = vrsqrt.f32 %v3375_v45  ;;  %v3376_v28 = vadd.f32 1e-06, %v3370_v19 }
0x14c0   :  { %5029 = vrsqrt.f32 %v3376_v28 }
0x14c8   :  { %v5028_v53 = vpop.eup %5027 }
0x14c9   :  { %v3387_v57 = vmul.f32 %v5028_v53, %v3339_v55 }
0x14ca   :  { %v5030_v23 = vpop.eup %5029 }
0x14cb   :  { %v3388_v52 = vmul.f32 %v5030_v23, %v3340_v36  ;;  %v3484_v8 = vpop.f32.mrb[140].mxu1  ;;  %v3399_v14 = vmul.f32 %v6781_v26, %v3387_v57 }
0x14cc   :  { %v6842_v35 = vadd.f32 %v6838_v44, %v3484_v8  ;;  %v4581_v34 = vpop.f32.mrb[141].mxu1 }
0x14cd   :  { %v3487_v51 = vpop.f32.mrb[142].mxu1  ;;  %v3400_v10 = vmul.f32 %v6781_v26, %v3388_v52  ;;  %v3411_v13 = vadd.f32 %v6787_v41, %v3399_v14 }
0x14ce   :  { %v6846_v40 = vmul.f32 0.70710677, %v6842_v35  ;;  %v6849_v56 = vadd.f32 %v6838_v44, %v3487_v51  ;;  %v4582_v20 = vpop.f32.mrb[143].mxu1 }
0x14cf   :  { %v3412_v21 = vadd.f32 %v6787_v41, %v3400_v10 }
0x14d0   :  { %v3531_v48 = vand.u32 2147483647, %v6846_v40  ;;  %v6855_v37 = vmul.f32 0.70710677, %v6849_v56  ;;  %vm3519_vm12 = vcmp.ge.f32.partialorder %v6846_v40, 0.0 }
0x14d1   :  { %v3422_v24 = vpack.c.bf16 %v3412_v21, %v3411_v13 }
0x14d2   :  { %v3537_v43 = vmul.f32 0.3275911, %v3531_v48  ;;  %v3532_v26 = vand.u32 2147483647, %v6855_v37  ;;  %v3615_v6 = vsub.f32 0.0, %v3531_v48  ;;  %vm3520_vm13 = vcmp.ge.f32.partialorder %v6855_v37, 0.0 }
0x14d3   :  { %4588 = vmatmul.mubr.msk.bf16.gmra.mrb[148].mxu1 %vm187_vm2, %v3422_v24  ;;  %v3526_v40 = vsel %vm3520_vm13, 1.0, %v5103_v32  ;;  %vm3803_vm2 = vcmask 1040384  }
0x14d4   :  { %v3543_v12 = vadd.f32 1.0, %v3537_v43  ;;  %v3538_v38 = vmul.f32 0.3275911, %v3532_v26  ;;  %v3616_v31 = vsub.f32 0.0, %v3532_v26  ;;  %v3621_v4 = vmul.f32 %v3615_v6, %v3531_v48 }
0x14d5   :  { %v3492_v63 = vpop.f32.mrb[144].mxu1 }
0x14d6   :  { %5031 = vrcp.f32 %v3543_v12  ;;  %v3544_v5 = vadd.f32 1.0, %v3538_v38  ;;  %v4585_v15 = vpop.f32.mrb[145].mxu1  ;;  %v6860_v22 = vadd.f32 %v6838_v44, %v3492_v63  ;;  %v3622_v25 = vmul.f32 %v3616_v31, %v3532_v26 }
0x14d7   :  { %v3495_v41 = vpop.f32.mrb[146].mxu1  ;;  %v3627_v46 = vmul.f32 1.442695, %v3621_v4 }
0x14d8   :  { %v6863_v59 = vadd.f32 %v6838_v44, %v3495_v41  ;;  %v4586_v61 = vpop.f32.mrb[147].mxu1  ;;  %5033 = vrcp.f32 %v3544_v5  ;;  %v6866_v7 = vmul.f32 0.70710677, %v6860_v22  ;;  %v3629_v33 = vmul.f32 1.442695, %v3622_v25 }
0x14da   :  { %v6869_v42 = vmul.f32 0.70710677, %v6863_v59  ;;  %v3533_v50 = vand.u32 2147483647, %v6866_v7  ;;  %vm3521_vm14 = vcmp.ge.f32.partialorder %v6866_v7, 0.0  ;;  %v3509_v7 = vmul.f32 0.5, %v6860_v22 }
0x14dc   :  { %v3534_v29 = vand.u32 2147483647, %v6869_v42  ;;  %v3539_v3 = vmul.f32 0.3275911, %v3533_v50  ;;  %v3617_v30 = vsub.f32 0.0, %v3533_v50  ;;  %vm3522_vm15 = vcmp.ge.f32.partialorder %v6869_v42, 0.0 }
0x14de   :  { %v3540_v58 = vmul.f32 0.3275911, %v3534_v29  ;;  %v3545_v0 = vadd.f32 1.0, %v3539_v3  ;;  %v3618_v11 = vsub.f32 0.0, %v3534_v29  ;;  %v3623_v28 = vmul.f32 %v3617_v30, %v3533_v50 }
0x14df   :  { %v3525_v3 = vsel %vm3519_vm12, 1.0, %v5103_v32 }
0x14e0   :  { %v5032_v55 = vpop.eup %5031  ;;  %v3546_v36 = vadd.f32 1.0, %v3540_v58  ;;  %5035 = vrcp.f32 %v3545_v0  ;;  %v3624_v52 = vmul.f32 %v3618_v11, %v3534_v29  ;;  %v3631_v20 = vmul.f32 1.442695, %v3623_v28 }
0x14e1   :  { %v3561_v16 = vmul.f32 1.0614054, %v5032_v55 }
0x14e2   :  { %5037 = vrcp.f32 %v3546_v36  ;;  %v5034_v27 = vpop.eup %5033  ;;  %v3633_v24 = vmul.f32 1.442695, %v3624_v52  ;;  %v3510_v52 = vmul.f32 0.5, %v6863_v59 }
0x14e3   :  { %v3567_v17 = vadd.f32 -1.4531521, %v3561_v16  ;;  %v3562_v49 = vmul.f32 1.0614054, %v5034_v27  ;;  %5039 = vpow2.f32 %v3627_v46 }
0x14e4   :  { %5041 = vpow2.f32 %v3629_v33 }
0x14e5   :  { %v3573_v18 = vmul.f32 %v5032_v55, %v3567_v17  ;;  %v3568_v62 = vadd.f32 -1.4531521, %v3562_v49  ;;  %5043 = vpow2.f32 %v3631_v20  ;;  %v3507_v49 = vmul.f32 0.5, %v6842_v35 }
0x14e6   :  { %5045 = vpow2.f32 %v3633_v24 }
0x14e7   :  { %v3579_v9 = vadd.f32 1.4214138, %v3573_v18  ;;  %v3574_v54 = vmul.f32 %v5034_v27, %v3568_v62  ;;  %v3508_v18 = vmul.f32 0.5, %v6849_v56  ;;  %v3528_v56 = vsel %vm3522_vm15, 1.0, %v5103_v32 }
0x14e9   :  { %v3585_v47 = vmul.f32 %v5032_v55, %v3579_v9  ;;  %v3580_v2 = vadd.f32 1.4214138, %v3574_v54 }
0x14ea   :  { %v5036_v45 = vpop.eup %5035 }
0x14eb   :  { %v3591_v19 = vadd.f32 -0.28449672, %v3585_v47  ;;  %v3586_v57 = vmul.f32 %v5034_v27, %v3580_v2  ;;  %v3563_v23 = vmul.f32 1.0614054, %v5036_v45 }
0x14ec   :  { %v5038_v53 = vpop.eup %5037 }
0x14ed   :  { %v3597_v8 = vmul.f32 %v5032_v55, %v3591_v19  ;;  %v3564_v14 = vmul.f32 1.0614054, %v5038_v53  ;;  %v3592_v34 = vadd.f32 -0.28449672, %v3586_v57  ;;  %v3569_v51 = vadd.f32 -1.4531521, %v3563_v23  ;;  %v5040_v12 = vpop.eup %5039 }
0x14ee   :  { %v5042_v50 = vpop.eup %5041  ;;  %v3527_v57 = vsel %vm3521_vm14, 1.0, %v5103_v32 }
0x14ef   :  { %v3603_v10 = vadd.f32 0.2548296, %v3597_v8  ;;  %v3570_v13 = vadd.f32 -1.4531521, %v3564_v14  ;;  %v3598_v21 = vmul.f32 %v5034_v27, %v3592_v34  ;;  %v3575_v48 = vmul.f32 %v5036_v45, %v3569_v51  ;;  %v5044_v37 = vpop.eup %5043 }
0x14f0   :  { %v5046_v30 = vpop.eup %5045 }
0x14f1   :  { %v3609_v43 = vmul.f32 %v5032_v55, %v3603_v10  ;;  %v3576_v26 = vmul.f32 %v5038_v53, %v3570_v13  ;;  %v3604_v38 = vadd.f32 0.2548296, %v3598_v21  ;;  %v3581_v63 = vadd.f32 1.4214138, %v3575_v48 }
0x14f3   :  { %v3639_v5 = vmul.f32 %v5040_v12, %v3609_v43  ;;  %v3582_v15 = vadd.f32 1.4214138, %v3576_v26  ;;  %v3610_v41 = vmul.f32 %v5034_v27, %v3604_v38  ;;  %v3587_v61 = vmul.f32 %v5036_v45, %v3581_v63 }
0x14f5   :  { %v3645_v6 = vsub.f32 1.0, %v3639_v5  ;;  %v3588_v29 = vmul.f32 %v5038_v53, %v3582_v15  ;;  %v3640_v58 = vmul.f32 %v5042_v50, %v3610_v41  ;;  %v3593_v31 = vadd.f32 -0.28449672, %v3587_v61 }
0x14f7   :  { %v3651_v0 = vmul.f32 %v3645_v6, %v3525_v3  ;;  %v3594_v55 = vadd.f32 -0.28449672, %v3588_v29  ;;  %v3646_v4 = vsub.f32 1.0, %v3640_v58  ;;  %v3599_v36 = vmul.f32 %v5036_v45, %v3593_v31 }
0x14f9   :  { %v3600_v16 = vmul.f32 %v5038_v53, %v3594_v55  ;;  %v3657_v17 = vadd.f32 1.0, %v3651_v0  ;;  %v3652_v27 = vmul.f32 %v3646_v4, %v3526_v40  ;;  %v3605_v25 = vadd.f32 0.2548296, %v3599_v36 }
0x14fb   :  { %v3606_v46 = vadd.f32 0.2548296, %v3600_v16  ;;  %v3658_v62 = vadd.f32 1.0, %v3652_v27  ;;  %v3611_v9 = vmul.f32 %v5036_v45, %v3605_v25  ;;  %v3663_v54 = vmul.f32 %v3657_v17, %v3507_v49 }
0x14fd   :  { %v3612_v33 = vmul.f32 %v5038_v53, %v3606_v46  ;;  %v3664_v11 = vmul.f32 %v3658_v62, %v3508_v18  ;;  %v3641_v47 = vmul.f32 %v5044_v37, %v3611_v9 }
0x14ff   :  { %v3642_v2 = vmul.f32 %v5046_v30, %v3612_v33  ;;  %v3688_v19 = vpack.c.bf16 %v3664_v11, %v3663_v54  ;;  %v3647_v28 = vsub.f32 1.0, %v3641_v47 }
0x1501   :  { %v3648_v35 = vsub.f32 1.0, %v3642_v2  ;;  %v3653_v23 = vmul.f32 %v3647_v28, %v3527_v57  ;;  %4608 = vmatmul.mubr.bf16.vlgmr.msra.gmra.mrb[136].mxu0 %v3688_v19 }
0x1502   :  { %4611 = vmatprep.mubr.msk.bf16.mxu0 %vm5088_vm0, %v5087_v1 }
0x1503   :  { %v3654_v45 = vmul.f32 %v3648_v35, %v3528_v56  ;;  %v3659_v53 = vadd.f32 1.0, %v3653_v23 }
0x1505   :  { %v3660_v42 = vadd.f32 1.0, %v3654_v45  ;;  %v3665_v8 = vmul.f32 %v3659_v53, %v3509_v7 }
0x1507   :  { %v3666_v14 = vmul.f32 %v3660_v42, %v3510_v52 }
0x1509   :  { %v3689_v34 = vpack.c.bf16 %v3666_v14, %v3665_v8 }
0x150b   :  { %4612 = vmatmul.mubr.bf16.gmra.mrb[140].mxu0 %v3689_v34 }
0x150c   :  { %4615 = vmatprep.mubr.msk.bf16.mxu0 %vm5088_vm0, %v5087_v1 }
0x15a6   :  { %v3500_v51 = vpop.f32.mrb[148].mxu1 }
0x15a7   :  { %v3501_v10 = vadd.f32 %v6838_v44, %v3500_v51  ;;  %v4589_v20 = vpop.f32.mrb[149].mxu1  ;;  %v3996_v51 = vld [vmem:[%s6934_s15 + $0x1] ss:$0 sm:$0xff] }
0x15a8   :  { %v3503_v13 = vpop.f32.mrb[150].mxu1 }
0x15a9   :  { %v3517_v21 = vmul.f32 0.70710677, %v3501_v10  ;;  %v3504_v48 = vadd.f32 %v6838_v44, %v3503_v13  ;;  %v4590_v24 = vpop.f32.mrb[151].mxu1  ;;  %v3511_v45 = vmul.f32 0.5, %v3501_v10 }
0x15ab   :  { %v3535_v22 = vand.u32 2147483647, %v3517_v21  ;;  %v3518_v43 = vmul.f32 0.70710677, %v3504_v48  ;;  %vm3523_vm0 = vcmp.ge.f32.partialorder %v3517_v21, 0.0  ;;  %v3512_v53 = vmul.f32 0.5, %v3504_v48 }
0x15ac   :  { %v3529_v11 = vsel %vm3523_vm0, 1.0, %v5103_v32 }
0x15ad   :  { %v3541_v59 = vmul.f32 0.3275911, %v3535_v22  ;;  %v3536_v26 = vand.u32 2147483647, %v3518_v43  ;;  %v3619_v5 = vsub.f32 0.0, %v3535_v22  ;;  %vm3524_vm1 = vcmp.ge.f32.partialorder %v3518_v43, 0.0 }
0x15ae   :  { %v3530_v28 = vsel %vm3524_vm1, 1.0, %v5103_v32 }
0x15af   :  { %v3547_v12 = vadd.f32 1.0, %v3541_v59  ;;  %v3542_v38 = vmul.f32 0.3275911, %v3536_v26  ;;  %v3620_v1 = vsub.f32 0.0, %v3536_v26  ;;  %v3625_v41 = vmul.f32 %v3619_v5, %v3535_v22 }
0x15b1   :  { %5047 = vrcp.f32 %v3547_v12  ;;  %v3548_v63 = vadd.f32 1.0, %v3542_v38  ;;  %v3626_v29 = vmul.f32 %v3620_v1, %v3536_v26  ;;  %v3635_v3 = vmul.f32 1.442695, %v3625_v41 }
0x15b3   :  { %5049 = vrcp.f32 %v3548_v63  ;;  %v3637_v55 = vmul.f32 1.442695, %v3626_v29 }
0x15b4   :  { %5051 = vpow2.f32 %v3635_v3  ;;  %v4005_v3 = vld [vmem:[%s6935_s16] ss:$0 sm:$0xff] }
0x15b5   :  { %5053 = vpow2.f32 %v3637_v55 }
0x15bb   :  { %v5048_v15 = vpop.eup %5047 }
0x15bc   :  { %v3565_v61 = vmul.f32 1.0614054, %v5048_v15 }
0x15bd   :  { %v5050_v50 = vpop.eup %5049 }
0x15be   :  { %v3571_v6 = vadd.f32 -1.4531521, %v3565_v61  ;;  %v3566_v44 = vmul.f32 1.0614054, %v5050_v50  ;;  %v5052_v62 = vpop.eup %5051 }
0x15bf   :  { %v5054_v30 = vpop.eup %5053 }
0x15c0   :  { %v3577_v58 = vmul.f32 %v5048_v15, %v3571_v6  ;;  %v3572_v31 = vadd.f32 -1.4531521, %v3566_v44 }
0x15c2   :  { %v3583_v0 = vadd.f32 1.4214138, %v3577_v58  ;;  %v3578_v4 = vmul.f32 %v5050_v50, %v3572_v31  ;;  %v4006_v58 = vld [vmem:[%s6936_s17] ss:$0 sm:$0xff] }
0x15c4   :  { %v3589_v36 = vmul.f32 %v5048_v15, %v3583_v0  ;;  %v3584_v40 = vadd.f32 1.4214138, %v3578_v4 }
0x15c6   :  { %v3595_v16 = vadd.f32 -0.28449672, %v3589_v36  ;;  %v3590_v17 = vmul.f32 %v5050_v50, %v3584_v40 }
0x15c8   :  { %v3601_v27 = vmul.f32 %v5048_v15, %v3595_v16  ;;  %v3596_v25 = vadd.f32 -0.28449672, %v3590_v17 }
0x15ca   :  { %v3607_v46 = vadd.f32 0.2548296, %v3601_v27  ;;  %v3602_v49 = vmul.f32 %v5050_v50, %v3596_v25 }
0x15cc   :  { %v3613_v18 = vmul.f32 %v5048_v15, %v3607_v46  ;;  %v3608_v9 = vadd.f32 0.2548296, %v3602_v49 }
0x15ce   :  { %v3643_v37 = vmul.f32 %v5052_v62, %v3613_v18  ;;  %v3614_v33 = vmul.f32 %v5050_v50, %v3608_v9 }
0x15d0   :  { %v3649_v54 = vsub.f32 1.0, %v3643_v37  ;;  %v3644_v47 = vmul.f32 %v5054_v30, %v3614_v33 }
0x15d2   :  { %v3655_v2 = vmul.f32 %v3649_v54, %v3529_v11  ;;  %v3650_v19 = vsub.f32 1.0, %v3644_v47 }
0x15d4   :  { %v3661_v57 = vadd.f32 1.0, %v3655_v2  ;;  %v3656_v35 = vmul.f32 %v3650_v19, %v3530_v28  ;;  %v3779_v23 = vpop.f32.mrb[136].mxu0 }
0x15d5   :  { %v4609_v56 = vpop.f32.mrb[137].mxu0  ;;  %v3780_v21 = vadd.f32 %v3996_v51, %v3779_v23 }
0x15d6   :  { %v3662_v7 = vadd.f32 1.0, %v3656_v35  ;;  %v3782_v52 = vpop.f32.mrb[138].mxu0  ;;  %v3667_v8 = vmul.f32 %v3661_v57, %v3511_v45 }
0x15d7   :  { %v4610_v42 = vpop.f32.mrb[139].mxu0  ;;  %v3798_v48 = vadd.f32 %v3780_v21, %v6736_v39 }
0x15d8   :  { %v3668_v14 = vmul.f32 %v3662_v7, %v3512_v53 }
0x15da   :  { %v3690_v34 = vpack.c.bf16 %v3668_v14, %v3667_v8 }
0x15dc   :  { %4616 = vmatmul.mubr.bf16.gmra.mrb[144].mxu0 %v3690_v34 }
0x15de   :  { %v3786_v20 = vpop.f32.mrb[140].mxu0 }
0x15df   :  { %v4613_v13 = vpop.f32.mrb[141].mxu0 }
0x15e0   :  { %v3788_v32 = vpop.f32.mrb[142].mxu0 }
0x15e1   :  { %v3789_v24 = vadd.f32 %v3996_v51, %v3788_v32  ;;  %v4614_v22 = vpop.f32.mrb[143].mxu0 }
0x15e3   :  { %v3799_v10 = vadd.f32 %v3789_v24, %v6754_v60 }
0x15e5   :  { %v3801_v43 = vrot.slane %v3799_v10, 7 }
0x15e7   :  { %v3804_v59 = vsel %vm3803_vm2, %v3798_v48, %v3801_v43 }
0x15e8   :  { %v3808_v26 = vsel %vm3807_vm3, %v3804_v59, 0.0 }
0x15e9   :  { %3809 = vadd.xlane.f32.xlu1 %v3808_v26 }
0x1676   :  { %v3810_v12 = vpop.xlane.xlu1 %3809 }
0x1677   :  { %v3811_v38 = vmul.f32 0.03125, %v3810_v12 }
0x1679   :  { %v3812_v63 = vsub.f32 %v3804_v59, %v3811_v38 }
0x167b   :  { %v3813_v5 = vmul.f32 %v3812_v63, %v3812_v63 }
0x167d   :  { %v3814_v1 = vsel %vm3807_vm3, %v3813_v5, 0.0 }
0x167e   :  { %3815 = vadd.xlane.f32.xlu0 %v3814_v1 }
0x16af   :  { %v3793_v15 = vpop.f32.mrb[144].mxu0 }
0x16b0   :  { %v4617_v41 = vpop.f32.mrb[145].mxu0 }
0x16b1   :  { %v3795_v61 = vpop.f32.mrb[146].mxu0 }
0x16b2   :  { %v4618_v60 = vpop.f32.mrb[147].mxu0 }
0x170b   :  { %v3816_v50 = vpop.xlane.xlu0 %3815 }
0x170c   :  { %v3817_v6 = vmul.f32 0.03125, %v3816_v50 }
0x170e   :  { %v3818_v39 = vadd.f32 1e-06, %v3817_v6 }
0x1710   :  { %5055 = vrsqrt.f32 %v3818_v39 }
0x171a   :  { %v5056_v29 = vpop.eup %5055 }
0x171b   :  { %v3820_v44 = vmul.f32 %v5056_v29, %v3812_v63 }
0x171d   :  { %v3827_v31 = vmul.f32 %v4005_v3, %v3820_v44 }
0x171f   :  { %v3834_v0 = vadd.f32 %v4006_v58, %v3827_v31 }
0x1721   :  { %3835 = vst.msk [vmem:[#allocation2] sm:$0x3] %vm3807_vm3, %v3834_v0 }
0x1722   :  { %5074 = shalt.err (!%p5071_p4)
}
0x1723   :  { %s5075_s10 = scalar_lea.hbm %s6937_s18, 32 }
0x1724   :  { %p5076_p5 = scmp.ne.s32.totalorder %s6937_s18, %s5075_s10  ;;  %p5079_p6 = scmp.lt.u32.totalorder %s5075_s10, %s6937_s18 }
0x1726   :  { %p5081_p7 = pnand %p5079_p6, %p5076_p5 }
0x1728   :  { %5084 = shalt.err (!%p5081_p7)
}
0x1729   :  { %3845 = dma.vmem_to_hbm [thread:$0]  %s3843_s24, 32, %s6937_s18, [#allocation3]  }
0x172a   :  { %5085 = dma.done.wait [#allocation3], 32  }
0x172b   :  { %5086 = vsyncadd [#allocation3], 4294967264 }
0x172c   :  { %3849 = vsyncpa [#allocation3], 1 }

</bundles_post_ra>
